<compile_context>
chip_gen: v7x
topology: tpu7x:2x2x1
jax: 0.10.0
libtpu: 0.0.40
codegen_flags: <defaults>
</compile_context>

<pallas_src>
import jax
import jax.numpy as jnp
from jax.experimental import pallas as pl
from jax.experimental.pallas import tpu as pltpu

# ---------------- model dimensions (small, deterministic) ----------------
B = 2
IMG = 32
PATCH = 16
IN_CH = 3                         # USE_RGBD = False -> first 3 channels
GRID = IMG // PATCH
N_PATCH = GRID * GRID             # 4 patches
N_TOK = N_PATCH + 1               # + cls token = 5
N_PAD = 8                         # token axis padded to one f32 sublane tile
EMBED_DIM = 128
DEPTH = 2
NUM_HEADS = 4
HEAD_DIM = EMBED_DIM // NUM_HEADS
MLP_DIM = 4 * EMBED_DIM
TEXT_LEN = 8
HIDDEN_DIM = 128                  # hidden_dim of the prediction MLP heads
NUM_TIMESTEPS = 10
OUT_DIM = 6 + 3 + 1 + NUM_TIMESTEPS + 1 + 1   # 22 (torch.cat column order)
OUT_PAD = 128                     # lane-dense padded output width
PATCH_K = IN_CH * PATCH * PATCH   # 768
LN_EPS = 1e-6
ATTN_SCALE = float(HEAD_DIM) ** -0.5
XATTN_SCALE = float(EMBED_DIM) ** -0.5

BN = B * N_PAD                    # 16 rows: batch-folded token axis
BT = B * TEXT_LEN                 # 16 rows: batch-folded text tokens
N_MLP_HEADS = 5                   # fingertips / force / grip / width / yaw
HID_ALL = N_MLP_HEADS * HIDDEN_DIM       # 640

# per-layer matrix slab (DEPTH, 128, A_LANES) bf16, lane layout:
#   [ wqkv(384) | wproj(128) | w1(512) | xwq(128) | xwk(128) | xwv(128) | xwo(128) ]
A_QKV, A_PROJ, A_W1, A_XQ, A_XK, A_XV, A_XO, A_LANES = (
    0, 384, 512, 1024, 1152, 1280, 1408, 1536)
# per-layer vector slab (DEPTH, V_LANES) f32, lane layout:
#   [ ln1g | ln1b | bqkv(384) | bproj | ln2g | ln2b | b1(512) | b2 ]
V_LN1G, V_LN1B, V_BQKV, V_BPROJ, V_LN2G, V_LN2B, V_B1, V_B2, V_LANES = (
    0, 128, 256, 640, 768, 896, 1024, 1536, 1664)
# head matrix slab (128, 768) bf16: [ hw1(640) | hwc(128) ]
# head vector slab (1, 1024) f32:   [ norm_g | norm_b | hb1(640) | hb(128) ]


# ---------------- in-kernel helpers (f32 math) ----------------
def _ln(x, g, b):
    mu = jnp.mean(x, axis=-1, keepdims=True)
    xc = x - mu
    var = jnp.mean(xc * xc, axis=-1, keepdims=True)
    return xc * jax.lax.rsqrt(var + LN_EPS) * g + b


def _softmax_last(s):
    s = s - jnp.max(s, axis=-1, keepdims=True)
    p = jnp.exp(s)
    # EUP approximate reciprocal instead of a VALU divide.
    return p * pl.reciprocal(jnp.sum(p, axis=-1, keepdims=True), approx=True)


# ---------------- the single fused kernel (whole batch, one invocation) ----------------
def _fused_forward_kernel(patches_ref, txt_ref, pw_ref, xinit_ref, mats_ref,
                          w2_ref, vec_ref, hmat_ref, hw2_ref, hvec_ref, o_ref):
    f32, bf16 = jnp.float32, jnp.bfloat16

    # ---- patch_embed (Conv2d k=s=16 lowered to im2col matmul) + _pos_embed ----
    # Padded rows (row 0 = cls slot, rows 5..7) carry zero patches; cls token,
    # pos embeds and the conv bias are folded offline into x_init.
    pe = jnp.dot(patches_ref[...].astype(bf16), pw_ref[...],
                 preferred_element_type=f32)                        # (BN, D)
    x = pe + xinit_ref[...]                                         # (BN, D) f32
    txt_bf = txt_ref[...].astype(bf16)                              # (BT, D)

    # key-padding bias for self-attention: padded token columns -> -1e30
    key_ids = jax.lax.broadcasted_iota(jnp.int32, (1, 1, N_PAD), 2)
    key_bias = jnp.where(key_ids < N_TOK, 0.0, -1e30).astype(f32)   # (1, 1, N_PAD)

    # norm_pre is Identity (timm ViT with num_classes=0).
    for layer in range(DEPTH):
        ln1g = vec_ref[layer:layer + 1, V_LN1G:V_LN1B]
        ln1b = vec_ref[layer:layer + 1, V_LN1B:V_BQKV]
        bqkv = vec_ref[layer:layer + 1, V_BQKV:V_BPROJ]
        bproj = vec_ref[layer:layer + 1, V_BPROJ:V_LN2G]
        ln2g = vec_ref[layer:layer + 1, V_LN2G:V_LN2B]
        ln2b = vec_ref[layer:layer + 1, V_LN2B:V_B1]
        b1 = vec_ref[layer:layer + 1, V_B1:V_B2]
        b2 = vec_ref[layer:layer + 1, V_B2:V_LANES]

        # --- self-attention (ATTN_SCALE pre-folded into wqkv / bqkv Q slots) ---
        h = _ln(x, ln1g, ln1b)
        wqkv = mats_ref[layer, :, A_QKV:A_PROJ]                     # (D, 3D) bf16
        qkv = jnp.dot(h.astype(bf16), wqkv,
                      preferred_element_type=f32) + bqkv            # (BN, 3D) f32
        wproj = mats_ref[layer, :, A_PROJ:A_W1]                     # (D, D) bf16, rows head-major

        attn_rows = []
        for bi in range(B):
            qkv_b = qkv[bi * N_PAD:(bi + 1) * N_PAD]                # (N_PAD, 3D)
            q = jnp.stack([qkv_b[:, hi * HEAD_DIM:(hi + 1) * HEAD_DIM]
                           for hi in range(NUM_HEADS)], axis=0)     # (H, N, hd)
            k = jnp.stack([qkv_b[:, EMBED_DIM + hi * HEAD_DIM:
                                 EMBED_DIM + (hi + 1) * HEAD_DIM]
                           for hi in range(NUM_HEADS)], axis=0)
            v = jnp.stack([qkv_b[:, 2 * EMBED_DIM + hi * HEAD_DIM:
                                 2 * EMBED_DIM + (hi + 1) * HEAD_DIM]
                           for hi in range(NUM_HEADS)], axis=0)
            s = jnp.einsum('hnd,hmd->hnm', q, k,
                           preferred_element_type=f32) + key_bias   # (H, N, N)
            p = _softmax_last(s)
            o = jnp.einsum('hnm,hmd->hnd', p, v,
                           preferred_element_type=f32)              # (H, N, hd)
            # output projection without a lane concat: per-head K=32 dots accumulated
            proj = jnp.dot(o[0].astype(bf16), wproj[0:HEAD_DIM, :],
                           preferred_element_type=f32)
            for hi in range(1, NUM_HEADS):
                proj = proj + jnp.dot(
                    o[hi].astype(bf16),
                    wproj[hi * HEAD_DIM:(hi + 1) * HEAD_DIM, :],
                    preferred_element_type=f32)
            attn_rows.append(proj)                                  # (N_PAD, D)
        x = x + jnp.concatenate(attn_rows, axis=0) + bproj          # (BN, D)

        # --- MLP ---
        hmid = _ln(x, ln2g, ln2b)
        w1 = mats_ref[layer, :, A_W1:A_XQ]                          # (D, MLP) bf16
        w2 = w2_ref[layer * MLP_DIM:(layer + 1) * MLP_DIM, :]       # (MLP, D) bf16
        hmid = jnp.dot(hmid.astype(bf16), w1, preferred_element_type=f32) + b1
        # TODO(synk): timm ViT uses exact (erf) GELU; tanh approximation used here.
        hmid = jax.nn.gelu(hmid, approximate=True)
        x = x + jnp.dot(hmid.astype(bf16), w2, preferred_element_type=f32) + b2

        # --- xattn text conditioning (XATTN_SCALE pre-folded into xwq) ---
        # TODO(synk): the external AttentionTextConditioner (with its text encoder)
        # is replaced by residual cross-attention over synthetic text-token embeddings.
        xwq = mats_ref[layer, :, A_XQ:A_XK]
        xwk = mats_ref[layer, :, A_XK:A_XV]
        xwv = mats_ref[layer, :, A_XV:A_XO]
        xwo = mats_ref[layer, :, A_XO:A_LANES]
        q2 = jnp.dot(x.astype(bf16), xwq, preferred_element_type=f32)    # (BN, D)
        k2 = jnp.dot(txt_bf, xwk, preferred_element_type=f32)            # (BT, D)
        v2 = jnp.dot(txt_bf, xwv, preferred_element_type=f32)            # (BT, D)
        xa_rows = []
        for bi in range(B):
            q2b = q2[bi * N_PAD:(bi + 1) * N_PAD]
            k2b = k2[bi * TEXT_LEN:(bi + 1) * TEXT_LEN]
            v2b = v2[bi * TEXT_LEN:(bi + 1) * TEXT_LEN]
            s2 = jnp.einsum('nd,td->nt', q2b, k2b, preferred_element_type=f32)
            xa_rows.append(jnp.dot(_softmax_last(s2), v2b,
                                   preferred_element_type=f32))           # (N_PAD, D)
        xa = jnp.concatenate(xa_rows, axis=0)                             # (BN, D)
        x = x + jnp.dot(xa.astype(bf16), xwo, preferred_element_type=f32)

    # ---- final norm + prediction heads (fc_norm & head are Identity;
    #      PIXEL_SPACE_OUTPUT=False so only the cls rows are read out by the wrapper).
    norm_g = hvec_ref[:, 0:128]
    norm_b = hvec_ref[:, 128:256]
    hb1 = hvec_ref[:, 256:256 + HID_ALL]
    hb = hvec_ref[:, 256 + HID_ALL:256 + HID_ALL + OUT_PAD]
    xn = _ln(x, norm_g, norm_b)                                           # (BN, D)

    # Head weights are pre-permuted offline into the torch.cat column order
    # [fingertips(6), force(3), grip(1), timestep(10), width(1), yaw(1)] and padded
    # to 128 output lanes for a full-tile, lane-dense store.
    hw1 = hmat_ref[:, 0:HID_ALL]                                          # (D, 640) bf16
    hwc = hmat_ref[:, HID_ALL:HID_ALL + OUT_PAD]                          # (D, 128) bf16
    hid = jnp.maximum(
        jnp.dot(xn.astype(bf16), hw1, preferred_element_type=f32) + hb1, 0.0)
    y = (jnp.dot(hid.astype(bf16), hw2_ref[...], preferred_element_type=f32)
         + jnp.dot(xn.astype(bf16), hwc, preferred_element_type=f32)
         + hb)                                                            # (BN, OUT_PAD)
    o_ref[...] = y


# ---------------- wrapper ----------------
def _cost_estimate():
    mm = lambda m, k, n: 2 * m * k * n
    per_layer = (mm(BN, EMBED_DIM, 3 * EMBED_DIM)
                 + B * NUM_HEADS * (mm(N_PAD, HEAD_DIM, N_PAD)
                                    + mm(N_PAD, N_PAD, HEAD_DIM)
                                    + mm(N_PAD, HEAD_DIM, EMBED_DIM))
                 + mm(BN, EMBED_DIM, MLP_DIM) + mm(BN, MLP_DIM, EMBED_DIM)
                 + mm(BN, EMBED_DIM, EMBED_DIM)
                 + 2 * mm(BT, EMBED_DIM, EMBED_DIM)
                 + B * (mm(N_PAD, EMBED_DIM, TEXT_LEN) + mm(N_PAD, TEXT_LEN, EMBED_DIM))
                 + mm(BN, EMBED_DIM, EMBED_DIM))
    flops = (mm(BN, PATCH_K, EMBED_DIM) + DEPTH * per_layer
             + mm(BN, EMBED_DIM, HID_ALL) + mm(BN, HID_ALL, OUT_PAD)
             + mm(BN, EMBED_DIM, OUT_PAD))
    transcend = DEPTH * (B * NUM_HEADS * N_PAD * N_PAD + B * N_PAD * TEXT_LEN
                         + BN * MLP_DIM)
    bytes_accessed = (
        (BN * PATCH_K + BT * EMBED_DIM) * 4                            # f32 activations
        + (PATCH_K * EMBED_DIM + DEPTH * EMBED_DIM * A_LANES
           + DEPTH * MLP_DIM * EMBED_DIM
           + EMBED_DIM * (HID_ALL + OUT_PAD) + HID_ALL * OUT_PAD) * 2  # bf16 weight slabs
        + (BN * EMBED_DIM + DEPTH * V_LANES + 1024) * 4                # f32 vector slabs
        + BN * OUT_PAD * 4)                                            # output
    return pl.CostEstimate(flops=int(flops), transcendentals=int(transcend),
                           bytes_accessed=int(bytes_accessed))


@jax.jit
def conditioned_vit_forward(image, text_tokens, params):
    # im2col for the stride-16 Conv2d patch embedding (pure layout, done by XLA),
    # padded to N_PAD = 8 token rows per batch element (row 0 = cls slot, rows 5..7 pad).
    imgs = image[:, :IN_CH]                                   # USE_RGBD = False
    p = imgs.reshape(B, IN_CH, GRID, PATCH, GRID, PATCH)
    p = p.transpose(0, 2, 4, 1, 3, 5).reshape(B, N_PATCH, PATCH_K)
    patches = (jnp.zeros((B, N_PAD, PATCH_K), jnp.float32)
               .at[:, 1:1 + N_PATCH].set(p).reshape(BN, PATCH_K))
    txt = text_tokens.reshape(BT, EMBED_DIM).astype(jnp.float32)

    vmem = pl.BlockSpec(memory_space=pltpu.MemorySpace.VMEM)
    out = pl.pallas_call(
        _fused_forward_kernel,
        out_shape=jax.ShapeDtypeStruct((BN, OUT_PAD), jnp.float32),
        # no grid: one invocation handles the whole batch -> weights are DMA'd once,
        # whole-array single-buffered VMEM blocks, no per-step pipeline overhead.
        in_specs=[vmem] * 10,
        out_specs=vmem,
        compiler_params=pltpu.CompilerParams(vmem_limit_bytes=12 * 1024 * 1024),
        cost_estimate=_cost_estimate(),
    )(patches, txt, params["patch_w"], params["x_init"], params["mats_a"],
      params["w2"], params["vecs"], params["head_mats"], params["hw2"],
      params["head_vecs"])
    # cls row of each batch element; real 22 output columns.
    return out.reshape(B, N_PAD, OUT_PAD)[:, 0, :OUT_DIM]


# ---------------- parameters (deterministic, synthetic; offline-packed/folded) ----------------
def init_packed_params(key):
    ks = iter(jax.random.split(key, 96))

    def nrm(shape, scale=0.02):
        return (scale * jax.random.normal(next(ks), shape)).astype(jnp.float32)

    # --- patch embed + positional embeds, folded offline into x_init ---
    patch_w = nrm((PATCH_K, EMBED_DIM))
    patch_b = nrm((EMBED_DIM,))
    cls_token = nrm((EMBED_DIM,))
    pos_embed = nrm((N_TOK, EMBED_DIM))

    x_init = jnp.zeros((N_PAD, EMBED_DIM), jnp.float32)
    x_init = x_init.at[0].set(cls_token + pos_embed[0])               # cls + its pos embed
    x_init = x_init.at[1:1 + N_PATCH].set(pos_embed[1:] + patch_b)    # conv bias + pos embeds
    x_init = jnp.tile(x_init, (B, 1))                                 # (BN, D), pad rows stay 0

    # --- per-layer slabs ---
    mats_a, w2s, vecs = [], [], []
    for _ in range(DEPTH):
        wqkv = nrm((EMBED_DIM, 3 * EMBED_DIM))
        bqkv = nrm((3 * EMBED_DIM,))
        # fold ATTN_SCALE into the Q columns / Q bias (offline constant fold)
        wqkv = wqkv.at[:, :EMBED_DIM].multiply(ATTN_SCALE)
        bqkv = bqkv.at[:EMBED_DIM].multiply(ATTN_SCALE)
        wproj = nrm((EMBED_DIM, EMBED_DIM))
        bproj = nrm((EMBED_DIM,))
        w1 = nrm((EMBED_DIM, MLP_DIM))
        b1 = nrm((MLP_DIM,))
        w2 = nrm((MLP_DIM, EMBED_DIM))
        b2 = nrm((EMBED_DIM,))
        xwq = nrm((EMBED_DIM, EMBED_DIM)) * XATTN_SCALE               # fold xattn scale
        xwk = nrm((EMBED_DIM, EMBED_DIM))
        xwv = nrm((EMBED_DIM, EMBED_DIM))
        xwo = nrm((EMBED_DIM, EMBED_DIM))
        ln1g = jnp.ones((EMBED_DIM,), jnp.float32)
        ln1b = jnp.zeros((EMBED_DIM,), jnp.float32)
        ln2g = jnp.ones((EMBED_DIM,), jnp.float32)
        ln2b = jnp.zeros((EMBED_DIM,), jnp.float32)

        mats_a.append(jnp.concatenate([wqkv, wproj, w1, xwq, xwk, xwv, xwo], axis=1))
        w2s.append(w2)
        vecs.append(jnp.concatenate([ln1g, ln1b, bqkv, bproj, ln2g, ln2b, b1, b2]))

    mats_a = jnp.stack(mats_a).astype(jnp.bfloat16)                   # (DEPTH, 128, 1536)
    w2_slab = jnp.concatenate(w2s, axis=0).astype(jnp.bfloat16)       # (DEPTH*512, 128)
    vec_slab = jnp.stack(vecs)                                        # (DEPTH, 1664) f32

    # --- prediction heads, pre-permuted into the torch.cat column order
    #     [fingertips(6), force(3), grip(1), timestep(10), width(1), yaw(1)],
    #     output lanes padded to OUT_PAD=128 ---
    col_order = [("fingertips", 6), ("force", 3), ("grip", 1),
                 ("timestep", NUM_TIMESTEPS), ("width", 1), ("yaw", 1)]
    col_of, c = {}, 0
    for name, od in col_order:
        col_of[name] = (c, c + od)
        c += od
    assert c == OUT_DIM

    mlp_heads = [("fingertips", 6), ("force", 3), ("grip", 1), ("width", 1), ("yaw", 1)]
    hw1 = jnp.concatenate([nrm((EMBED_DIM, HIDDEN_DIM)) for _ in mlp_heads], axis=1)
    hb1 = jnp.concatenate([nrm((HIDDEN_DIM,)) for _ in mlp_heads])
    hw2 = jnp.zeros((HID_ALL, OUT_PAD), jnp.float32)
    hb = jnp.zeros((OUT_PAD,), jnp.float32)
    for i, (name, od) in enumerate(mlp_heads):
        lo, hi = col_of[name]
        hw2 = hw2.at[i * HIDDEN_DIM:(i + 1) * HIDDEN_DIM, lo:hi].set(nrm((HIDDEN_DIM, od)))
        hb = hb.at[lo:hi].set(nrm((od,)))
    # TODO(synk): ClassificationHead definition not provided; modeled as a single Linear.
    hwc = jnp.zeros((EMBED_DIM, OUT_PAD), jnp.float32)
    lo, hi = col_of["timestep"]
    hwc = hwc.at[:, lo:hi].set(nrm((EMBED_DIM, NUM_TIMESTEPS)))
    hb = hb.at[lo:hi].set(nrm((NUM_TIMESTEPS,)))

    norm_g = jnp.ones((EMBED_DIM,), jnp.float32)
    norm_b = jnp.zeros((EMBED_DIM,), jnp.float32)

    return {
        "patch_w": patch_w.astype(jnp.bfloat16),                           # (768, 128)
        "x_init": x_init,                                                  # (16, 128) f32
        "mats_a": mats_a,                                                  # (2, 128, 1536) bf16
        "w2": w2_slab,                                                     # (1024, 128) bf16
        "vecs": vec_slab,                                                  # (2, 1664) f32
        "head_mats": jnp.concatenate([hw1, hwc], axis=1).astype(jnp.bfloat16),  # (128, 768)
        "hw2": hw2.astype(jnp.bfloat16),                                   # (640, 128)
        "head_vecs": jnp.concatenate([norm_g, norm_b, hb1, hb]).reshape(1, -1),  # (1, 1024) f32
    }


if __name__ == "__main__":
    key = jax.random.PRNGKey(0)
    k_img, k_txt, k_par = jax.random.split(key, 3)

    # RGBD image in NCHW (PyTorch convention); only the first 3 channels are used.
    image = jax.random.normal(k_img, (B, 4, IMG, IMG), jnp.float32)
    # synthetic text-token embeddings (stand-in for the external text encoder)
    text_tokens = jax.random.normal(k_txt, (B, TEXT_LEN, EMBED_DIM), jnp.float32) * 0.1

    params = init_packed_params(k_par)

    out = conditioned_vit_forward(image, text_tokens, params)
    out = jax.block_until_ready(out)
    assert out.shape == (B, OUT_DIM) and out.dtype == jnp.float32
    assert bool(jnp.all(jnp.isfinite(out)))
    print("KERNEL_OK")
</pallas_src>

<mosaic_0001>
module attributes {stable_mosaic.version = 11 : i64} {
  func.func @_fused_forward_kernel(%arg0: memref<16x768xf32, #tpu.memory_space<vmem>>, %arg1: memref<16x128xf32, #tpu.memory_space<vmem>>, %arg2: memref<768x128xbf16, #tpu.memory_space<vmem>>, %arg3: memref<16x128xf32, #tpu.memory_space<vmem>>, %arg4: memref<2x128x1536xbf16, #tpu.memory_space<vmem>>, %arg5: memref<1024x128xbf16, #tpu.memory_space<vmem>>, %arg6: memref<2x1664xf32, #tpu.memory_space<vmem>>, %arg7: memref<128x768xbf16, #tpu.memory_space<vmem>>, %arg8: memref<640x128xbf16, #tpu.memory_space<vmem>>, %arg9: memref<1x1024xf32, #tpu.memory_space<vmem>>, %arg10: memref<16x128xf32, #tpu.memory_space<vmem>>) attributes {dimension_semantics = [], scalar_prefetch = 0 : i64, scratch_operands = 0 : i64, tpu.core_type = #tpu.core_type<tc>} {
    %c0 = arith.constant 0 : index
    %c0_0 = arith.constant 0 : index
    %0 = vector.load %arg0[%c0, %c0_0] : memref<16x768xf32, #tpu.memory_space<vmem>>, vector<16x768xf32>
    %1 = arith.truncf %0 : vector<16x768xf32> to vector<16x768xbf16>
    %c0_1 = arith.constant 0 : index
    %c0_2 = arith.constant 0 : index
    %2 = vector.load %arg2[%c0_1, %c0_2] : memref<768x128xbf16, #tpu.memory_space<vmem>>, vector<768x128xbf16>
    %cst = arith.constant dense<0.000000e+00> : vector<16x128xf32>
    %3 = tpu.matmul %1, %2, %cst {dimension_numbers = #tpu.dot_dimension_numbers<[1], [0], [0], [1], [0, 0, 1, 1], [], []>} : vector<16x768xbf16>, vector<768x128xbf16>, vector<16x128xf32> -> vector<16x128xf32>
    %c0_3 = arith.constant 0 : index
    %c0_4 = arith.constant 0 : index
    %4 = vector.load %arg3[%c0_3, %c0_4] : memref<16x128xf32, #tpu.memory_space<vmem>>, vector<16x128xf32>
    %5 = arith.addf %3, %4 : vector<16x128xf32>
    %c0_5 = arith.constant 0 : index
    %c0_6 = arith.constant 0 : index
    %6 = vector.load %arg1[%c0_5, %c0_6] : memref<16x128xf32, #tpu.memory_space<vmem>>, vector<16x128xf32>
    %7 = arith.truncf %6 : vector<16x128xf32> to vector<16x128xbf16>
    %8 = tpu.iota {dimensions = array<i32: 2>} : vector<1x1x8xi32>
    %c5_i32 = arith.constant 5 : i32
    %9 = vector.broadcast %c5_i32 : i32 to vector<1x1x8xi32>
    %10 = arith.cmpi slt, %8, %9 : vector<1x1x8xi32>
    %cst_7 = arith.constant 0.000000e+00 : f32
    %cst_8 = arith.constant -1.000000e+30 : f32
    %11 = vector.broadcast %cst_7 : f32 to vector<1x1x8xf32>
    %12 = vector.broadcast %cst_8 : f32 to vector<1x1x8xf32>
    %13 = arith.select %10, %11, %12 : vector<1x1x8xi1>, vector<1x1x8xf32>
    %c0_9 = arith.constant 0 : index
    %c0_10 = arith.constant 0 : index
    %14 = vector.load %arg6[%c0_9, %c0_10] : memref<2x1664xf32, #tpu.memory_space<vmem>>, vector<1x128xf32>
    %c0_11 = arith.constant 0 : index
    %c128 = arith.constant 128 : index
    %15 = vector.load %arg6[%c0_11, %c128] : memref<2x1664xf32, #tpu.memory_space<vmem>>, vector<1x128xf32>
    %c0_12 = arith.constant 0 : index
    %c256 = arith.constant 256 : index
    %16 = vector.load %arg6[%c0_12, %c256] : memref<2x1664xf32, #tpu.memory_space<vmem>>, vector<1x384xf32>
    %c0_13 = arith.constant 0 : index
    %c640 = arith.constant 640 : index
    %17 = vector.load %arg6[%c0_13, %c640] : memref<2x1664xf32, #tpu.memory_space<vmem>>, vector<1x128xf32>
    %c0_14 = arith.constant 0 : index
    %c768 = arith.constant 768 : index
    %18 = vector.load %arg6[%c0_14, %c768] : memref<2x1664xf32, #tpu.memory_space<vmem>>, vector<1x128xf32>
    %c0_15 = arith.constant 0 : index
    %c896 = arith.constant 896 : index
    %19 = vector.load %arg6[%c0_15, %c896] : memref<2x1664xf32, #tpu.memory_space<vmem>>, vector<1x128xf32>
    %c0_16 = arith.constant 0 : index
    %c1024 = arith.constant 1024 : index
    %20 = vector.load %arg6[%c0_16, %c1024] : memref<2x1664xf32, #tpu.memory_space<vmem>>, vector<1x512xf32>
    %c0_17 = arith.constant 0 : index
    %c1536 = arith.constant 1536 : index
    %21 = vector.load %arg6[%c0_17, %c1536] : memref<2x1664xf32, #tpu.memory_space<vmem>>, vector<1x128xf32>
    %cst_18 = arith.constant dense<0.000000e+00> : vector<16xf32>
    %22 = vector.multi_reduction <add>, %5, %cst_18 [1] : vector<16x128xf32> to vector<16xf32>
    %23 = vector.shape_cast %22 : vector<16xf32> to vector<16x1xf32>
    %cst_19 = arith.constant 1.280000e+02 : f32
    %24 = vector.broadcast %cst_19 : f32 to vector<16x1xf32>
    %25 = arith.divf %23, %24 : vector<16x1xf32>
    %26 = vector.broadcast %25 : vector<16x1xf32> to vector<16x128xf32>
    %27 = arith.subf %5, %26 : vector<16x128xf32>
    %28 = arith.mulf %27, %27 : vector<16x128xf32>
    %cst_20 = arith.constant dense<0.000000e+00> : vector<16xf32>
    %29 = vector.multi_reduction <add>, %28, %cst_20 [1] : vector<16x128xf32> to vector<16xf32>
    %30 = vector.shape_cast %29 : vector<16xf32> to vector<16x1xf32>
    %cst_21 = arith.constant 1.280000e+02 : f32
    %31 = vector.broadcast %cst_21 : f32 to vector<16x1xf32>
    %32 = arith.divf %30, %31 : vector<16x1xf32>
    %cst_22 = arith.constant 9.99999997E-7 : f32
    %33 = vector.broadcast %cst_22 : f32 to vector<16x1xf32>
    %34 = arith.addf %32, %33 : vector<16x1xf32>
    %35 = math.rsqrt %34 : vector<16x1xf32>
    %36 = vector.broadcast %35 : vector<16x1xf32> to vector<16x128xf32>
    %37 = arith.mulf %27, %36 : vector<16x128xf32>
    %38 = vector.broadcast %14 : vector<1x128xf32> to vector<16x128xf32>
    %39 = arith.mulf %37, %38 : vector<16x128xf32>
    %40 = vector.broadcast %15 : vector<1x128xf32> to vector<16x128xf32>
    %41 = arith.addf %39, %40 : vector<16x128xf32>
    %c0_23 = arith.constant 0 : index
    %c0_24 = arith.constant 0 : index
    %c0_25 = arith.constant 0 : index
    %42 = vector.load %arg4[%c0_23, %c0_24, %c0_25] : memref<2x128x1536xbf16, #tpu.memory_space<vmem>>, vector<1x128x384xbf16>
    %43 = vector.shape_cast %42 : vector<1x128x384xbf16> to vector<128x384xbf16>
    %44 = arith.truncf %41 : vector<16x128xf32> to vector<16x128xbf16>
    %cst_26 = arith.constant dense<0.000000e+00> : vector<16x384xf32>
    %45 = tpu.matmul %44, %43, %cst_26 {dimension_numbers = #tpu.dot_dimension_numbers<[1], [0], [0], [1], [0, 0, 1, 1], [], []>} : vector<16x128xbf16>, vector<128x384xbf16>, vector<16x384xf32> -> vector<16x384xf32>
    %46 = vector.broadcast %16 : vector<1x384xf32> to vector<16x384xf32>
    %47 = arith.addf %45, %46 : vector<16x384xf32>
    %c0_27 = arith.constant 0 : index
    %c0_28 = arith.constant 0 : index
    %c384 = arith.constant 384 : index
    %48 = vector.load %arg4[%c0_27, %c0_28, %c384] : memref<2x128x1536xbf16, #tpu.memory_space<vmem>>, vector<1x128x128xbf16>
    %49 = vector.shape_cast %48 : vector<1x128x128xbf16> to vector<128x128xbf16>
    %50 = vector.extract_strided_slice %47 {offsets = [0, 0], sizes = [8, 384], strides = [1, 1]} : vector<16x384xf32> to vector<8x384xf32>
    %51 = vector.extract_strided_slice %50 {offsets = [0, 0], sizes = [8, 32], strides = [1, 1]} : vector<8x384xf32> to vector<8x32xf32>
    %52 = vector.extract_strided_slice %50 {offsets = [0, 32], sizes = [8, 32], strides = [1, 1]} : vector<8x384xf32> to vector<8x32xf32>
    %53 = vector.extract_strided_slice %50 {offsets = [0, 64], sizes = [8, 32], strides = [1, 1]} : vector<8x384xf32> to vector<8x32xf32>
    %54 = vector.extract_strided_slice %50 {offsets = [0, 96], sizes = [8, 32], strides = [1, 1]} : vector<8x384xf32> to vector<8x32xf32>
    %55 = vector.shape_cast %51 : vector<8x32xf32> to vector<1x8x32xf32>
    %56 = vector.shape_cast %52 : vector<8x32xf32> to vector<1x8x32xf32>
    %57 = vector.shape_cast %53 : vector<8x32xf32> to vector<1x8x32xf32>
    %58 = vector.shape_cast %54 : vector<8x32xf32> to vector<1x8x32xf32>
    %59 = tpu.concatenate %55, %56, %57, %58 in 0 : vector<1x8x32xf32>, vector<1x8x32xf32>, vector<1x8x32xf32>, vector<1x8x32xf32> -> vector<4x8x32xf32>
    %60 = vector.extract_strided_slice %50 {offsets = [0, 128], sizes = [8, 32], strides = [1, 1]} : vector<8x384xf32> to vector<8x32xf32>
    %61 = vector.extract_strided_slice %50 {offsets = [0, 160], sizes = [8, 32], strides = [1, 1]} : vector<8x384xf32> to vector<8x32xf32>
    %62 = vector.extract_strided_slice %50 {offsets = [0, 192], sizes = [8, 32], strides = [1, 1]} : vector<8x384xf32> to vector<8x32xf32>
    %63 = vector.extract_strided_slice %50 {offsets = [0, 224], sizes = [8, 32], strides = [1, 1]} : vector<8x384xf32> to vector<8x32xf32>
    %64 = vector.shape_cast %60 : vector<8x32xf32> to vector<1x8x32xf32>
    %65 = vector.shape_cast %61 : vector<8x32xf32> to vector<1x8x32xf32>
    %66 = vector.shape_cast %62 : vector<8x32xf32> to vector<1x8x32xf32>
    %67 = vector.shape_cast %63 : vector<8x32xf32> to vector<1x8x32xf32>
    %68 = tpu.concatenate %64, %65, %66, %67 in 0 : vector<1x8x32xf32>, vector<1x8x32xf32>, vector<1x8x32xf32>, vector<1x8x32xf32> -> vector<4x8x32xf32>
    %69 = vector.extract_strided_slice %50 {offsets = [0, 256], sizes = [8, 32], strides = [1, 1]} : vector<8x384xf32> to vector<8x32xf32>
    %70 = vector.extract_strided_slice %50 {offsets = [0, 288], sizes = [8, 32], strides = [1, 1]} : vector<8x384xf32> to vector<8x32xf32>
    %71 = vector.extract_strided_slice %50 {offsets = [0, 320], sizes = [8, 32], strides = [1, 1]} : vector<8x384xf32> to vector<8x32xf32>
    %72 = vector.extract_strided_slice %50 {offsets = [0, 352], sizes = [8, 32], strides = [1, 1]} : vector<8x384xf32> to vector<8x32xf32>
    %73 = vector.shape_cast %69 : vector<8x32xf32> to vector<1x8x32xf32>
    %74 = vector.shape_cast %70 : vector<8x32xf32> to vector<1x8x32xf32>
    %75 = vector.shape_cast %71 : vector<8x32xf32> to vector<1x8x32xf32>
    %76 = vector.shape_cast %72 : vector<8x32xf32> to vector<1x8x32xf32>
    %77 = tpu.concatenate %73, %74, %75, %76 in 0 : vector<1x8x32xf32>, vector<1x8x32xf32>, vector<1x8x32xf32>, vector<1x8x32xf32> -> vector<4x8x32xf32>
    "tpu.trace_start"() <{level = 10 : i32, message = "hnd,hmd->hnm"}> : () -> ()
    %cst_29 = arith.constant dense<0.000000e+00> : vector<4x8x8xf32>
    %78 = tpu.matmul %59, %68, %cst_29 {dimension_numbers = #tpu.dot_dimension_numbers<[2], [2], [1], [1], [0, 0, 0, 1, 1, 1], [0], [0]>} : vector<4x8x32xf32>, vector<4x8x32xf32>, vector<4x8x8xf32> -> vector<4x8x8xf32>
    "tpu.trace_stop"() : () -> ()
    %79 = vector.broadcast %13 : vector<1x1x8xf32> to vector<4x8x8xf32>
    %80 = arith.addf %78, %79 : vector<4x8x8xf32>
    %cst_30 = arith.constant dense<0xFF800000> : vector<4x8xf32>
    %81 = vector.multi_reduction <maximumf>, %80, %cst_30 [2] : vector<4x8x8xf32> to vector<4x8xf32>
    %82 = vector.shape_cast %81 : vector<4x8xf32> to vector<4x8x1xf32>
    %83 = vector.broadcast %82 : vector<4x8x1xf32> to vector<4x8x8xf32>
    %84 = arith.subf %80, %83 : vector<4x8x8xf32>
    %85 = math.exp %84 : vector<4x8x8xf32>
    %cst_31 = arith.constant dense<0.000000e+00> : vector<4x8xf32>
    %86 = vector.multi_reduction <add>, %85, %cst_31 [2] : vector<4x8x8xf32> to vector<4x8xf32>
    %87 = vector.shape_cast %86 : vector<4x8xf32> to vector<4x8x1xf32>
    %88 = tpu.reciprocal %87 {approx = true} : vector<4x8x1xf32> -> vector<4x8x1xf32>
    %89 = vector.broadcast %88 : vector<4x8x1xf32> to vector<4x8x8xf32>
    %90 = arith.mulf %85, %89 : vector<4x8x8xf32>
    "tpu.trace_start"() <{level = 10 : i32, message = "hnm,hmd->hnd"}> : () -> ()
    %cst_32 = arith.constant dense<0.000000e+00> : vector<4x8x32xf32>
    %91 = tpu.matmul %90, %77, %cst_32 {dimension_numbers = #tpu.dot_dimension_numbers<[2], [1], [1], [2], [0, 0, 0, 1, 1, 2], [0], [0]>} : vector<4x8x8xf32>, vector<4x8x32xf32>, vector<4x8x32xf32> -> vector<4x8x32xf32>
    "tpu.trace_stop"() : () -> ()
    %92 = vector.extract_strided_slice %91 {offsets = [0, 0, 0], sizes = [1, 8, 32], strides = [1, 1, 1]} : vector<4x8x32xf32> to vector<1x8x32xf32>
    %93 = vector.shape_cast %92 : vector<1x8x32xf32> to vector<8x32xf32>
    %94 = arith.truncf %93 : vector<8x32xf32> to vector<8x32xbf16>
    %95 = vector.extract_strided_slice %49 {offsets = [0, 0], sizes = [32, 128], strides = [1, 1]} : vector<128x128xbf16> to vector<32x128xbf16>
    %cst_33 = arith.constant dense<0.000000e+00> : vector<8x128xf32>
    %96 = tpu.matmul %94, %95, %cst_33 {dimension_numbers = #tpu.dot_dimension_numbers<[1], [0], [0], [1], [0, 0, 1, 1], [], []>} : vector<8x32xbf16>, vector<32x128xbf16>, vector<8x128xf32> -> vector<8x128xf32>
    %97 = vector.extract_strided_slice %91 {offsets = [1, 0, 0], sizes = [1, 8, 32], strides = [1, 1, 1]} : vector<4x8x32xf32> to vector<1x8x32xf32>
    %98 = vector.shape_cast %97 : vector<1x8x32xf32> to vector<8x32xf32>
    %99 = arith.truncf %98 : vector<8x32xf32> to vector<8x32xbf16>
    %100 = vector.extract_strided_slice %49 {offsets = [32, 0], sizes = [32, 128], strides = [1, 1]} : vector<128x128xbf16> to vector<32x128xbf16>
    %cst_34 = arith.constant dense<0.000000e+00> : vector<8x128xf32>
    %101 = tpu.matmul %99, %100, %cst_34 {dimension_numbers = #tpu.dot_dimension_numbers<[1], [0], [0], [1], [0, 0, 1, 1], [], []>} : vector<8x32xbf16>, vector<32x128xbf16>, vector<8x128xf32> -> vector<8x128xf32>
    %102 = arith.addf %96, %101 : vector<8x128xf32>
    %103 = vector.extract_strided_slice %91 {offsets = [2, 0, 0], sizes = [1, 8, 32], strides = [1, 1, 1]} : vector<4x8x32xf32> to vector<1x8x32xf32>
    %104 = vector.shape_cast %103 : vector<1x8x32xf32> to vector<8x32xf32>
    %105 = arith.truncf %104 : vector<8x32xf32> to vector<8x32xbf16>
    %106 = vector.extract_strided_slice %49 {offsets = [64, 0], sizes = [32, 128], strides = [1, 1]} : vector<128x128xbf16> to vector<32x128xbf16>
    %cst_35 = arith.constant dense<0.000000e+00> : vector<8x128xf32>
    %107 = tpu.matmul %105, %106, %cst_35 {dimension_numbers = #tpu.dot_dimension_numbers<[1], [0], [0], [1], [0, 0, 1, 1], [], []>} : vector<8x32xbf16>, vector<32x128xbf16>, vector<8x128xf32> -> vector<8x128xf32>
    %108 = arith.addf %102, %107 : vector<8x128xf32>
    %109 = vector.extract_strided_slice %91 {offsets = [3, 0, 0], sizes = [1, 8, 32], strides = [1, 1, 1]} : vector<4x8x32xf32> to vector<1x8x32xf32>
    %110 = vector.shape_cast %109 : vector<1x8x32xf32> to vector<8x32xf32>
    %111 = arith.truncf %110 : vector<8x32xf32> to vector<8x32xbf16>
    %112 = vector.extract_strided_slice %49 {offsets = [96, 0], sizes = [32, 128], strides = [1, 1]} : vector<128x128xbf16> to vector<32x128xbf16>
    %cst_36 = arith.constant dense<0.000000e+00> : vector<8x128xf32>
    %113 = tpu.matmul %111, %112, %cst_36 {dimension_numbers = #tpu.dot_dimension_numbers<[1], [0], [0], [1], [0, 0, 1, 1], [], []>} : vector<8x32xbf16>, vector<32x128xbf16>, vector<8x128xf32> -> vector<8x128xf32>
    %114 = arith.addf %108, %113 : vector<8x128xf32>
    %115 = vector.extract_strided_slice %47 {offsets = [8, 0], sizes = [8, 384], strides = [1, 1]} : vector<16x384xf32> to vector<8x384xf32>
    %116 = vector.extract_strided_slice %115 {offsets = [0, 0], sizes = [8, 32], strides = [1, 1]} : vector<8x384xf32> to vector<8x32xf32>
    %117 = vector.extract_strided_slice %115 {offsets = [0, 32], sizes = [8, 32], strides = [1, 1]} : vector<8x384xf32> to vector<8x32xf32>
    %118 = vector.extract_strided_slice %115 {offsets = [0, 64], sizes = [8, 32], strides = [1, 1]} : vector<8x384xf32> to vector<8x32xf32>
    %119 = vector.extract_strided_slice %115 {offsets = [0, 96], sizes = [8, 32], strides = [1, 1]} : vector<8x384xf32> to vector<8x32xf32>
    %120 = vector.shape_cast %116 : vector<8x32xf32> to vector<1x8x32xf32>
    %121 = vector.shape_cast %117 : vector<8x32xf32> to vector<1x8x32xf32>
    %122 = vector.shape_cast %118 : vector<8x32xf32> to vector<1x8x32xf32>
    %123 = vector.shape_cast %119 : vector<8x32xf32> to vector<1x8x32xf32>
    %124 = tpu.concatenate %120, %121, %122, %123 in 0 : vector<1x8x32xf32>, vector<1x8x32xf32>, vector<1x8x32xf32>, vector<1x8x32xf32> -> vector<4x8x32xf32>
    %125 = vector.extract_strided_slice %115 {offsets = [0, 128], sizes = [8, 32], strides = [1, 1]} : vector<8x384xf32> to vector<8x32xf32>
    %126 = vector.extract_strided_slice %115 {offsets = [0, 160], sizes = [8, 32], strides = [1, 1]} : vector<8x384xf32> to vector<8x32xf32>
    %127 = vector.extract_strided_slice %115 {offsets = [0, 192], sizes = [8, 32], strides = [1, 1]} : vector<8x384xf32> to vector<8x32xf32>
    %128 = vector.extract_strided_slice %115 {offsets = [0, 224], sizes = [8, 32], strides = [1, 1]} : vector<8x384xf32> to vector<8x32xf32>
    %129 = vector.shape_cast %125 : vector<8x32xf32> to vector<1x8x32xf32>
    %130 = vector.shape_cast %126 : vector<8x32xf32> to vector<1x8x32xf32>
    %131 = vector.shape_cast %127 : vector<8x32xf32> to vector<1x8x32xf32>
    %132 = vector.shape_cast %128 : vector<8x32xf32> to vector<1x8x32xf32>
    %133 = tpu.concatenate %129, %130, %131, %132 in 0 : vector<1x8x32xf32>, vector<1x8x32xf32>, vector<1x8x32xf32>, vector<1x8x32xf32> -> vector<4x8x32xf32>
    %134 = vector.extract_strided_slice %115 {offsets = [0, 256], sizes = [8, 32], strides = [1, 1]} : vector<8x384xf32> to vector<8x32xf32>
    %135 = vector.extract_strided_slice %115 {offsets = [0, 288], sizes = [8, 32], strides = [1, 1]} : vector<8x384xf32> to vector<8x32xf32>
    %136 = vector.extract_strided_slice %115 {offsets = [0, 320], sizes = [8, 32], strides = [1, 1]} : vector<8x384xf32> to vector<8x32xf32>
    %137 = vector.extract_strided_slice %115 {offsets = [0, 352], sizes = [8, 32], strides = [1, 1]} : vector<8x384xf32> to vector<8x32xf32>
    %138 = vector.shape_cast %134 : vector<8x32xf32> to vector<1x8x32xf32>
    %139 = vector.shape_cast %135 : vector<8x32xf32> to vector<1x8x32xf32>
    %140 = vector.shape_cast %136 : vector<8x32xf32> to vector<1x8x32xf32>
    %141 = vector.shape_cast %137 : vector<8x32xf32> to vector<1x8x32xf32>
    %142 = tpu.concatenate %138, %139, %140, %141 in 0 : vector<1x8x32xf32>, vector<1x8x32xf32>, vector<1x8x32xf32>, vector<1x8x32xf32> -> vector<4x8x32xf32>
    "tpu.trace_start"() <{level = 10 : i32, message = "hnd,hmd->hnm"}> : () -> ()
    %cst_37 = arith.constant dense<0.000000e+00> : vector<4x8x8xf32>
    %143 = tpu.matmul %124, %133, %cst_37 {dimension_numbers = #tpu.dot_dimension_numbers<[2], [2], [1], [1], [0, 0, 0, 1, 1, 1], [0], [0]>} : vector<4x8x32xf32>, vector<4x8x32xf32>, vector<4x8x8xf32> -> vector<4x8x8xf32>
    "tpu.trace_stop"() : () -> ()
    %144 = vector.broadcast %13 : vector<1x1x8xf32> to vector<4x8x8xf32>
    %145 = arith.addf %143, %144 : vector<4x8x8xf32>
    %cst_38 = arith.constant dense<0xFF800000> : vector<4x8xf32>
    %146 = vector.multi_reduction <maximumf>, %145, %cst_38 [2] : vector<4x8x8xf32> to vector<4x8xf32>
    %147 = vector.shape_cast %146 : vector<4x8xf32> to vector<4x8x1xf32>
    %148 = vector.broadcast %147 : vector<4x8x1xf32> to vector<4x8x8xf32>
    %149 = arith.subf %145, %148 : vector<4x8x8xf32>
    %150 = math.exp %149 : vector<4x8x8xf32>
    %cst_39 = arith.constant dense<0.000000e+00> : vector<4x8xf32>
    %151 = vector.multi_reduction <add>, %150, %cst_39 [2] : vector<4x8x8xf32> to vector<4x8xf32>
    %152 = vector.shape_cast %151 : vector<4x8xf32> to vector<4x8x1xf32>
    %153 = tpu.reciprocal %152 {approx = true} : vector<4x8x1xf32> -> vector<4x8x1xf32>
    %154 = vector.broadcast %153 : vector<4x8x1xf32> to vector<4x8x8xf32>
    %155 = arith.mulf %150, %154 : vector<4x8x8xf32>
    "tpu.trace_start"() <{level = 10 : i32, message = "hnm,hmd->hnd"}> : () -> ()
    %cst_40 = arith.constant dense<0.000000e+00> : vector<4x8x32xf32>
    %156 = tpu.matmul %155, %142, %cst_40 {dimension_numbers = #tpu.dot_dimension_numbers<[2], [1], [1], [2], [0, 0, 0, 1, 1, 2], [0], [0]>} : vector<4x8x8xf32>, vector<4x8x32xf32>, vector<4x8x32xf32> -> vector<4x8x32xf32>
    "tpu.trace_stop"() : () -> ()
    %157 = vector.extract_strided_slice %156 {offsets = [0, 0, 0], sizes = [1, 8, 32], strides = [1, 1, 1]} : vector<4x8x32xf32> to vector<1x8x32xf32>
    %158 = vector.shape_cast %157 : vector<1x8x32xf32> to vector<8x32xf32>
    %159 = arith.truncf %158 : vector<8x32xf32> to vector<8x32xbf16>
    %160 = vector.extract_strided_slice %49 {offsets = [0, 0], sizes = [32, 128], strides = [1, 1]} : vector<128x128xbf16> to vector<32x128xbf16>
    %cst_41 = arith.constant dense<0.000000e+00> : vector<8x128xf32>
    %161 = tpu.matmul %159, %160, %cst_41 {dimension_numbers = #tpu.dot_dimension_numbers<[1], [0], [0], [1], [0, 0, 1, 1], [], []>} : vector<8x32xbf16>, vector<32x128xbf16>, vector<8x128xf32> -> vector<8x128xf32>
    %162 = vector.extract_strided_slice %156 {offsets = [1, 0, 0], sizes = [1, 8, 32], strides = [1, 1, 1]} : vector<4x8x32xf32> to vector<1x8x32xf32>
    %163 = vector.shape_cast %162 : vector<1x8x32xf32> to vector<8x32xf32>
    %164 = arith.truncf %163 : vector<8x32xf32> to vector<8x32xbf16>
    %165 = vector.extract_strided_slice %49 {offsets = [32, 0], sizes = [32, 128], strides = [1, 1]} : vector<128x128xbf16> to vector<32x128xbf16>
    %cst_42 = arith.constant dense<0.000000e+00> : vector<8x128xf32>
    %166 = tpu.matmul %164, %165, %cst_42 {dimension_numbers = #tpu.dot_dimension_numbers<[1], [0], [0], [1], [0, 0, 1, 1], [], []>} : vector<8x32xbf16>, vector<32x128xbf16>, vector<8x128xf32> -> vector<8x128xf32>
    %167 = arith.addf %161, %166 : vector<8x128xf32>
    %168 = vector.extract_strided_slice %156 {offsets = [2, 0, 0], sizes = [1, 8, 32], strides = [1, 1, 1]} : vector<4x8x32xf32> to vector<1x8x32xf32>
    %169 = vector.shape_cast %168 : vector<1x8x32xf32> to vector<8x32xf32>
    %170 = arith.truncf %169 : vector<8x32xf32> to vector<8x32xbf16>
    %171 = vector.extract_strided_slice %49 {offsets = [64, 0], sizes = [32, 128], strides = [1, 1]} : vector<128x128xbf16> to vector<32x128xbf16>
    %cst_43 = arith.constant dense<0.000000e+00> : vector<8x128xf32>
    %172 = tpu.matmul %170, %171, %cst_43 {dimension_numbers = #tpu.dot_dimension_numbers<[1], [0], [0], [1], [0, 0, 1, 1], [], []>} : vector<8x32xbf16>, vector<32x128xbf16>, vector<8x128xf32> -> vector<8x128xf32>
    %173 = arith.addf %167, %172 : vector<8x128xf32>
    %174 = vector.extract_strided_slice %156 {offsets = [3, 0, 0], sizes = [1, 8, 32], strides = [1, 1, 1]} : vector<4x8x32xf32> to vector<1x8x32xf32>
    %175 = vector.shape_cast %174 : vector<1x8x32xf32> to vector<8x32xf32>
    %176 = arith.truncf %175 : vector<8x32xf32> to vector<8x32xbf16>
    %177 = vector.extract_strided_slice %49 {offsets = [96, 0], sizes = [32, 128], strides = [1, 1]} : vector<128x128xbf16> to vector<32x128xbf16>
    %cst_44 = arith.constant dense<0.000000e+00> : vector<8x128xf32>
    %178 = tpu.matmul %176, %177, %cst_44 {dimension_numbers = #tpu.dot_dimension_numbers<[1], [0], [0], [1], [0, 0, 1, 1], [], []>} : vector<8x32xbf16>, vector<32x128xbf16>, vector<8x128xf32> -> vector<8x128xf32>
    %179 = arith.addf %173, %178 : vector<8x128xf32>
    %180 = tpu.concatenate %114, %179 in 0 : vector<8x128xf32>, vector<8x128xf32> -> vector<16x128xf32>
    %181 = arith.addf %5, %180 : vector<16x128xf32>
    %182 = vector.broadcast %17 : vector<1x128xf32> to vector<16x128xf32>
    %183 = arith.addf %181, %182 : vector<16x128xf32>
    %cst_45 = arith.constant dense<0.000000e+00> : vector<16xf32>
    %184 = vector.multi_reduction <add>, %183, %cst_45 [1] : vector<16x128xf32> to vector<16xf32>
    %185 = vector.shape_cast %184 : vector<16xf32> to vector<16x1xf32>
    %cst_46 = arith.constant 1.280000e+02 : f32
    %186 = vector.broadcast %cst_46 : f32 to vector<16x1xf32>
    %187 = arith.divf %185, %186 : vector<16x1xf32>
    %188 = vector.broadcast %187 : vector<16x1xf32> to vector<16x128xf32>
    %189 = arith.subf %183, %188 : vector<16x128xf32>
    %190 = arith.mulf %189, %189 : vector<16x128xf32>
    %cst_47 = arith.constant dense<0.000000e+00> : vector<16xf32>
    %191 = vector.multi_reduction <add>, %190, %cst_47 [1] : vector<16x128xf32> to vector<16xf32>
    %192 = vector.shape_cast %191 : vector<16xf32> to vector<16x1xf32>
    %cst_48 = arith.constant 1.280000e+02 : f32
    %193 = vector.broadcast %cst_48 : f32 to vector<16x1xf32>
    %194 = arith.divf %192, %193 : vector<16x1xf32>
    %cst_49 = arith.constant 9.99999997E-7 : f32
    %195 = vector.broadcast %cst_49 : f32 to vector<16x1xf32>
    %196 = arith.addf %194, %195 : vector<16x1xf32>
    %197 = math.rsqrt %196 : vector<16x1xf32>
    %198 = vector.broadcast %197 : vector<16x1xf32> to vector<16x128xf32>
    %199 = arith.mulf %189, %198 : vector<16x128xf32>
    %200 = vector.broadcast %18 : vector<1x128xf32> to vector<16x128xf32>
    %201 = arith.mulf %199, %200 : vector<16x128xf32>
    %202 = vector.broadcast %19 : vector<1x128xf32> to vector<16x128xf32>
    %203 = arith.addf %201, %202 : vector<16x128xf32>
    %c0_50 = arith.constant 0 : index
    %c0_51 = arith.constant 0 : index
    %c512 = arith.constant 512 : index
    %204 = vector.load %arg4[%c0_50, %c0_51, %c512] : memref<2x128x1536xbf16, #tpu.memory_space<vmem>>, vector<1x128x512xbf16>
    %205 = vector.shape_cast %204 : vector<1x128x512xbf16> to vector<128x512xbf16>
    %c0_52 = arith.constant 0 : index
    %c0_53 = arith.constant 0 : index
    %206 = vector.load %arg5[%c0_52, %c0_53] : memref<1024x128xbf16, #tpu.memory_space<vmem>>, vector<512x128xbf16>
    %207 = arith.truncf %203 : vector<16x128xf32> to vector<16x128xbf16>
    %cst_54 = arith.constant dense<0.000000e+00> : vector<16x512xf32>
    %208 = tpu.matmul %207, %205, %cst_54 {dimension_numbers = #tpu.dot_dimension_numbers<[1], [0], [0], [1], [0, 0, 1, 1], [], []>} : vector<16x128xbf16>, vector<128x512xbf16>, vector<16x512xf32> -> vector<16x512xf32>
    %209 = vector.broadcast %20 : vector<1x512xf32> to vector<16x512xf32>
    %210 = arith.addf %208, %209 : vector<16x512xf32>
    %211 = arith.mulf %210, %210 : vector<16x512xf32>
    %212 = arith.mulf %210, %211 : vector<16x512xf32>
    %cst_55 = arith.constant 4.471500e-02 : f32
    %213 = vector.broadcast %cst_55 : f32 to vector<16x512xf32>
    %214 = arith.mulf %213, %212 : vector<16x512xf32>
    %215 = arith.addf %210, %214 : vector<16x512xf32>
    %cst_56 = arith.constant 0.797884583 : f32
    %216 = vector.broadcast %cst_56 : f32 to vector<16x512xf32>
    %217 = arith.mulf %216, %215 : vector<16x512xf32>
    %218 = math.tanh %217 : vector<16x512xf32>
    %cst_57 = arith.constant 1.000000e+00 : f32
    %219 = vector.broadcast %cst_57 : f32 to vector<16x512xf32>
    %220 = arith.addf %219, %218 : vector<16x512xf32>
    %cst_58 = arith.constant 5.000000e-01 : f32
    %221 = vector.broadcast %cst_58 : f32 to vector<16x512xf32>
    %222 = arith.mulf %221, %220 : vector<16x512xf32>
    %223 = arith.mulf %210, %222 : vector<16x512xf32>
    %224 = arith.truncf %223 : vector<16x512xf32> to vector<16x512xbf16>
    %cst_59 = arith.constant dense<0.000000e+00> : vector<16x128xf32>
    %225 = tpu.matmul %224, %206, %cst_59 {dimension_numbers = #tpu.dot_dimension_numbers<[1], [0], [0], [1], [0, 0, 1, 1], [], []>} : vector<16x512xbf16>, vector<512x128xbf16>, vector<16x128xf32> -> vector<16x128xf32>
    %226 = arith.addf %183, %225 : vector<16x128xf32>
    %227 = vector.broadcast %21 : vector<1x128xf32> to vector<16x128xf32>
    %228 = arith.addf %226, %227 : vector<16x128xf32>
    %c0_60 = arith.constant 0 : index
    %c0_61 = arith.constant 0 : index
    %c1024_62 = arith.constant 1024 : index
    %229 = vector.load %arg4[%c0_60, %c0_61, %c1024_62] : memref<2x128x1536xbf16, #tpu.memory_space<vmem>>, vector<1x128x128xbf16>
    %230 = vector.shape_cast %229 : vector<1x128x128xbf16> to vector<128x128xbf16>
    %c0_63 = arith.constant 0 : index
    %c0_64 = arith.constant 0 : index
    %c1152 = arith.constant 1152 : index
    %231 = vector.load %arg4[%c0_63, %c0_64, %c1152] : memref<2x128x1536xbf16, #tpu.memory_space<vmem>>, vector<1x128x128xbf16>
    %232 = vector.shape_cast %231 : vector<1x128x128xbf16> to vector<128x128xbf16>
    %c0_65 = arith.constant 0 : index
    %c0_66 = arith.constant 0 : index
    %c1280 = arith.constant 1280 : index
    %233 = vector.load %arg4[%c0_65, %c0_66, %c1280] : memref<2x128x1536xbf16, #tpu.memory_space<vmem>>, vector<1x128x128xbf16>
    %234 = vector.shape_cast %233 : vector<1x128x128xbf16> to vector<128x128xbf16>
    %c0_67 = arith.constant 0 : index
    %c0_68 = arith.constant 0 : index
    %c1408 = arith.constant 1408 : index
    %235 = vector.load %arg4[%c0_67, %c0_68, %c1408] : memref<2x128x1536xbf16, #tpu.memory_space<vmem>>, vector<1x128x128xbf16>
    %236 = vector.shape_cast %235 : vector<1x128x128xbf16> to vector<128x128xbf16>
    %237 = arith.truncf %228 : vector<16x128xf32> to vector<16x128xbf16>
    %cst_69 = arith.constant dense<0.000000e+00> : vector<16x128xf32>
    %238 = tpu.matmul %237, %230, %cst_69 {dimension_numbers = #tpu.dot_dimension_numbers<[1], [0], [0], [1], [0, 0, 1, 1], [], []>} : vector<16x128xbf16>, vector<128x128xbf16>, vector<16x128xf32> -> vector<16x128xf32>
    %cst_70 = arith.constant dense<0.000000e+00> : vector<16x128xf32>
    %239 = tpu.matmul %7, %232, %cst_70 {dimension_numbers = #tpu.dot_dimension_numbers<[1], [0], [0], [1], [0, 0, 1, 1], [], []>} : vector<16x128xbf16>, vector<128x128xbf16>, vector<16x128xf32> -> vector<16x128xf32>
    %cst_71 = arith.constant dense<0.000000e+00> : vector<16x128xf32>
    %240 = tpu.matmul %7, %234, %cst_71 {dimension_numbers = #tpu.dot_dimension_numbers<[1], [0], [0], [1], [0, 0, 1, 1], [], []>} : vector<16x128xbf16>, vector<128x128xbf16>, vector<16x128xf32> -> vector<16x128xf32>
    %241 = vector.extract_strided_slice %238 {offsets = [0, 0], sizes = [8, 128], strides = [1, 1]} : vector<16x128xf32> to vector<8x128xf32>
    %242 = vector.extract_strided_slice %239 {offsets = [0, 0], sizes = [8, 128], strides = [1, 1]} : vector<16x128xf32> to vector<8x128xf32>
    %243 = vector.extract_strided_slice %240 {offsets = [0, 0], sizes = [8, 128], strides = [1, 1]} : vector<16x128xf32> to vector<8x128xf32>
    "tpu.trace_start"() <{level = 10 : i32, message = "nd,td->nt"}> : () -> ()
    %cst_72 = arith.constant dense<0.000000e+00> : vector<8x8xf32>
    %244 = tpu.matmul %241, %242, %cst_72 {dimension_numbers = #tpu.dot_dimension_numbers<[1], [1], [0], [0], [0, 0, 1, 0], [], []>} : vector<8x128xf32>, vector<8x128xf32>, vector<8x8xf32> -> vector<8x8xf32>
    "tpu.trace_stop"() : () -> ()
    %cst_73 = arith.constant dense<0xFF800000> : vector<8xf32>
    %245 = vector.multi_reduction <maximumf>, %244, %cst_73 [1] : vector<8x8xf32> to vector<8xf32>
    %246 = vector.shape_cast %245 : vector<8xf32> to vector<8x1xf32>
    %247 = vector.broadcast %246 : vector<8x1xf32> to vector<8x8xf32>
    %248 = arith.subf %244, %247 : vector<8x8xf32>
    %249 = math.exp %248 : vector<8x8xf32>
    %cst_74 = arith.constant dense<0.000000e+00> : vector<8xf32>
    %250 = vector.multi_reduction <add>, %249, %cst_74 [1] : vector<8x8xf32> to vector<8xf32>
    %251 = vector.shape_cast %250 : vector<8xf32> to vector<8x1xf32>
    %252 = tpu.reciprocal %251 {approx = true} : vector<8x1xf32> -> vector<8x1xf32>
    %253 = vector.broadcast %252 : vector<8x1xf32> to vector<8x8xf32>
    %254 = arith.mulf %249, %253 : vector<8x8xf32>
    %cst_75 = arith.constant dense<0.000000e+00> : vector<8x128xf32>
    %255 = tpu.matmul %254, %243, %cst_75 {dimension_numbers = #tpu.dot_dimension_numbers<[1], [0], [0], [1], [0, 0, 1, 1], [], []>} : vector<8x8xf32>, vector<8x128xf32>, vector<8x128xf32> -> vector<8x128xf32>
    %256 = vector.extract_strided_slice %238 {offsets = [8, 0], sizes = [8, 128], strides = [1, 1]} : vector<16x128xf32> to vector<8x128xf32>
    %257 = vector.extract_strided_slice %239 {offsets = [8, 0], sizes = [8, 128], strides = [1, 1]} : vector<16x128xf32> to vector<8x128xf32>
    %258 = vector.extract_strided_slice %240 {offsets = [8, 0], sizes = [8, 128], strides = [1, 1]} : vector<16x128xf32> to vector<8x128xf32>
    "tpu.trace_start"() <{level = 10 : i32, message = "nd,td->nt"}> : () -> ()
    %cst_76 = arith.constant dense<0.000000e+00> : vector<8x8xf32>
    %259 = tpu.matmul %256, %257, %cst_76 {dimension_numbers = #tpu.dot_dimension_numbers<[1], [1], [0], [0], [0, 0, 1, 0], [], []>} : vector<8x128xf32>, vector<8x128xf32>, vector<8x8xf32> -> vector<8x8xf32>
    "tpu.trace_stop"() : () -> ()
    %cst_77 = arith.constant dense<0xFF800000> : vector<8xf32>
    %260 = vector.multi_reduction <maximumf>, %259, %cst_77 [1] : vector<8x8xf32> to vector<8xf32>
    %261 = vector.shape_cast %260 : vector<8xf32> to vector<8x1xf32>
    %262 = vector.broadcast %261 : vector<8x1xf32> to vector<8x8xf32>
    %263 = arith.subf %259, %262 : vector<8x8xf32>
    %264 = math.exp %263 : vector<8x8xf32>
    %cst_78 = arith.constant dense<0.000000e+00> : vector<8xf32>
    %265 = vector.multi_reduction <add>, %264, %cst_78 [1] : vector<8x8xf32> to vector<8xf32>
    %266 = vector.shape_cast %265 : vector<8xf32> to vector<8x1xf32>
    %267 = tpu.reciprocal %266 {approx = true} : vector<8x1xf32> -> vector<8x1xf32>
    %268 = vector.broadcast %267 : vector<8x1xf32> to vector<8x8xf32>
    %269 = arith.mulf %264, %268 : vector<8x8xf32>
    %cst_79 = arith.constant dense<0.000000e+00> : vector<8x128xf32>
    %270 = tpu.matmul %269, %258, %cst_79 {dimension_numbers = #tpu.dot_dimension_numbers<[1], [0], [0], [1], [0, 0, 1, 1], [], []>} : vector<8x8xf32>, vector<8x128xf32>, vector<8x128xf32> -> vector<8x128xf32>
    %271 = tpu.concatenate %255, %270 in 0 : vector<8x128xf32>, vector<8x128xf32> -> vector<16x128xf32>
    %272 = arith.truncf %271 : vector<16x128xf32> to vector<16x128xbf16>
    %cst_80 = arith.constant dense<0.000000e+00> : vector<16x128xf32>
    %273 = tpu.matmul %272, %236, %cst_80 {dimension_numbers = #tpu.dot_dimension_numbers<[1], [0], [0], [1], [0, 0, 1, 1], [], []>} : vector<16x128xbf16>, vector<128x128xbf16>, vector<16x128xf32> -> vector<16x128xf32>
    %274 = arith.addf %228, %273 : vector<16x128xf32>
    %c1 = arith.constant 1 : index
    %c0_81 = arith.constant 0 : index
    %275 = vector.load %arg6[%c1, %c0_81] : memref<2x1664xf32, #tpu.memory_space<vmem>>, vector<1x128xf32>
    %c1_82 = arith.constant 1 : index
    %c128_83 = arith.constant 128 : index
    %276 = vector.load %arg6[%c1_82, %c128_83] : memref<2x1664xf32, #tpu.memory_space<vmem>>, vector<1x128xf32>
    %c1_84 = arith.constant 1 : index
    %c256_85 = arith.constant 256 : index
    %277 = vector.load %arg6[%c1_84, %c256_85] : memref<2x1664xf32, #tpu.memory_space<vmem>>, vector<1x384xf32>
    %c1_86 = arith.constant 1 : index
    %c640_87 = arith.constant 640 : index
    %278 = vector.load %arg6[%c1_86, %c640_87] : memref<2x1664xf32, #tpu.memory_space<vmem>>, vector<1x128xf32>
    %c1_88 = arith.constant 1 : index
    %c768_89 = arith.constant 768 : index
    %279 = vector.load %arg6[%c1_88, %c768_89] : memref<2x1664xf32, #tpu.memory_space<vmem>>, vector<1x128xf32>
    %c1_90 = arith.constant 1 : index
    %c896_91 = arith.constant 896 : index
    %280 = vector.load %arg6[%c1_90, %c896_91] : memref<2x1664xf32, #tpu.memory_space<vmem>>, vector<1x128xf32>
    %c1_92 = arith.constant 1 : index
    %c1024_93 = arith.constant 1024 : index
    %281 = vector.load %arg6[%c1_92, %c1024_93] : memref<2x1664xf32, #tpu.memory_space<vmem>>, vector<1x512xf32>
    %c1_94 = arith.constant 1 : index
    %c1536_95 = arith.constant 1536 : index
    %282 = vector.load %arg6[%c1_94, %c1536_95] : memref<2x1664xf32, #tpu.memory_space<vmem>>, vector<1x128xf32>
    %cst_96 = arith.constant dense<0.000000e+00> : vector<16xf32>
    %283 = vector.multi_reduction <add>, %274, %cst_96 [1] : vector<16x128xf32> to vector<16xf32>
    %284 = vector.shape_cast %283 : vector<16xf32> to vector<16x1xf32>
    %cst_97 = arith.constant 1.280000e+02 : f32
    %285 = vector.broadcast %cst_97 : f32 to vector<16x1xf32>
    %286 = arith.divf %284, %285 : vector<16x1xf32>
    %287 = vector.broadcast %286 : vector<16x1xf32> to vector<16x128xf32>
    %288 = arith.subf %274, %287 : vector<16x128xf32>
    %289 = arith.mulf %288, %288 : vector<16x128xf32>
    %cst_98 = arith.constant dense<0.000000e+00> : vector<16xf32>
    %290 = vector.multi_reduction <add>, %289, %cst_98 [1] : vector<16x128xf32> to vector<16xf32>
    %291 = vector.shape_cast %290 : vector<16xf32> to vector<16x1xf32>
    %cst_99 = arith.constant 1.280000e+02 : f32
    %292 = vector.broadcast %cst_99 : f32 to vector<16x1xf32>
    %293 = arith.divf %291, %292 : vector<16x1xf32>
    %cst_100 = arith.constant 9.99999997E-7 : f32
    %294 = vector.broadcast %cst_100 : f32 to vector<16x1xf32>
    %295 = arith.addf %293, %294 : vector<16x1xf32>
    %296 = math.rsqrt %295 : vector<16x1xf32>
    %297 = vector.broadcast %296 : vector<16x1xf32> to vector<16x128xf32>
    %298 = arith.mulf %288, %297 : vector<16x128xf32>
    %299 = vector.broadcast %275 : vector<1x128xf32> to vector<16x128xf32>
    %300 = arith.mulf %298, %299 : vector<16x128xf32>
    %301 = vector.broadcast %276 : vector<1x128xf32> to vector<16x128xf32>
    %302 = arith.addf %300, %301 : vector<16x128xf32>
    %c1_101 = arith.constant 1 : index
    %c0_102 = arith.constant 0 : index
    %c0_103 = arith.constant 0 : index
    %303 = vector.load %arg4[%c1_101, %c0_102, %c0_103] : memref<2x128x1536xbf16, #tpu.memory_space<vmem>>, vector<1x128x384xbf16>
    %304 = vector.shape_cast %303 : vector<1x128x384xbf16> to vector<128x384xbf16>
    %305 = arith.truncf %302 : vector<16x128xf32> to vector<16x128xbf16>
    %cst_104 = arith.constant dense<0.000000e+00> : vector<16x384xf32>
    %306 = tpu.matmul %305, %304, %cst_104 {dimension_numbers = #tpu.dot_dimension_numbers<[1], [0], [0], [1], [0, 0, 1, 1], [], []>} : vector<16x128xbf16>, vector<128x384xbf16>, vector<16x384xf32> -> vector<16x384xf32>
    %307 = vector.broadcast %277 : vector<1x384xf32> to vector<16x384xf32>
    %308 = arith.addf %306, %307 : vector<16x384xf32>
    %c1_105 = arith.constant 1 : index
    %c0_106 = arith.constant 0 : index
    %c384_107 = arith.constant 384 : index
    %309 = vector.load %arg4[%c1_105, %c0_106, %c384_107] : memref<2x128x1536xbf16, #tpu.memory_space<vmem>>, vector<1x128x128xbf16>
    %310 = vector.shape_cast %309 : vector<1x128x128xbf16> to vector<128x128xbf16>
    %311 = vector.extract_strided_slice %308 {offsets = [0, 0], sizes = [8, 384], strides = [1, 1]} : vector<16x384xf32> to vector<8x384xf32>
    %312 = vector.extract_strided_slice %311 {offsets = [0, 0], sizes = [8, 32], strides = [1, 1]} : vector<8x384xf32> to vector<8x32xf32>
    %313 = vector.extract_strided_slice %311 {offsets = [0, 32], sizes = [8, 32], strides = [1, 1]} : vector<8x384xf32> to vector<8x32xf32>
    %314 = vector.extract_strided_slice %311 {offsets = [0, 64], sizes = [8, 32], strides = [1, 1]} : vector<8x384xf32> to vector<8x32xf32>
    %315 = vector.extract_strided_slice %311 {offsets = [0, 96], sizes = [8, 32], strides = [1, 1]} : vector<8x384xf32> to vector<8x32xf32>
    %316 = vector.shape_cast %312 : vector<8x32xf32> to vector<1x8x32xf32>
    %317 = vector.shape_cast %313 : vector<8x32xf32> to vector<1x8x32xf32>
    %318 = vector.shape_cast %314 : vector<8x32xf32> to vector<1x8x32xf32>
    %319 = vector.shape_cast %315 : vector<8x32xf32> to vector<1x8x32xf32>
    %320 = tpu.concatenate %316, %317, %318, %319 in 0 : vector<1x8x32xf32>, vector<1x8x32xf32>, vector<1x8x32xf32>, vector<1x8x32xf32> -> vector<4x8x32xf32>
    %321 = vector.extract_strided_slice %311 {offsets = [0, 128], sizes = [8, 32], strides = [1, 1]} : vector<8x384xf32> to vector<8x32xf32>
    %322 = vector.extract_strided_slice %311 {offsets = [0, 160], sizes = [8, 32], strides = [1, 1]} : vector<8x384xf32> to vector<8x32xf32>
    %323 = vector.extract_strided_slice %311 {offsets = [0, 192], sizes = [8, 32], strides = [1, 1]} : vector<8x384xf32> to vector<8x32xf32>
    %324 = vector.extract_strided_slice %311 {offsets = [0, 224], sizes = [8, 32], strides = [1, 1]} : vector<8x384xf32> to vector<8x32xf32>
    %325 = vector.shape_cast %321 : vector<8x32xf32> to vector<1x8x32xf32>
    %326 = vector.shape_cast %322 : vector<8x32xf32> to vector<1x8x32xf32>
    %327 = vector.shape_cast %323 : vector<8x32xf32> to vector<1x8x32xf32>
    %328 = vector.shape_cast %324 : vector<8x32xf32> to vector<1x8x32xf32>
    %329 = tpu.concatenate %325, %326, %327, %328 in 0 : vector<1x8x32xf32>, vector<1x8x32xf32>, vector<1x8x32xf32>, vector<1x8x32xf32> -> vector<4x8x32xf32>
    %330 = vector.extract_strided_slice %311 {offsets = [0, 256], sizes = [8, 32], strides = [1, 1]} : vector<8x384xf32> to vector<8x32xf32>
    %331 = vector.extract_strided_slice %311 {offsets = [0, 288], sizes = [8, 32], strides = [1, 1]} : vector<8x384xf32> to vector<8x32xf32>
    %332 = vector.extract_strided_slice %311 {offsets = [0, 320], sizes = [8, 32], strides = [1, 1]} : vector<8x384xf32> to vector<8x32xf32>
    %333 = vector.extract_strided_slice %311 {offsets = [0, 352], sizes = [8, 32], strides = [1, 1]} : vector<8x384xf32> to vector<8x32xf32>
    %334 = vector.shape_cast %330 : vector<8x32xf32> to vector<1x8x32xf32>
    %335 = vector.shape_cast %331 : vector<8x32xf32> to vector<1x8x32xf32>
    %336 = vector.shape_cast %332 : vector<8x32xf32> to vector<1x8x32xf32>
    %337 = vector.shape_cast %333 : vector<8x32xf32> to vector<1x8x32xf32>
    %338 = tpu.concatenate %334, %335, %336, %337 in 0 : vector<1x8x32xf32>, vector<1x8x32xf32>, vector<1x8x32xf32>, vector<1x8x32xf32> -> vector<4x8x32xf32>
    "tpu.trace_start"() <{level = 10 : i32, message = "hnd,hmd->hnm"}> : () -> ()
    %cst_108 = arith.constant dense<0.000000e+00> : vector<4x8x8xf32>
    %339 = tpu.matmul %320, %329, %cst_108 {dimension_numbers = #tpu.dot_dimension_numbers<[2], [2], [1], [1], [0, 0, 0, 1, 1, 1], [0], [0]>} : vector<4x8x32xf32>, vector<4x8x32xf32>, vector<4x8x8xf32> -> vector<4x8x8xf32>
    "tpu.trace_stop"() : () -> ()
    %340 = vector.broadcast %13 : vector<1x1x8xf32> to vector<4x8x8xf32>
    %341 = arith.addf %339, %340 : vector<4x8x8xf32>
    %cst_109 = arith.constant dense<0xFF800000> : vector<4x8xf32>
    %342 = vector.multi_reduction <maximumf>, %341, %cst_109 [2] : vector<4x8x8xf32> to vector<4x8xf32>
    %343 = vector.shape_cast %342 : vector<4x8xf32> to vector<4x8x1xf32>
    %344 = vector.broadcast %343 : vector<4x8x1xf32> to vector<4x8x8xf32>
    %345 = arith.subf %341, %344 : vector<4x8x8xf32>
    %346 = math.exp %345 : vector<4x8x8xf32>
    %cst_110 = arith.constant dense<0.000000e+00> : vector<4x8xf32>
    %347 = vector.multi_reduction <add>, %346, %cst_110 [2] : vector<4x8x8xf32> to vector<4x8xf32>
    %348 = vector.shape_cast %347 : vector<4x8xf32> to vector<4x8x1xf32>
    %349 = tpu.reciprocal %348 {approx = true} : vector<4x8x1xf32> -> vector<4x8x1xf32>
    %350 = vector.broadcast %349 : vector<4x8x1xf32> to vector<4x8x8xf32>
    %351 = arith.mulf %346, %350 : vector<4x8x8xf32>
    "tpu.trace_start"() <{level = 10 : i32, message = "hnm,hmd->hnd"}> : () -> ()
    %cst_111 = arith.constant dense<0.000000e+00> : vector<4x8x32xf32>
    %352 = tpu.matmul %351, %338, %cst_111 {dimension_numbers = #tpu.dot_dimension_numbers<[2], [1], [1], [2], [0, 0, 0, 1, 1, 2], [0], [0]>} : vector<4x8x8xf32>, vector<4x8x32xf32>, vector<4x8x32xf32> -> vector<4x8x32xf32>
    "tpu.trace_stop"() : () -> ()
    %353 = vector.extract_strided_slice %352 {offsets = [0, 0, 0], sizes = [1, 8, 32], strides = [1, 1, 1]} : vector<4x8x32xf32> to vector<1x8x32xf32>
    %354 = vector.shape_cast %353 : vector<1x8x32xf32> to vector<8x32xf32>
    %355 = arith.truncf %354 : vector<8x32xf32> to vector<8x32xbf16>
    %356 = vector.extract_strided_slice %310 {offsets = [0, 0], sizes = [32, 128], strides = [1, 1]} : vector<128x128xbf16> to vector<32x128xbf16>
    %cst_112 = arith.constant dense<0.000000e+00> : vector<8x128xf32>
    %357 = tpu.matmul %355, %356, %cst_112 {dimension_numbers = #tpu.dot_dimension_numbers<[1], [0], [0], [1], [0, 0, 1, 1], [], []>} : vector<8x32xbf16>, vector<32x128xbf16>, vector<8x128xf32> -> vector<8x128xf32>
    %358 = vector.extract_strided_slice %352 {offsets = [1, 0, 0], sizes = [1, 8, 32], strides = [1, 1, 1]} : vector<4x8x32xf32> to vector<1x8x32xf32>
    %359 = vector.shape_cast %358 : vector<1x8x32xf32> to vector<8x32xf32>
    %360 = arith.truncf %359 : vector<8x32xf32> to vector<8x32xbf16>
    %361 = vector.extract_strided_slice %310 {offsets = [32, 0], sizes = [32, 128], strides = [1, 1]} : vector<128x128xbf16> to vector<32x128xbf16>
    %cst_113 = arith.constant dense<0.000000e+00> : vector<8x128xf32>
    %362 = tpu.matmul %360, %361, %cst_113 {dimension_numbers = #tpu.dot_dimension_numbers<[1], [0], [0], [1], [0, 0, 1, 1], [], []>} : vector<8x32xbf16>, vector<32x128xbf16>, vector<8x128xf32> -> vector<8x128xf32>
    %363 = arith.addf %357, %362 : vector<8x128xf32>
    %364 = vector.extract_strided_slice %352 {offsets = [2, 0, 0], sizes = [1, 8, 32], strides = [1, 1, 1]} : vector<4x8x32xf32> to vector<1x8x32xf32>
    %365 = vector.shape_cast %364 : vector<1x8x32xf32> to vector<8x32xf32>
    %366 = arith.truncf %365 : vector<8x32xf32> to vector<8x32xbf16>
    %367 = vector.extract_strided_slice %310 {offsets = [64, 0], sizes = [32, 128], strides = [1, 1]} : vector<128x128xbf16> to vector<32x128xbf16>
    %cst_114 = arith.constant dense<0.000000e+00> : vector<8x128xf32>
    %368 = tpu.matmul %366, %367, %cst_114 {dimension_numbers = #tpu.dot_dimension_numbers<[1], [0], [0], [1], [0, 0, 1, 1], [], []>} : vector<8x32xbf16>, vector<32x128xbf16>, vector<8x128xf32> -> vector<8x128xf32>
    %369 = arith.addf %363, %368 : vector<8x128xf32>
    %370 = vector.extract_strided_slice %352 {offsets = [3, 0, 0], sizes = [1, 8, 32], strides = [1, 1, 1]} : vector<4x8x32xf32> to vector<1x8x32xf32>
    %371 = vector.shape_cast %370 : vector<1x8x32xf32> to vector<8x32xf32>
    %372 = arith.truncf %371 : vector<8x32xf32> to vector<8x32xbf16>
    %373 = vector.extract_strided_slice %310 {offsets = [96, 0], sizes = [32, 128], strides = [1, 1]} : vector<128x128xbf16> to vector<32x128xbf16>
    %cst_115 = arith.constant dense<0.000000e+00> : vector<8x128xf32>
    %374 = tpu.matmul %372, %373, %cst_115 {dimension_numbers = #tpu.dot_dimension_numbers<[1], [0], [0], [1], [0, 0, 1, 1], [], []>} : vector<8x32xbf16>, vector<32x128xbf16>, vector<8x128xf32> -> vector<8x128xf32>
    %375 = arith.addf %369, %374 : vector<8x128xf32>
    %376 = vector.extract_strided_slice %308 {offsets = [8, 0], sizes = [8, 384], strides = [1, 1]} : vector<16x384xf32> to vector<8x384xf32>
    %377 = vector.extract_strided_slice %376 {offsets = [0, 0], sizes = [8, 32], strides = [1, 1]} : vector<8x384xf32> to vector<8x32xf32>
    %378 = vector.extract_strided_slice %376 {offsets = [0, 32], sizes = [8, 32], strides = [1, 1]} : vector<8x384xf32> to vector<8x32xf32>
    %379 = vector.extract_strided_slice %376 {offsets = [0, 64], sizes = [8, 32], strides = [1, 1]} : vector<8x384xf32> to vector<8x32xf32>
    %380 = vector.extract_strided_slice %376 {offsets = [0, 96], sizes = [8, 32], strides = [1, 1]} : vector<8x384xf32> to vector<8x32xf32>
    %381 = vector.shape_cast %377 : vector<8x32xf32> to vector<1x8x32xf32>
    %382 = vector.shape_cast %378 : vector<8x32xf32> to vector<1x8x32xf32>
    %383 = vector.shape_cast %379 : vector<8x32xf32> to vector<1x8x32xf32>
    %384 = vector.shape_cast %380 : vector<8x32xf32> to vector<1x8x32xf32>
    %385 = tpu.concatenate %381, %382, %383, %384 in 0 : vector<1x8x32xf32>, vector<1x8x32xf32>, vector<1x8x32xf32>, vector<1x8x32xf32> -> vector<4x8x32xf32>
    %386 = vector.extract_strided_slice %376 {offsets = [0, 128], sizes = [8, 32], strides = [1, 1]} : vector<8x384xf32> to vector<8x32xf32>
    %387 = vector.extract_strided_slice %376 {offsets = [0, 160], sizes = [8, 32], strides = [1, 1]} : vector<8x384xf32> to vector<8x32xf32>
    %388 = vector.extract_strided_slice %376 {offsets = [0, 192], sizes = [8, 32], strides = [1, 1]} : vector<8x384xf32> to vector<8x32xf32>
    %389 = vector.extract_strided_slice %376 {offsets = [0, 224], sizes = [8, 32], strides = [1, 1]} : vector<8x384xf32> to vector<8x32xf32>
    %390 = vector.shape_cast %386 : vector<8x32xf32> to vector<1x8x32xf32>
    %391 = vector.shape_cast %387 : vector<8x32xf32> to vector<1x8x32xf32>
    %392 = vector.shape_cast %388 : vector<8x32xf32> to vector<1x8x32xf32>
    %393 = vector.shape_cast %389 : vector<8x32xf32> to vector<1x8x32xf32>
    %394 = tpu.concatenate %390, %391, %392, %393 in 0 : vector<1x8x32xf32>, vector<1x8x32xf32>, vector<1x8x32xf32>, vector<1x8x32xf32> -> vector<4x8x32xf32>
    %395 = vector.extract_strided_slice %376 {offsets = [0, 256], sizes = [8, 32], strides = [1, 1]} : vector<8x384xf32> to vector<8x32xf32>
    %396 = vector.extract_strided_slice %376 {offsets = [0, 288], sizes = [8, 32], strides = [1, 1]} : vector<8x384xf32> to vector<8x32xf32>
    %397 = vector.extract_strided_slice %376 {offsets = [0, 320], sizes = [8, 32], strides = [1, 1]} : vector<8x384xf32> to vector<8x32xf32>
    %398 = vector.extract_strided_slice %376 {offsets = [0, 352], sizes = [8, 32], strides = [1, 1]} : vector<8x384xf32> to vector<8x32xf32>
    %399 = vector.shape_cast %395 : vector<8x32xf32> to vector<1x8x32xf32>
    %400 = vector.shape_cast %396 : vector<8x32xf32> to vector<1x8x32xf32>
    %401 = vector.shape_cast %397 : vector<8x32xf32> to vector<1x8x32xf32>
    %402 = vector.shape_cast %398 : vector<8x32xf32> to vector<1x8x32xf32>
    %403 = tpu.concatenate %399, %400, %401, %402 in 0 : vector<1x8x32xf32>, vector<1x8x32xf32>, vector<1x8x32xf32>, vector<1x8x32xf32> -> vector<4x8x32xf32>
    "tpu.trace_start"() <{level = 10 : i32, message = "hnd,hmd->hnm"}> : () -> ()
    %cst_116 = arith.constant dense<0.000000e+00> : vector<4x8x8xf32>
    %404 = tpu.matmul %385, %394, %cst_116 {dimension_numbers = #tpu.dot_dimension_numbers<[2], [2], [1], [1], [0, 0, 0, 1, 1, 1], [0], [0]>} : vector<4x8x32xf32>, vector<4x8x32xf32>, vector<4x8x8xf32> -> vector<4x8x8xf32>
    "tpu.trace_stop"() : () -> ()
    %405 = vector.broadcast %13 : vector<1x1x8xf32> to vector<4x8x8xf32>
    %406 = arith.addf %404, %405 : vector<4x8x8xf32>
    %cst_117 = arith.constant dense<0xFF800000> : vector<4x8xf32>
    %407 = vector.multi_reduction <maximumf>, %406, %cst_117 [2] : vector<4x8x8xf32> to vector<4x8xf32>
    %408 = vector.shape_cast %407 : vector<4x8xf32> to vector<4x8x1xf32>
    %409 = vector.broadcast %408 : vector<4x8x1xf32> to vector<4x8x8xf32>
    %410 = arith.subf %406, %409 : vector<4x8x8xf32>
    %411 = math.exp %410 : vector<4x8x8xf32>
    %cst_118 = arith.constant dense<0.000000e+00> : vector<4x8xf32>
    %412 = vector.multi_reduction <add>, %411, %cst_118 [2] : vector<4x8x8xf32> to vector<4x8xf32>
    %413 = vector.shape_cast %412 : vector<4x8xf32> to vector<4x8x1xf32>
    %414 = tpu.reciprocal %413 {approx = true} : vector<4x8x1xf32> -> vector<4x8x1xf32>
    %415 = vector.broadcast %414 : vector<4x8x1xf32> to vector<4x8x8xf32>
    %416 = arith.mulf %411, %415 : vector<4x8x8xf32>
    "tpu.trace_start"() <{level = 10 : i32, message = "hnm,hmd->hnd"}> : () -> ()
    %cst_119 = arith.constant dense<0.000000e+00> : vector<4x8x32xf32>
    %417 = tpu.matmul %416, %403, %cst_119 {dimension_numbers = #tpu.dot_dimension_numbers<[2], [1], [1], [2], [0, 0, 0, 1, 1, 2], [0], [0]>} : vector<4x8x8xf32>, vector<4x8x32xf32>, vector<4x8x32xf32> -> vector<4x8x32xf32>
    "tpu.trace_stop"() : () -> ()
    %418 = vector.extract_strided_slice %417 {offsets = [0, 0, 0], sizes = [1, 8, 32], strides = [1, 1, 1]} : vector<4x8x32xf32> to vector<1x8x32xf32>
    %419 = vector.shape_cast %418 : vector<1x8x32xf32> to vector<8x32xf32>
    %420 = arith.truncf %419 : vector<8x32xf32> to vector<8x32xbf16>
    %421 = vector.extract_strided_slice %310 {offsets = [0, 0], sizes = [32, 128], strides = [1, 1]} : vector<128x128xbf16> to vector<32x128xbf16>
    %cst_120 = arith.constant dense<0.000000e+00> : vector<8x128xf32>
    %422 = tpu.matmul %420, %421, %cst_120 {dimension_numbers = #tpu.dot_dimension_numbers<[1], [0], [0], [1], [0, 0, 1, 1], [], []>} : vector<8x32xbf16>, vector<32x128xbf16>, vector<8x128xf32> -> vector<8x128xf32>
    %423 = vector.extract_strided_slice %417 {offsets = [1, 0, 0], sizes = [1, 8, 32], strides = [1, 1, 1]} : vector<4x8x32xf32> to vector<1x8x32xf32>
    %424 = vector.shape_cast %423 : vector<1x8x32xf32> to vector<8x32xf32>
    %425 = arith.truncf %424 : vector<8x32xf32> to vector<8x32xbf16>
    %426 = vector.extract_strided_slice %310 {offsets = [32, 0], sizes = [32, 128], strides = [1, 1]} : vector<128x128xbf16> to vector<32x128xbf16>
    %cst_121 = arith.constant dense<0.000000e+00> : vector<8x128xf32>
    %427 = tpu.matmul %425, %426, %cst_121 {dimension_numbers = #tpu.dot_dimension_numbers<[1], [0], [0], [1], [0, 0, 1, 1], [], []>} : vector<8x32xbf16>, vector<32x128xbf16>, vector<8x128xf32> -> vector<8x128xf32>
    %428 = arith.addf %422, %427 : vector<8x128xf32>
    %429 = vector.extract_strided_slice %417 {offsets = [2, 0, 0], sizes = [1, 8, 32], strides = [1, 1, 1]} : vector<4x8x32xf32> to vector<1x8x32xf32>
    %430 = vector.shape_cast %429 : vector<1x8x32xf32> to vector<8x32xf32>
    %431 = arith.truncf %430 : vector<8x32xf32> to vector<8x32xbf16>
    %432 = vector.extract_strided_slice %310 {offsets = [64, 0], sizes = [32, 128], strides = [1, 1]} : vector<128x128xbf16> to vector<32x128xbf16>
    %cst_122 = arith.constant dense<0.000000e+00> : vector<8x128xf32>
    %433 = tpu.matmul %431, %432, %cst_122 {dimension_numbers = #tpu.dot_dimension_numbers<[1], [0], [0], [1], [0, 0, 1, 1], [], []>} : vector<8x32xbf16>, vector<32x128xbf16>, vector<8x128xf32> -> vector<8x128xf32>
    %434 = arith.addf %428, %433 : vector<8x128xf32>
    %435 = vector.extract_strided_slice %417 {offsets = [3, 0, 0], sizes = [1, 8, 32], strides = [1, 1, 1]} : vector<4x8x32xf32> to vector<1x8x32xf32>
    %436 = vector.shape_cast %435 : vector<1x8x32xf32> to vector<8x32xf32>
    %437 = arith.truncf %436 : vector<8x32xf32> to vector<8x32xbf16>
    %438 = vector.extract_strided_slice %310 {offsets = [96, 0], sizes = [32, 128], strides = [1, 1]} : vector<128x128xbf16> to vector<32x128xbf16>
    %cst_123 = arith.constant dense<0.000000e+00> : vector<8x128xf32>
    %439 = tpu.matmul %437, %438, %cst_123 {dimension_numbers = #tpu.dot_dimension_numbers<[1], [0], [0], [1], [0, 0, 1, 1], [], []>} : vector<8x32xbf16>, vector<32x128xbf16>, vector<8x128xf32> -> vector<8x128xf32>
    %440 = arith.addf %434, %439 : vector<8x128xf32>
    %441 = tpu.concatenate %375, %440 in 0 : vector<8x128xf32>, vector<8x128xf32> -> vector<16x128xf32>
    %442 = arith.addf %274, %441 : vector<16x128xf32>
    %443 = vector.broadcast %278 : vector<1x128xf32> to vector<16x128xf32>
    %444 = arith.addf %442, %443 : vector<16x128xf32>
    %cst_124 = arith.constant dense<0.000000e+00> : vector<16xf32>
    %445 = vector.multi_reduction <add>, %444, %cst_124 [1] : vector<16x128xf32> to vector<16xf32>
    %446 = vector.shape_cast %445 : vector<16xf32> to vector<16x1xf32>
    %cst_125 = arith.constant 1.280000e+02 : f32
    %447 = vector.broadcast %cst_125 : f32 to vector<16x1xf32>
    %448 = arith.divf %446, %447 : vector<16x1xf32>
    %449 = vector.broadcast %448 : vector<16x1xf32> to vector<16x128xf32>
    %450 = arith.subf %444, %449 : vector<16x128xf32>
    %451 = arith.mulf %450, %450 : vector<16x128xf32>
    %cst_126 = arith.constant dense<0.000000e+00> : vector<16xf32>
    %452 = vector.multi_reduction <add>, %451, %cst_126 [1] : vector<16x128xf32> to vector<16xf32>
    %453 = vector.shape_cast %452 : vector<16xf32> to vector<16x1xf32>
    %cst_127 = arith.constant 1.280000e+02 : f32
    %454 = vector.broadcast %cst_127 : f32 to vector<16x1xf32>
    %455 = arith.divf %453, %454 : vector<16x1xf32>
    %cst_128 = arith.constant 9.99999997E-7 : f32
    %456 = vector.broadcast %cst_128 : f32 to vector<16x1xf32>
    %457 = arith.addf %455, %456 : vector<16x1xf32>
    %458 = math.rsqrt %457 : vector<16x1xf32>
    %459 = vector.broadcast %458 : vector<16x1xf32> to vector<16x128xf32>
    %460 = arith.mulf %450, %459 : vector<16x128xf32>
    %461 = vector.broadcast %279 : vector<1x128xf32> to vector<16x128xf32>
    %462 = arith.mulf %460, %461 : vector<16x128xf32>
    %463 = vector.broadcast %280 : vector<1x128xf32> to vector<16x128xf32>
    %464 = arith.addf %462, %463 : vector<16x128xf32>
    %c1_129 = arith.constant 1 : index
    %c0_130 = arith.constant 0 : index
    %c512_131 = arith.constant 512 : index
    %465 = vector.load %arg4[%c1_129, %c0_130, %c512_131] : memref<2x128x1536xbf16, #tpu.memory_space<vmem>>, vector<1x128x512xbf16>
    %466 = vector.shape_cast %465 : vector<1x128x512xbf16> to vector<128x512xbf16>
    %c512_132 = arith.constant 512 : index
    %c0_133 = arith.constant 0 : index
    %467 = vector.load %arg5[%c512_132, %c0_133] : memref<1024x128xbf16, #tpu.memory_space<vmem>>, vector<512x128xbf16>
    %468 = arith.truncf %464 : vector<16x128xf32> to vector<16x128xbf16>
    %cst_134 = arith.constant dense<0.000000e+00> : vector<16x512xf32>
    %469 = tpu.matmul %468, %466, %cst_134 {dimension_numbers = #tpu.dot_dimension_numbers<[1], [0], [0], [1], [0, 0, 1, 1], [], []>} : vector<16x128xbf16>, vector<128x512xbf16>, vector<16x512xf32> -> vector<16x512xf32>
    %470 = vector.broadcast %281 : vector<1x512xf32> to vector<16x512xf32>
    %471 = arith.addf %469, %470 : vector<16x512xf32>
    %472 = arith.mulf %471, %471 : vector<16x512xf32>
    %473 = arith.mulf %471, %472 : vector<16x512xf32>
    %cst_135 = arith.constant 4.471500e-02 : f32
    %474 = vector.broadcast %cst_135 : f32 to vector<16x512xf32>
    %475 = arith.mulf %474, %473 : vector<16x512xf32>
    %476 = arith.addf %471, %475 : vector<16x512xf32>
    %cst_136 = arith.constant 0.797884583 : f32
    %477 = vector.broadcast %cst_136 : f32 to vector<16x512xf32>
    %478 = arith.mulf %477, %476 : vector<16x512xf32>
    %479 = math.tanh %478 : vector<16x512xf32>
    %cst_137 = arith.constant 1.000000e+00 : f32
    %480 = vector.broadcast %cst_137 : f32 to vector<16x512xf32>
    %481 = arith.addf %480, %479 : vector<16x512xf32>
    %cst_138 = arith.constant 5.000000e-01 : f32
    %482 = vector.broadcast %cst_138 : f32 to vector<16x512xf32>
    %483 = arith.mulf %482, %481 : vector<16x512xf32>
    %484 = arith.mulf %471, %483 : vector<16x512xf32>
    %485 = arith.truncf %484 : vector<16x512xf32> to vector<16x512xbf16>
    %cst_139 = arith.constant dense<0.000000e+00> : vector<16x128xf32>
    %486 = tpu.matmul %485, %467, %cst_139 {dimension_numbers = #tpu.dot_dimension_numbers<[1], [0], [0], [1], [0, 0, 1, 1], [], []>} : vector<16x512xbf16>, vector<512x128xbf16>, vector<16x128xf32> -> vector<16x128xf32>
    %487 = arith.addf %444, %486 : vector<16x128xf32>
    %488 = vector.broadcast %282 : vector<1x128xf32> to vector<16x128xf32>
    %489 = arith.addf %487, %488 : vector<16x128xf32>
    %c1_140 = arith.constant 1 : index
    %c0_141 = arith.constant 0 : index
    %c1024_142 = arith.constant 1024 : index
    %490 = vector.load %arg4[%c1_140, %c0_141, %c1024_142] : memref<2x128x1536xbf16, #tpu.memory_space<vmem>>, vector<1x128x128xbf16>
    %491 = vector.shape_cast %490 : vector<1x128x128xbf16> to vector<128x128xbf16>
    %c1_143 = arith.constant 1 : index
    %c0_144 = arith.constant 0 : index
    %c1152_145 = arith.constant 1152 : index
    %492 = vector.load %arg4[%c1_143, %c0_144, %c1152_145] : memref<2x128x1536xbf16, #tpu.memory_space<vmem>>, vector<1x128x128xbf16>
    %493 = vector.shape_cast %492 : vector<1x128x128xbf16> to vector<128x128xbf16>
    %c1_146 = arith.constant 1 : index
    %c0_147 = arith.constant 0 : index
    %c1280_148 = arith.constant 1280 : index
    %494 = vector.load %arg4[%c1_146, %c0_147, %c1280_148] : memref<2x128x1536xbf16, #tpu.memory_space<vmem>>, vector<1x128x128xbf16>
    %495 = vector.shape_cast %494 : vector<1x128x128xbf16> to vector<128x128xbf16>
    %c1_149 = arith.constant 1 : index
    %c0_150 = arith.constant 0 : index
    %c1408_151 = arith.constant 1408 : index
    %496 = vector.load %arg4[%c1_149, %c0_150, %c1408_151] : memref<2x128x1536xbf16, #tpu.memory_space<vmem>>, vector<1x128x128xbf16>
    %497 = vector.shape_cast %496 : vector<1x128x128xbf16> to vector<128x128xbf16>
    %498 = arith.truncf %489 : vector<16x128xf32> to vector<16x128xbf16>
    %cst_152 = arith.constant dense<0.000000e+00> : vector<16x128xf32>
    %499 = tpu.matmul %498, %491, %cst_152 {dimension_numbers = #tpu.dot_dimension_numbers<[1], [0], [0], [1], [0, 0, 1, 1], [], []>} : vector<16x128xbf16>, vector<128x128xbf16>, vector<16x128xf32> -> vector<16x128xf32>
    %cst_153 = arith.constant dense<0.000000e+00> : vector<16x128xf32>
    %500 = tpu.matmul %7, %493, %cst_153 {dimension_numbers = #tpu.dot_dimension_numbers<[1], [0], [0], [1], [0, 0, 1, 1], [], []>} : vector<16x128xbf16>, vector<128x128xbf16>, vector<16x128xf32> -> vector<16x128xf32>
    %cst_154 = arith.constant dense<0.000000e+00> : vector<16x128xf32>
    %501 = tpu.matmul %7, %495, %cst_154 {dimension_numbers = #tpu.dot_dimension_numbers<[1], [0], [0], [1], [0, 0, 1, 1], [], []>} : vector<16x128xbf16>, vector<128x128xbf16>, vector<16x128xf32> -> vector<16x128xf32>
    %502 = vector.extract_strided_slice %499 {offsets = [0, 0], sizes = [8, 128], strides = [1, 1]} : vector<16x128xf32> to vector<8x128xf32>
    %503 = vector.extract_strided_slice %500 {offsets = [0, 0], sizes = [8, 128], strides = [1, 1]} : vector<16x128xf32> to vector<8x128xf32>
    %504 = vector.extract_strided_slice %501 {offsets = [0, 0], sizes = [8, 128], strides = [1, 1]} : vector<16x128xf32> to vector<8x128xf32>
    "tpu.trace_start"() <{level = 10 : i32, message = "nd,td->nt"}> : () -> ()
    %cst_155 = arith.constant dense<0.000000e+00> : vector<8x8xf32>
    %505 = tpu.matmul %502, %503, %cst_155 {dimension_numbers = #tpu.dot_dimension_numbers<[1], [1], [0], [0], [0, 0, 1, 0], [], []>} : vector<8x128xf32>, vector<8x128xf32>, vector<8x8xf32> -> vector<8x8xf32>
    "tpu.trace_stop"() : () -> ()
    %cst_156 = arith.constant dense<0xFF800000> : vector<8xf32>
    %506 = vector.multi_reduction <maximumf>, %505, %cst_156 [1] : vector<8x8xf32> to vector<8xf32>
    %507 = vector.shape_cast %506 : vector<8xf32> to vector<8x1xf32>
    %508 = vector.broadcast %507 : vector<8x1xf32> to vector<8x8xf32>
    %509 = arith.subf %505, %508 : vector<8x8xf32>
    %510 = math.exp %509 : vector<8x8xf32>
    %cst_157 = arith.constant dense<0.000000e+00> : vector<8xf32>
    %511 = vector.multi_reduction <add>, %510, %cst_157 [1] : vector<8x8xf32> to vector<8xf32>
    %512 = vector.shape_cast %511 : vector<8xf32> to vector<8x1xf32>
    %513 = tpu.reciprocal %512 {approx = true} : vector<8x1xf32> -> vector<8x1xf32>
    %514 = vector.broadcast %513 : vector<8x1xf32> to vector<8x8xf32>
    %515 = arith.mulf %510, %514 : vector<8x8xf32>
    %cst_158 = arith.constant dense<0.000000e+00> : vector<8x128xf32>
    %516 = tpu.matmul %515, %504, %cst_158 {dimension_numbers = #tpu.dot_dimension_numbers<[1], [0], [0], [1], [0, 0, 1, 1], [], []>} : vector<8x8xf32>, vector<8x128xf32>, vector<8x128xf32> -> vector<8x128xf32>
    %517 = vector.extract_strided_slice %499 {offsets = [8, 0], sizes = [8, 128], strides = [1, 1]} : vector<16x128xf32> to vector<8x128xf32>
    %518 = vector.extract_strided_slice %500 {offsets = [8, 0], sizes = [8, 128], strides = [1, 1]} : vector<16x128xf32> to vector<8x128xf32>
    %519 = vector.extract_strided_slice %501 {offsets = [8, 0], sizes = [8, 128], strides = [1, 1]} : vector<16x128xf32> to vector<8x128xf32>
    "tpu.trace_start"() <{level = 10 : i32, message = "nd,td->nt"}> : () -> ()
    %cst_159 = arith.constant dense<0.000000e+00> : vector<8x8xf32>
    %520 = tpu.matmul %517, %518, %cst_159 {dimension_numbers = #tpu.dot_dimension_numbers<[1], [1], [0], [0], [0, 0, 1, 0], [], []>} : vector<8x128xf32>, vector<8x128xf32>, vector<8x8xf32> -> vector<8x8xf32>
    "tpu.trace_stop"() : () -> ()
    %cst_160 = arith.constant dense<0xFF800000> : vector<8xf32>
    %521 = vector.multi_reduction <maximumf>, %520, %cst_160 [1] : vector<8x8xf32> to vector<8xf32>
    %522 = vector.shape_cast %521 : vector<8xf32> to vector<8x1xf32>
    %523 = vector.broadcast %522 : vector<8x1xf32> to vector<8x8xf32>
    %524 = arith.subf %520, %523 : vector<8x8xf32>
    %525 = math.exp %524 : vector<8x8xf32>
    %cst_161 = arith.constant dense<0.000000e+00> : vector<8xf32>
    %526 = vector.multi_reduction <add>, %525, %cst_161 [1] : vector<8x8xf32> to vector<8xf32>
    %527 = vector.shape_cast %526 : vector<8xf32> to vector<8x1xf32>
    %528 = tpu.reciprocal %527 {approx = true} : vector<8x1xf32> -> vector<8x1xf32>
    %529 = vector.broadcast %528 : vector<8x1xf32> to vector<8x8xf32>
    %530 = arith.mulf %525, %529 : vector<8x8xf32>
    %cst_162 = arith.constant dense<0.000000e+00> : vector<8x128xf32>
    %531 = tpu.matmul %530, %519, %cst_162 {dimension_numbers = #tpu.dot_dimension_numbers<[1], [0], [0], [1], [0, 0, 1, 1], [], []>} : vector<8x8xf32>, vector<8x128xf32>, vector<8x128xf32> -> vector<8x128xf32>
    %532 = tpu.concatenate %516, %531 in 0 : vector<8x128xf32>, vector<8x128xf32> -> vector<16x128xf32>
    %533 = arith.truncf %532 : vector<16x128xf32> to vector<16x128xbf16>
    %cst_163 = arith.constant dense<0.000000e+00> : vector<16x128xf32>
    %534 = tpu.matmul %533, %497, %cst_163 {dimension_numbers = #tpu.dot_dimension_numbers<[1], [0], [0], [1], [0, 0, 1, 1], [], []>} : vector<16x128xbf16>, vector<128x128xbf16>, vector<16x128xf32> -> vector<16x128xf32>
    %535 = arith.addf %489, %534 : vector<16x128xf32>
    %c0_164 = arith.constant 0 : index
    %c0_165 = arith.constant 0 : index
    %536 = vector.load %arg9[%c0_164, %c0_165] : memref<1x1024xf32, #tpu.memory_space<vmem>>, vector<1x128xf32>
    %c0_166 = arith.constant 0 : index
    %c128_167 = arith.constant 128 : index
    %537 = vector.load %arg9[%c0_166, %c128_167] : memref<1x1024xf32, #tpu.memory_space<vmem>>, vector<1x128xf32>
    %c0_168 = arith.constant 0 : index
    %c256_169 = arith.constant 256 : index
    %538 = vector.load %arg9[%c0_168, %c256_169] : memref<1x1024xf32, #tpu.memory_space<vmem>>, vector<1x640xf32>
    %c0_170 = arith.constant 0 : index
    %c896_171 = arith.constant 896 : index
    %539 = vector.load %arg9[%c0_170, %c896_171] : memref<1x1024xf32, #tpu.memory_space<vmem>>, vector<1x128xf32>
    %cst_172 = arith.constant dense<0.000000e+00> : vector<16xf32>
    %540 = vector.multi_reduction <add>, %535, %cst_172 [1] : vector<16x128xf32> to vector<16xf32>
    %541 = vector.shape_cast %540 : vector<16xf32> to vector<16x1xf32>
    %cst_173 = arith.constant 1.280000e+02 : f32
    %542 = vector.broadcast %cst_173 : f32 to vector<16x1xf32>
    %543 = arith.divf %541, %542 : vector<16x1xf32>
    %544 = vector.broadcast %543 : vector<16x1xf32> to vector<16x128xf32>
    %545 = arith.subf %535, %544 : vector<16x128xf32>
    %546 = arith.mulf %545, %545 : vector<16x128xf32>
    %cst_174 = arith.constant dense<0.000000e+00> : vector<16xf32>
    %547 = vector.multi_reduction <add>, %546, %cst_174 [1] : vector<16x128xf32> to vector<16xf32>
    %548 = vector.shape_cast %547 : vector<16xf32> to vector<16x1xf32>
    %cst_175 = arith.constant 1.280000e+02 : f32
    %549 = vector.broadcast %cst_175 : f32 to vector<16x1xf32>
    %550 = arith.divf %548, %549 : vector<16x1xf32>
    %cst_176 = arith.constant 9.99999997E-7 : f32
    %551 = vector.broadcast %cst_176 : f32 to vector<16x1xf32>
    %552 = arith.addf %550, %551 : vector<16x1xf32>
    %553 = math.rsqrt %552 : vector<16x1xf32>
    %554 = vector.broadcast %553 : vector<16x1xf32> to vector<16x128xf32>
    %555 = arith.mulf %545, %554 : vector<16x128xf32>
    %556 = vector.broadcast %536 : vector<1x128xf32> to vector<16x128xf32>
    %557 = arith.mulf %555, %556 : vector<16x128xf32>
    %558 = vector.broadcast %537 : vector<1x128xf32> to vector<16x128xf32>
    %559 = arith.addf %557, %558 : vector<16x128xf32>
    %c0_177 = arith.constant 0 : index
    %c0_178 = arith.constant 0 : index
    %560 = vector.load %arg7[%c0_177, %c0_178] : memref<128x768xbf16, #tpu.memory_space<vmem>>, vector<128x640xbf16>
    %c0_179 = arith.constant 0 : index
    %c640_180 = arith.constant 640 : index
    %561 = vector.load %arg7[%c0_179, %c640_180] : memref<128x768xbf16, #tpu.memory_space<vmem>>, vector<128x128xbf16>
    %562 = arith.truncf %559 : vector<16x128xf32> to vector<16x128xbf16>
    %cst_181 = arith.constant dense<0.000000e+00> : vector<16x640xf32>
    %563 = tpu.matmul %562, %560, %cst_181 {dimension_numbers = #tpu.dot_dimension_numbers<[1], [0], [0], [1], [0, 0, 1, 1], [], []>} : vector<16x128xbf16>, vector<128x640xbf16>, vector<16x640xf32> -> vector<16x640xf32>
    %564 = vector.broadcast %538 : vector<1x640xf32> to vector<16x640xf32>
    %565 = arith.addf %563, %564 : vector<16x640xf32>
    %cst_182 = arith.constant 0.000000e+00 : f32
    %566 = vector.broadcast %cst_182 : f32 to vector<16x640xf32>
    %567 = arith.maximumf %565, %566 : vector<16x640xf32>
    %568 = arith.truncf %567 : vector<16x640xf32> to vector<16x640xbf16>
    %c0_183 = arith.constant 0 : index
    %c0_184 = arith.constant 0 : index
    %569 = vector.load %arg8[%c0_183, %c0_184] : memref<640x128xbf16, #tpu.memory_space<vmem>>, vector<640x128xbf16>
    %cst_185 = arith.constant dense<0.000000e+00> : vector<16x128xf32>
    %570 = tpu.matmul %568, %569, %cst_185 {dimension_numbers = #tpu.dot_dimension_numbers<[1], [0], [0], [1], [0, 0, 1, 1], [], []>} : vector<16x640xbf16>, vector<640x128xbf16>, vector<16x128xf32> -> vector<16x128xf32>
    %571 = arith.truncf %559 : vector<16x128xf32> to vector<16x128xbf16>
    %cst_186 = arith.constant dense<0.000000e+00> : vector<16x128xf32>
    %572 = tpu.matmul %571, %561, %cst_186 {dimension_numbers = #tpu.dot_dimension_numbers<[1], [0], [0], [1], [0, 0, 1, 1], [], []>} : vector<16x128xbf16>, vector<128x128xbf16>, vector<16x128xf32> -> vector<16x128xf32>
    %573 = arith.addf %570, %572 : vector<16x128xf32>
    %574 = vector.broadcast %539 : vector<1x128xf32> to vector<16x128xf32>
    %575 = arith.addf %573, %574 : vector<16x128xf32>
    %c0_187 = arith.constant 0 : index
    %c0_188 = arith.constant 0 : index
    %576 = vector.load %arg10[%c0_187, %c0_188] : memref<16x128xf32, #tpu.memory_space<vmem>>, vector<16x128xf32>
    tpu.vector_store %arg10[%c0_187, %c0_188], %575 {strides = array<i32>} : memref<16x128xf32, #tpu.memory_space<vmem>>, vector<16x128xf32>,
    return
  }
}

</mosaic_0001>

<bundles_post_ra>
// kernel: conditioned_vit_forward.1
= control target key start
LH: loop header
LB: loop body
LE: loop exit
PB: predicated region body
PF: predicated region fallthrough
CT: control target
= control target key end

     0   :  { %15 = vsyncpa [#allocation3], 0  ;;  %s12868_s0 = inlined_call_operand.vmem [shape: f32[16,768], index: 0, kind: input, shape index: {}]   ;;  %s12869_s1 = inlined_call_operand.vmem [shape: f32[16,128], index: 1, kind: input, shape index: {}]   ;;  %s12870_s2 = inlined_call_operand.hbm [shape: bf16[768,128], index: 2, kind: input, shape index: {}]   ;;  %s12871_s3 = inlined_call_operand.vmem [shape: f32[16,128], index: 3, kind: input, shape index: {}]   ;;  %s12872_s4 = inlined_call_operand.vmem [shape: bf16[2,128,1536], index: 4, kind: input, shape index: {}]   ;;  %s12873_s5 = inlined_call_operand.vmem [shape: bf16[1024,128], index: 5, kind: input, shape index: {}]   ;;  %s12874_s6 = inlined_call_operand.vmem [shape: f32[2,1664], index: 6, kind: input, shape index: {}]   ;;  %s12875_s7 = inlined_call_operand.hbm [shape: bf16[128,768], index: 7, kind: input, shape index: {}]   ;;  %s12876_s8 = inlined_call_operand.hbm [shape: bf16[640,128], index: 8, kind: input, shape index: {}]   ;;  %s12877_s9 = inlined_call_operand.vmem [shape: f32[1,1024], index: 9, kind: input, shape index: {}]   ;;  %s12878_s10 = inlined_call_operand.vmem [shape: f32[16,128], index: 10, kind: output, shape index: {}]  }
   0x1   :  { %16 = vsyncpa [#allocation5], 0  ;;  %s11037_s13 = smov [#allocation4]   ;;  %s10967_s17 = scalar_lea.hbm %s12875_s7, 6144 }
   0x2   :  { %s46_s14 = sshll.u32 %s11037_s13, 4  ;;  %p10968_p0 = scmp.ne.s32.totalorder %s12875_s7, %s10967_s17  ;;  %s47_s14 = int_to_ptr.vmem [resolvable:$true] %s46_s14 }
   0x3   :  { %p10971_p1 = scmp.lt.u32.totalorder %s10967_s17, %s12875_s7 }
   0x5   :  { %p10973_p2 = pnand %p10971_p1, %p10968_p0 }
   0x7   :  { %10976 = shalt.err (!%p10973_p2)
}
   0x8   :  { %s10977_s22 = scalar_lea.vmem %s47_s14, 6144  ;;  %p10982_p4 = scmp.lt.s32.totalorder %s47_s14, %s47_s14 }
   0x9   :  { %p10978_p3 = scmp.ne.s32.totalorder %s47_s14, %s10977_s22  ;;  %p10983_p5 = scmp.lt.s32.totalorder %s10977_s22, %s10977_s22 }
   0xb   :  { %p10984_p6 = por %p10983_p5, %p10982_p4 }
   0xd   :  { %p10985_p7 = pnand %p10984_p6, %p10978_p3 }
   0xf   :  { %10988 = shalt.err (!%p10985_p7)
}
  0x10   :  { %s11038_s23 = smov 384   ;;  %s11039_s24 = smov 24  }
  0x11   :  { %52 = dma.hbm_to_vmem [thread:$0]  %s12875_s7, 6144, %s47_s14, [#allocation5], %s11038_s23, %s11038_s23, %s11039_s24  }
  0x12   :  { %s11040_s27 = smov [#allocation2]   ;;  %s10989_s11 = scalar_lea.hbm %s12870_s2, 6144 }
  0x13   :  { %s26_s28 = sshll.u32 %s11040_s27, 4  ;;  %p10990_p8 = scmp.ne.s32.totalorder %s12870_s2, %s10989_s11  ;;  %s27_s28 = int_to_ptr.vmem [resolvable:$true] %s26_s28 }
  0x14   :  { %p10993_p9 = scmp.lt.u32.totalorder %s10989_s11, %s12870_s2 }
  0x16   :  { %p10995_p10 = pnand %p10993_p9, %p10990_p8 }
  0x18   :  { %10998 = shalt.err (!%p10995_p10)
}
  0x19   :  { %s10999_s17 = scalar_lea.vmem %s27_s28, 6144  ;;  %p11004_p12 = scmp.lt.s32.totalorder %s27_s28, %s27_s28 }
  0x1a   :  { %p11000_p11 = scmp.ne.s32.totalorder %s27_s28, %s10999_s17  ;;  %p11005_p13 = scmp.lt.s32.totalorder %s10999_s17, %s10999_s17 }
  0x1c   :  { %p11006_p0 = por %p11005_p13, %p11004_p12 }
  0x1e   :  { %p11007_p1 = pnand %p11006_p0, %p11000_p11 }
  0x20   :  { %11010 = shalt.err (!%p11007_p1)
}
  0x21   :  { %s11041_s7 = smov 64   ;;  %s11042_s14 = smov 4  }
  0x22   :  { %32 = dma.hbm_to_vmem [thread:$0]  %s12870_s2, 6144, %s27_s28, [#allocation3], %s11041_s7, %s11041_s7, %s11042_s14  }
  0x23   :  { %s11043_s20 = smov [#allocation6]   ;;  %s11011_s24 = scalar_lea.hbm %s12876_s8, 5120 }
  0x24   :  { %s58_s21 = sshll.u32 %s11043_s20, 4  ;;  %p11012_p2 = scmp.ne.s32.totalorder %s12876_s8, %s11011_s24  ;;  %s59_s21 = int_to_ptr.vmem [resolvable:$true] %s58_s21 }
  0x25   :  { %p11015_p3 = scmp.lt.u32.totalorder %s11011_s24, %s12876_s8 }
  0x27   :  { %p11017_p4 = pnand %p11015_p3, %p11012_p2 }
  0x29   :  { %11020 = shalt.err (!%p11017_p4)
}
  0x2a   :  { %s11021_s30 = scalar_lea.vmem %s59_s21, 5120  ;;  %p11026_p6 = scmp.lt.s32.totalorder %s59_s21, %s59_s21 }
  0x2b   :  { %p11022_p5 = scmp.ne.s32.totalorder %s59_s21, %s11021_s30  ;;  %p11027_p7 = scmp.lt.s32.totalorder %s11021_s30, %s11021_s30 }
  0x2d   :  { %p11028_p8 = por %p11027_p7, %p11026_p6 }
  0x2f   :  { %p11029_p9 = pnand %p11028_p8, %p11022_p5 }
  0x31   :  { %11032 = shalt.err (!%p11029_p9)
}
  0x32   :  { %64 = dma.hbm_to_vmem [thread:$0]  %s12876_s8, 5120, %s59_s21, [#allocation5], %s11041_s7, %s11041_s7, %s11042_s14  }
  0x33   :  { %11033 = dma.done.wait [#allocation3], 6144  }
  0x34   :  { %11034 = vsyncadd [#allocation3], 4294961152 }
  0x35   :  { %11035 = dma.done.wait [#allocation5], 11264  }
  0x36   :  { %11036 = vsyncadd [#allocation5], 4294956032  ;;  %v10379_v0 = vld [vmem:[#allocation2 + $0x40] sm:$0xff]   ;;  %v10383_v4 = vld [vmem:[#allocation2 + $0x48] sm:$0xff]   ;;  %vm11046_vm0 = vmmov 0   ;;  %vm957_vm1 = vcmask 261120  }
  0x37   :  { %v10380_v1 = vld [vmem:[#allocation2] sm:$0xff]   ;;  %9335 = vmatprep.subr.bf16.mxu0 %v10379_v0  ;;  %v10384_v5 = vld [vmem:[#allocation2 + $0x8] sm:$0xff]   ;;  %v10387_v8 = vld [vmem:[#allocation2 + $0x50] sm:$0xff]   ;;  %s11047_s20 = smov 96   ;;  %s11048_s21 = smov 32   ;;  %vm1254_vm3 = vcmask 64512  }
  0x38   :  { %v10381_v2 = vld [vmem:[#allocation2 + $0xc0] sm:$0xff]   ;;  %9336 = vmatpush3.bf16.msra.mxu0 %v10380_v1  ;;  %v10385_v6 = vld [vmem:[#allocation2 + $0xc8] sm:$0xff]   ;;  %v10388_v9 = vld [vmem:[#allocation2 + $0x10] sm:$0xff]  }
  0x39   :  { %v10382_v3 = vld [vmem:[#allocation2 + $0x80] sm:$0xff]   ;;  %9357 = vmatprep.subr.bf16.mxu1 %v10381_v2  ;;  %9337 = vmatprep.subr.bf16.mxu0 %v10383_v4  ;;  %v10386_v7 = vld [vmem:[#allocation2 + $0x88] sm:$0xff]   ;;  %v10389_v10 = vld [vmem:[#allocation2 + $0xd0] sm:$0xff]  }
  0x3a   :  { %9358 = vmatpush3.bf16.msra.mxu1 %v10382_v3  ;;  %v10390_v11 = vld [vmem:[#allocation2 + $0x90] sm:$0xff]   ;;  %v10391_v12 = vld [vmem:[#allocation2 + $0x58] sm:$0xff]   ;;  %v10395_v16 = vld [vmem:[#allocation2 + $0x60] sm:$0xff]  }
  0x3b   :  { %9359 = vmatprep.subr.bf16.mxu1 %v10385_v6  ;;  %v10392_v13 = vld [vmem:[#allocation2 + $0x18] sm:$0xff]   ;;  %v10396_v17 = vld [vmem:[#allocation2 + $0x20] sm:$0xff]   ;;  %v10399_v20 = vld [vmem:[#allocation2 + $0x68] sm:$0xff]  }
  0x3c   :  { %9338 = vmatpush3.bf16.msra.mxu0 %v10384_v5  ;;  %v10393_v14 = vld [vmem:[#allocation2 + $0xd8] sm:$0xff]   ;;  %v10397_v18 = vld [vmem:[#allocation2 + $0xe0] sm:$0xff]   ;;  %v10400_v21 = vld [vmem:[#allocation2 + $0x28] sm:$0xff]  }
  0x3d   :  { %9339 = vmatprep.subr.bf16.mxu0 %v10387_v8  ;;  %v10394_v15 = vld [vmem:[#allocation2 + $0x98] sm:$0xff]   ;;  %v10398_v19 = vld [vmem:[#allocation2 + $0xa0] sm:$0xff]   ;;  %v10401_v22 = vld [vmem:[#allocation2 + $0xe8] sm:$0xff]  }
  0x3e   :  { %9360 = vmatpush3.bf16.msra.mxu1 %v10386_v7  ;;  %v10402_v23 = vld [vmem:[#allocation2 + $0xa8] sm:$0xff]   ;;  %v10403_v24 = vld [vmem:[#allocation2 + $0x70] sm:$0xff]   ;;  %v10407_v28 = vld [vmem:[#allocation2 + $0x78] sm:$0xff]  }
  0x3f   :  { %9361 = vmatprep.subr.bf16.mxu1 %v10389_v10  ;;  %v10404_v25 = vld [vmem:[#allocation2 + $0x30] sm:$0xff]   ;;  %v10408_v29 = vld [vmem:[#allocation2 + $0x38] sm:$0xff]   ;;  %v78_v31 = vld [vmem:[%s12868_s0 + $0x8] sm:$0xff] }
  0x40   :  { %9340 = vmatpush3.bf16.msra.mxu0 %v10388_v9  ;;  %v10405_v26 = vld [vmem:[#allocation2 + $0xf0] sm:$0xff]   ;;  %v10409_v30 = vld [vmem:[#allocation2 + $0xf8] sm:$0xff]   ;;  %v77_v35 = vld [vmem:[%s12868_s0] sm:$0xff] }
  0x41   :  { %9341 = vmatprep.subr.bf16.mxu0 %v10391_v12  ;;  %v10406_v27 = vld [vmem:[#allocation2 + $0xb0] sm:$0xff]   ;;  %v84_v32 = vld [vmem:[%s12868_s0 + $0x38] sm:$0xff]  ;;  %v10411_v38 = vld [vmem:[#allocation2 + $0x140] sm:$0xff]  }
  0x42   :  { %9362 = vmatpush3.bf16.msra.mxu1 %v10390_v11  ;;  %v90_v33 = vpack.c.bf16 %v84_v32, %v78_v31  ;;  %v10410_v34 = vld [vmem:[#allocation2 + $0xb8] sm:$0xff]   ;;  %v83_v36 = vld [vmem:[%s12868_s0 + $0x30] sm:$0xff]  ;;  %v86_v40 = vld [vmem:[%s12868_s0 + $0x48] sm:$0xff] }
  0x43   :  { %9363 = vmatprep.subr.bf16.mxu1 %v10393_v14  ;;  %v89_v37 = vpack.c.bf16 %v83_v36, %v77_v35  ;;  %v80_v39 = vld [vmem:[%s12868_s0 + $0x18] sm:$0xff]  ;;  %v10412_v42 = vld [vmem:[#allocation2 + $0x100] sm:$0xff]   ;;  %v79_v43 = vld [vmem:[%s12868_s0 + $0x10] sm:$0xff] }
  0x44   :  { %9342 = vmatpush3.bf16.msra.mxu0 %v10392_v13  ;;  %513 = vmatprep.mubr.bf16.mxu0 %v90_v33  ;;  %v92_v41 = vpack.c.bf16 %v86_v40, %v80_v39  ;;  %v85_v44 = vld [vmem:[%s12868_s0 + $0x40] sm:$0xff]  ;;  %v10413_v46 = vld [vmem:[#allocation2 + $0x148] sm:$0xff]   ;;  %v10415_v48 = vld [vmem:[#allocation2 + $0x150] sm:$0xff]  }
  0x45   :  { %9343 = vmatprep.subr.bf16.mxu0 %v10395_v16  ;;  %v91_v45 = vpack.c.bf16 %v85_v44, %v79_v43  ;;  %v10414_v47 = vld [vmem:[#allocation2 + $0x108] sm:$0xff]   ;;  %v10416_v49 = vld [vmem:[#allocation2 + $0x110] sm:$0xff]   ;;  %v10417_v50 = vld [vmem:[#allocation2 + $0x158] sm:$0xff]  }
  0x46   :  { %9364 = vmatpush3.bf16.msra.mxu1 %v10394_v15  ;;  %554 = vmatprep.mubr.bf16.mxu1 %v92_v41  ;;  %v10418_v51 = vld [vmem:[#allocation2 + $0x118] sm:$0xff]   ;;  %v10419_v52 = vld [vmem:[#allocation2 + $0x160] sm:$0xff]   ;;  %v10421_v54 = vld [vmem:[#allocation2 + $0x168] sm:$0xff]  }
  0x47   :  { %9365 = vmatprep.subr.bf16.mxu1 %v10397_v18  ;;  %v10420_v53 = vld [vmem:[#allocation2 + $0x120] sm:$0xff]   ;;  %v82_v55 = vld [vmem:[%s12868_s0 + $0x28] sm:$0xff]  ;;  %v88_v57 = vld [vmem:[%s12868_s0 + $0x58] sm:$0xff] }
  0x48   :  { %9344 = vmatpush3.bf16.msra.mxu0 %v10396_v17  ;;  %v10422_v56 = vld [vmem:[#allocation2 + $0x128] sm:$0xff]   ;;  %v10423_v58 = vld [vmem:[#allocation2 + $0x170] sm:$0xff]   ;;  %v94_v59 = vpack.c.bf16 %v88_v57, %v82_v55  ;;  %v10425_v61 = vld [vmem:[#allocation2 + $0x178] sm:$0xff]  }
  0x49   :  { %9345 = vmatprep.subr.bf16.mxu0 %v10399_v20  ;;  %v10424_v60 = vld [vmem:[#allocation2 + $0x130] sm:$0xff]   ;;  %v10426_v62 = vld [vmem:[#allocation2 + $0x138] sm:$0xff]   ;;  %v81_v63 = vld [vmem:[%s12868_s0 + $0x20] sm:$0xff] }
  0x4a   :  { %9366 = vmatpush3.bf16.msra.mxu1 %v10398_v19  ;;  %v87_v0 = vld [vmem:[%s12868_s0 + $0x50] sm:$0xff]  ;;  %v191_v3 = vld [vmem:[%s12871_s3] sm:$0xff]  ;;  %v192_v8 = vld [vmem:[%s12871_s3 + $0x8] sm:$0xff] }
  0x4b   :  { %9367 = vmatprep.subr.bf16.mxu1 %v10401_v22  ;;  %v93_v1 = vpack.c.bf16 %v87_v0, %v81_v63  ;;  %v10430_v31 = vld [vmem:[%s12872_s4 + $0x8] ss:$48 sps:$4 sm:$0xff]   ;;  %v10433_v32 = vld [vmem:[%s12872_s4 + $0x64] ss:$48 sps:$4 sm:$0xff]   ;;  %v10431_v33 = vld [vmem:[%s12872_s4 + $0x60] ss:$48 sps:$4 sm:$0xff]  }
  0x4c   :  { %9346 = vmatpush3.bf16.msra.mxu0 %v10400_v21  ;;  %v10437_v43 = vld [vmem:[%s12872_s4 + $0xc4] ss:$48 sps:$4 sm:$0xff]   ;;  %v10435_v44 = vld [vmem:[%s12872_s4 + $0xc0] ss:$48 sps:$4 sm:$0xff]   ;;  %v10454_v57 = vld [vmem:[%s12872_s4 + $0x248] ss:$48 sps:$4 sm:$0xff]  }
  0x4d   :  { %9347 = vmatprep.subr.bf16.mxu0 %v10403_v24  ;;  %v10453_v55 = vld [vmem:[%s12872_s4 + $0x244] ss:$48 sps:$4 sm:$0xff]  }
  0x4e   :  { %9368 = vmatpush3.bf16.msra.mxu1 %v10402_v23 }
  0x4f   :  { %9369 = vmatprep.subr.bf16.mxu1 %v10405_v26 }
  0x50   :  { %9348 = vmatpush3.bf16.msra.mxu0 %v10404_v25 }
  0x51   :  { %9349 = vmatprep.subr.bf16.mxu0 %v10407_v28  ;;  %v10427_v28 = vld [vmem:[%s12872_s4] ss:$48 sps:$4 sm:$0xff]  }
  0x52   :  { %9370 = vmatpush3.bf16.msra.mxu1 %v10406_v27 }
  0x53   :  { %9371 = vmatprep.subr.bf16.mxu1 %v10409_v30  ;;  %v11044_v30 = vmov 0.0  }
  0x54   :  { %9350 = vmatpush3.bf16.msra.mxu0 %v10408_v29  ;;  %v10429_v29 = vld [vmem:[%s12872_s4 + $0x4] ss:$48 sps:$4 sm:$0xff]  }
  0x55   :  { %9379 = vmatprep.subr.bf16.mxu0 %v10411_v38 }
  0x56   :  { %9372 = vmatpush3.bf16.msra.mxu1 %v10410_v34 }
  0x57   :  { %514 = vmatmul.mubr.bf16.vlgmr.msra.gmra.mrb[0].mxu0 %v89_v37  ;;  %833 = vmatprep.subr.bf16.mxu1 %v10429_v29 }
  0x58   :  { %9380 = vmatpush3.bf16.msra.mxu0 %v10412_v42  ;;  %595 = vmatprep.mubr.bf16.mxu0 %v94_v59  ;;  %v10434_v42 = vld [vmem:[%s12872_s4 + $0x68] ss:$48 sps:$4 sm:$0xff]   ;;  %v10455_v59 = vld [vmem:[%s12872_s4 + $0x2a0] ss:$48 sps:$4 sm:$0xff]  }
  0x59   :  { %555 = vmatmul.mubr.bf16.vlgmr.msra.gmra.mrb[0].mxu1 %v91_v45  ;;  %9381 = vmatprep.subr.bf16.mxu0 %v10413_v46  ;;  %v10438_v45 = vld [vmem:[%s12872_s4 + $0xc8] ss:$48 sps:$4 sm:$0xff]   ;;  %v10441_v46 = vld [vmem:[%s12872_s4 + $0x124] ss:$48 sps:$4 sm:$0xff]  }
  0x5a   :  { %834 = vmatpush1.bf16.msra.mxu1 %v10427_v28 }
  0x5b   :  { %835 = vmatprep.subr.bf16.mxu1 %v10433_v32 }
  0x5c   :  { %9382 = vmatpush3.bf16.msra.mxu0 %v10414_v47  ;;  %v10439_v47 = vld [vmem:[%s12872_s4 + $0x120] ss:$48 sps:$4 sm:$0xff]  }
  0x5d   :  { %9383 = vmatprep.subr.bf16.mxu0 %v10415_v48  ;;  %v10442_v48 = vld [vmem:[%s12872_s4 + $0x128] ss:$48 sps:$4 sm:$0xff]  }
  0x5e   :  { %836 = vmatpush1.bf16.msra.mxu1 %v10431_v33 }
  0x5f   :  { %837 = vmatprep.subr.bf16.mxu1 %v10437_v43 }
  0x60   :  { %9384 = vmatpush3.bf16.msra.mxu0 %v10416_v49  ;;  %v10445_v49 = vld [vmem:[%s12872_s4 + $0x184] ss:$48 sps:$4 sm:$0xff]  }
  0x61   :  { %9385 = vmatprep.subr.bf16.mxu0 %v10417_v50  ;;  %v10443_v50 = vld [vmem:[%s12872_s4 + $0x180] ss:$48 sps:$4 sm:$0xff]  }
  0x62   :  { %838 = vmatpush1.bf16.msra.mxu1 %v10435_v44 }
  0x63   :  { %839 = vmatprep.subr.bf16.mxu1 %v10441_v46 }
  0x64   :  { %9386 = vmatpush3.bf16.msra.mxu0 %v10418_v51  ;;  %v10446_v51 = vld [vmem:[%s12872_s4 + $0x188] ss:$48 sps:$4 sm:$0xff]  }
  0x65   :  { %9387 = vmatprep.subr.bf16.mxu0 %v10419_v52  ;;  %v10449_v52 = vld [vmem:[%s12872_s4 + $0x1e4] ss:$48 sps:$4 sm:$0xff]  }
  0x66   :  { %840 = vmatpush1.bf16.msra.mxu1 %v10439_v47 }
  0x67   :  { %841 = vmatprep.subr.bf16.mxu1 %v10445_v49 }
  0x68   :  { %9388 = vmatpush3.bf16.msra.mxu0 %v10420_v53  ;;  %v10447_v53 = vld [vmem:[%s12872_s4 + $0x1e0] ss:$48 sps:$4 sm:$0xff]  }
  0x69   :  { %9389 = vmatprep.subr.bf16.mxu0 %v10421_v54  ;;  %v10450_v54 = vld [vmem:[%s12872_s4 + $0x1e8] ss:$48 sps:$4 sm:$0xff]  }
  0x6a   :  { %842 = vmatpush1.bf16.msra.mxu1 %v10443_v50 }
  0x6b   :  { %843 = vmatprep.subr.bf16.mxu1 %v10449_v52 }
  0x6c   :  { %9390 = vmatpush3.bf16.msra.mxu0 %v10422_v56  ;;  %v10451_v56 = vld [vmem:[%s12872_s4 + $0x240] ss:$48 sps:$4 sm:$0xff]  }
  0x6d   :  { %9391 = vmatprep.subr.bf16.mxu0 %v10423_v58  ;;  %v10457_v58 = vld [vmem:[%s12872_s4 + $0x2a4] ss:$48 sps:$4 sm:$0xff]  }
  0x6e   :  { %844 = vmatpush1.bf16.msra.mxu1 %v10447_v53 }
  0x6f   :  { %845 = vmatprep.subr.bf16.mxu1 %v10453_v55 }
  0x70   :  { %9392 = vmatpush3.bf16.msra.mxu0 %v10424_v60  ;;  %v10458_v60 = vld [vmem:[%s12872_s4 + $0x2a8] ss:$48 sps:$4 sm:$0xff]  }
  0x71   :  { %9393 = vmatprep.subr.bf16.mxu0 %v10425_v61  ;;  %v11045_v61 = vmov 0  }
  0x72   :  { %846 = vmatpush1.bf16.msra.mxu1 %v10451_v56  ;;  %865 = vmatprep.mubr.bf16.mxu1 %v11045_v61 }
  0x73   :  { %847 = vmatprep.subr.bf16.mxu1 %v10457_v58 }
  0x74   :  { %9394 = vmatpush3.bf16.msra.mxu0 %v10426_v62 }
  0x75   :  { %9778 = vmatprep.subr.bf16.mxu0 %v11044_v30 }
  0x76   :  { %848 = vmatpush1.bf16.msra.mxu1 %v10455_v59 }
  0x77   :  { %596 = vmatmul.mubr.bf16.vlgmr.msra.gmra.mrb[4].mxu0 %v93_v1  ;;  %9798 = vmatprep.subr.mxu1 %v11044_v30 }
  0x78   :  { %9779 = vmatpush3.bf16.msra.mxu0 %v10430_v31  ;;  %9794 = vmatprep.mubr.msk.bf16.mxu0 %vm11046_vm0, %v11044_v30 }
  0x79   :  { %9780 = vmatprep.subr.bf16.mxu0 %v11044_v30 }
  0x7c   :  { %9781 = vmatpush3.bf16.msra.mxu0 %v10434_v42 }
  0x7d   :  { %9782 = vmatprep.subr.bf16.mxu0 %v11044_v30 }
  0x80   :  { %9783 = vmatpush3.bf16.msra.mxu0 %v10438_v45 }
  0x81   :  { %9784 = vmatprep.subr.bf16.mxu0 %v11044_v30 }
  0x84   :  { %9785 = vmatpush3.bf16.msra.mxu0 %v10442_v48  ;;  %v11049_v48 = vmov -1e+30  }
  0x85   :  { %9786 = vmatprep.subr.bf16.mxu0 %v11044_v30 }
  0x88   :  { %9787 = vmatpush3.bf16.msra.mxu0 %v10446_v51 }
  0x89   :  { %9788 = vmatprep.subr.bf16.mxu0 %v11044_v30 }
  0x8c   :  { %9789 = vmatpush3.bf16.msra.mxu0 %v10450_v54 }
  0x8d   :  { %9790 = vmatprep.subr.bf16.mxu0 %v11044_v30 }
  0x90   :  { %9791 = vmatpush3.bf16.msra.mxu0 %v10454_v57 }
  0x91   :  { %9792 = vmatprep.subr.bf16.mxu0 %v11044_v30 }
  0x94   :  { %9793 = vmatpush3.bf16.msra.mxu0 %v10458_v60 }
  0x95   :  { %9838 = vmatprep.subr.bf16.mxu0 %v11044_v30 }
 0x12a   :  { %v9351_v2 = vpop.f32.mrb[0].mxu0 }
 0x12b   :  { %v9352_v4 = vpop.f32.mrb[1].mxu0 }
 0x12c   :  { %v9353_v5 = vadd.f32 %v9352_v4, %v9351_v2  ;;  %v9354_v6 = vpop.f32.mrb[2].mxu0  ;;  %v9373_v7 = vpop.f32.mrb[0].mxu1 }
 0x12d   :  { %v9355_v9 = vpop.f32.mrb[3].mxu0  ;;  %v9374_v12 = vpop.f32.mrb[1].mxu1 }
 0x12e   :  { %v516_v10 = vadd.f32 %v9353_v5, %v191_v3  ;;  %v9356_v11 = vadd.f32 %v9355_v9, %v9354_v6  ;;  %v9375_v13 = vadd.f32 %v9374_v12, %v9373_v7  ;;  %v9376_v14 = vpop.f32.mrb[2].mxu1  ;;  %v8762_v6 = vld [vmem:[%s12874_s6] ss:$0 sm:$0xff] }
 0x12f   :  { %v9377_v16 = vpop.f32.mrb[3].mxu1 }
 0x130   :  { %v519_v15 = vadd.f32 %v9356_v11, %v192_v8  ;;  %v557_v17 = vadd.f32 %v9375_v13, %v516_v10  ;;  %v9378_v18 = vadd.f32 %v9377_v16, %v9376_v14  ;;  %v8763_v10 = vld [vmem:[%s12874_s6 + $0x2] ss:$0 sm:$0xff] }
 0x132   :  { %v560_v19 = vadd.f32 %v9378_v18, %v519_v15  ;;  %v607_v15 = vlaneseq  ;;  %v8760_v18 = vld [vmem:[%s12874_s6 + $0x4] ss:$2 sm:$0x7] }
 0x134   :  { %v11300_v16 = vshrl.u32 %v607_v15, 7  ;;  %v608_v47 = vand.u32 127, %v607_v15 }
 0x136   :  { %vm609_vm2 = vcmp.lt.s32.totalorder %v608_v47, 5 }
 0x137   :  { %v11353_v49 = vsel %vm609_vm2, 0.0, %v11049_v48 }
 0x14a   :  { %v9395_v20 = vpop.f32.mrb[4].mxu0 }
 0x14b   :  { %v9396_v21 = vpop.f32.mrb[5].mxu0 }
 0x14c   :  { %v9397_v22 = vadd.f32 %v9396_v21, %v9395_v20  ;;  %v9398_v23 = vpop.f32.mrb[6].mxu0  ;;  %v11313_v21 = vsub.s32 2, %v11300_v16 }
 0x14d   :  { %v9399_v24 = vpop.f32.mrb[7].mxu0 }
 0x14e   :  { %v11187_v25 = vadd.f32 %v9397_v22, %v557_v17  ;;  %v9400_v26 = vadd.f32 %v9399_v24, %v9398_v23  ;;  %v11303_v17 = vsub.s32 0, %v11300_v16  ;;  %v701_v28 = vrot.slane %v8760_v18, %v11313_v21 }
 0x150   :  { %v11189_v27 = vadd.f32 %v9400_v26, %v560_v19  ;;  %621 = vadd.xlane.f32.xlu0 %v11187_v25  ;;  %v11309_v19 = vsub.s32 1, %v11300_v16  ;;  %v693_v20 = vrot.slane %v8760_v18, %v11303_v17 }
 0x152   :  { %v697_v22 = vrot.slane %v8760_v18, %v11309_v19 }
 0x154   :  { %623 = vadd.xlane.f32.xlu0 %v11189_v27 }
 0x1dd   :  { %v622_v34 = vpop.xlane.xlu0 %621 }
 0x1de   :  { %v626_v35 = vmul.f32 0.0078125, %v622_v34 }
 0x1e0   :  { %v11211_v36 = vsub.f32 %v11187_v25, %v626_v35 }
 0x1e1   :  { %v624_v37 = vpop.xlane.xlu0 %623 }
 0x1e2   :  { %v627_v38 = vmul.f32 0.0078125, %v624_v37  ;;  %v630_v39 = vmul.f32 %v11211_v36, %v11211_v36 }
 0x1e4   :  { %v11216_v40 = vsub.f32 %v11189_v27, %v627_v38  ;;  %632 = vadd.xlane.f32.xlu1 %v630_v39 }
 0x1e6   :  { %v631_v41 = vmul.f32 %v11216_v40, %v11216_v40 }
 0x1e8   :  { %634 = vadd.xlane.f32.xlu1 %v631_v41 }
 0x271   :  { %v633_v62 = vpop.xlane.xlu1 %632 }
 0x272   :  { %v636_v63 = vmul.f32 0.0078125, %v633_v62 }
 0x274   :  { %v638_v0 = vadd.f32 1e-06, %v636_v63 }
 0x275   :  { %v635_v1 = vpop.xlane.xlu1 %634 }
 0x276   :  { %10835 = vrsqrt.f32 %v638_v0  ;;  %v637_v2 = vmul.f32 0.0078125, %v635_v1 }
 0x278   :  { %v639_v3 = vadd.f32 1e-06, %v637_v2 }
 0x27a   :  { %10837 = vrsqrt.f32 %v639_v3 }
 0x280   :  { %v10836_v4 = vpop.eup %10835 }
 0x281   :  { %v642_v5 = vmul.f32 %v10836_v4, %v11211_v36 }
 0x283   :  { %v648_v9 = vmul.f32 %v8762_v6, %v642_v5 }
 0x284   :  { %v10838_v7 = vpop.eup %10837 }
 0x285   :  { %v643_v8 = vmul.f32 %v10838_v7, %v11216_v40  ;;  %v654_v12 = vadd.f32 %v8763_v10, %v648_v9 }
 0x287   :  { %v649_v11 = vmul.f32 %v8762_v6, %v643_v8 }
 0x289   :  { %v655_v13 = vadd.f32 %v8763_v10, %v649_v11 }
 0x28b   :  { %v688_v14 = vpack.c.bf16 %v655_v13, %v654_v12 }
 0x28d   :  { %866 = vmatmul.mubr.bf16.vlgmr.msra.gmra.mrb[4].mxu1 %v688_v14  ;;  %9795 = vmatmul.mubr.bf16.vlgmr.msra.gmra.mrb[8].mxu0 %v688_v14 }
 0x28e   :  { %9800 = vmatprep.mubr.msk.f32.mxu1 %vm11046_vm0, %v11044_v30  ;;  %9842 = vmatprep.mubr.msk.bf16.mxu0 %vm11046_vm0, %v11044_v30 }
 0x360   :  { %v867_v23 = vpop.f32.mrb[4].mxu1  ;;  %v910_v24 = vpop.f32.mrb[8].mxu0 }
 0x361   :  { %v868_v26 = vadd.f32 %v867_v23, %v693_v20  ;;  %v869_v29 = vpop.f32.mrb[5].mxu1  ;;  %v9796_v31 = vpop.f32.mrb[9].mxu0  ;;  %v11346_v45 = vadd.f32 %v910_v24, %v701_v28 }
 0x362   :  { %v870_v32 = vadd.f32 %v869_v29, %v697_v22  ;;  %v871_v33 = vpop.f32.mrb[6].mxu1  ;;  %v913_v34 = vpop.f32.mrb[10].mxu0 }
 0x363   :  { %v11317_v35 = vadd.f32 %v871_v33, %v693_v20  ;;  %v11319_v36 = vadd.f32 %v913_v34, %v701_v28  ;;  %v873_v37 = vpop.f32.mrb[7].mxu1  ;;  %v9797_v38 = vpop.f32.mrb[11].mxu0  ;;  %934 = vrot.lane.b32.xlu1 %v868_v26, %s11047_s20  ;;  %v11391_v33 = vld [vmem:[%s12872_s4 + $0xcc] ss:$48 sps:$4 sm:$0xff]  }
 0x364   :  { %v11322_v39 = vadd.f32 %v873_v37, %v697_v22  ;;  %941 = vrot.lane.b32.xlu0 %v870_v32, %s11047_s20  ;;  %9799 = vmatpush3.xpose.msk.msra.mxu1 %vm957_vm1, %v870_v32  ;;  %v11397_v34 = vld [vmem:[%s12872_s4 + $0x12c] ss:$48 sps:$4 sm:$0xff]  }
 0x365   :  { %9803 = vmatprep.subr.mxu1 %v11044_v30  ;;  %9839 = vmatpush3.bf16.msra.mxu0 %v11391_v33 }
 0x366   :  { %9840 = vmatprep.subr.bf16.mxu0 %v11044_v30 }
 0x367   :  { %943 = vrot.lane.b32.xlu1 %v870_v32, %s11041_s7  ;;  %9801 = vmatmul.mubr.msk.f32.vlgmr.msra.gmra.mrb[8].mxu1 %vm957_vm1, %v868_v26 }
 0x368   :  { %945 = vrot.lane.b32.xlu0 %v870_v32, %s11048_s21  ;;  %9805 = vmatprep.mubr.msk.f32.mxu1 %vm11046_vm0, %v11044_v30 }
 0x369   :  { %9841 = vmatpush3.bf16.msra.mxu0 %v11397_v34 }
 0x36a   :  { %9854 = vmatprep.subr.bf16.mxu0 %v11044_v30 }
 0x36b   :  { %936 = vrot.lane.b32.xlu1 %v868_v26, %s11041_s7 }
 0x36f   :  { %938 = vrot.lane.b32.xlu1 %v868_v26, %s11048_s21 }
 0x3d5   :  { %v935_v40 = vpop.permute.xlu1 %934 }
 0x3d6   :  { %v942_v41 = vpop.permute.xlu0 %941 }
 0x3d7   :  { %9804 = vmatpush3.xpose.msk.msra.mxu1 %vm957_vm1, %v942_v41 }
 0x3d8   :  { %9808 = vmatprep.subr.mxu1 %v11044_v30 }
 0x3d9   :  { %v944_v42 = vpop.permute.xlu1 %943 }
 0x3da   :  { %9806 = vmatmul.mubr.msk.f32.vlgmr.msra.gmra.mrb[10].mxu1 %vm957_vm1, %v935_v40  ;;  %v946_v44 = vpop.permute.xlu0 %945 }
 0x3db   :  { %9809 = vmatpush3.xpose.msk.msra.mxu1 %vm957_vm1, %v944_v42  ;;  %9810 = vmatprep.mubr.msk.f32.mxu1 %vm11046_vm0, %v11044_v30 }
 0x3dc   :  { %9813 = vmatprep.subr.mxu1 %v11044_v30 }
 0x3dd   :  { %v937_v43 = vpop.permute.xlu1 %936 }
 0x3de   :  { %9811 = vmatmul.mubr.msk.f32.vlgmr.msra.gmra.mrb[12].mxu1 %vm957_vm1, %v937_v43 }
 0x3df   :  { %9814 = vmatpush3.xpose.msk.msra.mxu1 %vm957_vm1, %v946_v44  ;;  %9815 = vmatprep.mubr.msk.f32.mxu1 %vm11046_vm0, %v11044_v30 }
 0x3e0   :  { %9818 = vmatprep.subr.mxu1 %v11044_v30 }
 0x3e1   :  { %v939_v46 = vpop.permute.xlu1 %938 }
 0x3e2   :  { %9816 = vmatmul.mubr.msk.f32.vlgmr.msra.gmra.mrb[14].mxu1 %vm957_vm1, %v939_v46 }
 0x3e3   :  { %9819 = vmatpush3.msra.mxu1 %v11346_v45  ;;  %9820 = vmatprep.mubr.msk.f32.mxu1 %vm11046_vm0, %v11044_v30 }
 0x3e4   :  { %9823 = vmatprep.subr.mxu1 %v11044_v30 }
 0x43a   :  { %v1028_v50 = vpop.f32.mrb[8].mxu1 }
 0x43b   :  { %v1029_v51 = vadd.f32 %v1028_v50, %v11353_v49  ;;  %v9802_v52 = vpop.f32.mrb[9].mxu1  ;;  %v11414_v50 = vld [vmem:[%s12872_s4 + $0xc] ss:$48 sps:$4 sm:$0xff]  }
 0x43c   :  { %v11421_v52 = vld [vmem:[%s12872_s4 + $0x6c] ss:$48 sps:$4 sm:$0xff]  }
 0x43d   :  { %v1255_v53 = vsel %vm1254_vm3, %v1029_v51, -inf }
 0x43e   :  { %1256 = vmax.xlane.f32.xlu0 %v1255_v53 }
 0x4ad   :  { %v1102_v54 = vpop.f32.mrb[10].mxu1 }
 0x4ae   :  { %v1103_v55 = vadd.f32 %v1102_v54, %v11353_v49  ;;  %v9807_v56 = vpop.f32.mrb[11].mxu1 }
 0x4af   :  { %v11434_v56 = vld [vmem:[%s12872_s4 + $0x24c] ss:$48 sps:$4 sm:$0xff]  }
 0x4b0   :  { %v1258_v57 = vsel %vm1254_vm3, %v1103_v55, -inf }
 0x4b1   :  { %1259 = vmax.xlane.f32.xlu1 %v1258_v57  ;;  %v1176_v58 = vpop.f32.mrb[12].mxu1  ;;  %v11440_v57 = vld [vmem:[%s12872_s4 + $0x2ac] ss:$48 sps:$4 sm:$0xff]  }
 0x4b2   :  { %v1177_v59 = vadd.f32 %v1176_v58, %v11353_v49  ;;  %v9812_v60 = vpop.f32.mrb[13].mxu1 }
 0x4b4   :  { %v1261_v62 = vsel %vm1254_vm3, %v1177_v59, -inf }
 0x4b5   :  { %1262 = vmax.xlane.f32.xlu0 %v1261_v62  ;;  %v1250_v63 = vpop.f32.mrb[14].mxu1 }
 0x4b6   :  { %v1251_v0 = vadd.f32 %v1250_v63, %v11353_v49  ;;  %v9817_v1 = vpop.f32.mrb[15].mxu1 }
 0x4b8   :  { %v1264_v2 = vsel %vm1254_vm3, %v1251_v0, -inf }
 0x4b9   :  { %1265 = vmax.xlane.f32.xlu0 %v1264_v2 }
 0x4cb   :  { %v1257_v3 = vpop.xlane.xlu0 %1256 }
 0x4cc   :  { %v1267_v4 = vsub.f32 %v1029_v51, %v1257_v3 }
 0x4ce   :  { %v1271_v5 = vmul.f32 1.442695, %v1267_v4 }
 0x4d0   :  { %10839 = vpow2.f32 %v1271_v5 }
 0x4da   :  { %v10840_v6 = vpop.eup %10839 }
 0x4db   :  { %v1279_v7 = vsel %vm1254_vm3, %v10840_v6, 0.0 }
 0x4dc   :  { %1280 = vadd.xlane.f32.xlu0 %v1279_v7 }
 0x53e   :  { %v1260_v8 = vpop.xlane.xlu1 %1259 }
 0x53f   :  { %v1268_v9 = vsub.f32 %v1103_v55, %v1260_v8 }
 0x541   :  { %v1273_v10 = vmul.f32 1.442695, %v1268_v9 }
 0x542   :  { %v1263_v11 = vpop.xlane.xlu0 %1262 }
 0x543   :  { %10841 = vpow2.f32 %v1273_v10  ;;  %v1269_v12 = vsub.f32 %v1177_v59, %v1263_v11  ;;  %v11448_v59 = vld [vmem:[%s12872_s4 + $0x18c] ss:$48 sps:$4 sm:$0xff]  }
 0x545   :  { %v1275_v13 = vmul.f32 1.442695, %v1269_v12 }
 0x546   :  { %v1266_v22 = vpop.xlane.xlu0 %1265 }
 0x547   :  { %10843 = vpow2.f32 %v1275_v13  ;;  %v1270_v24 = vsub.f32 %v1251_v0, %v1266_v22  ;;  %v11455_v0 = vld [vmem:[%s12872_s4 + $0x1ec] ss:$48 sps:$4 sm:$0xff]  }
 0x549   :  { %v1277_v26 = vmul.f32 1.442695, %v1270_v24 }
 0x54d   :  { %v10842_v14 = vpop.eup %10841 }
 0x54e   :  { %v1282_v15 = vsel %vm1254_vm3, %v10842_v14, 0.0 }
 0x54f   :  { %1283 = vadd.xlane.f32.xlu1 %v1282_v15 }
 0x551   :  { %v10844_v18 = vpop.eup %10843 }
 0x552   :  { %v1285_v20 = vsel %vm1254_vm3, %v10844_v18, 0.0 }
 0x553   :  { %1286 = vadd.xlane.f32.xlu0 %v1285_v20 }
 0x560   :  { %951 = vrot.lane.b32.xlu1 %v11346_v45, %s11041_s7 }
 0x569   :  { %948 = vrot.lane.b32.xlu0 %v11346_v45, %s11047_s20  ;;  %v1281_v23 = vpop.xlane.xlu0 %1280 }
 0x56a   :  { %10845 = vrcp.f32 %v1281_v23 }
 0x56b   :  { %10847 = vpow2.f32 %v1277_v26 }
 0x56d   :  { %1818 = vrot.lane.b32.xlu0 %v11317_v35, %s11047_s20 }
 0x571   :  { %1829 = vrot.lane.b32.xlu0 %v11322_v39, %s11048_s21 }
 0x574   :  { %v10846_v28 = vpop.eup %10845 }
 0x575   :  { %v1295_v29 = vmul.f32 %v10846_v28, %v10840_v6  ;;  %1822 = vrot.lane.b32.xlu0 %v11317_v35, %s11048_s21  ;;  %v10848_v31 = vpop.eup %10847 }
 0x576   :  { %v1288_v32 = vsel %vm1254_vm3, %v10848_v31, 0.0 }
 0x577   :  { %9821 = vmatmul.mubr.msk.f32.vlgmr.msra.gmra.mrb[16].mxu1 %vm1254_vm3, %v1295_v29 }
 0x578   :  { %9825 = vmatprep.mubr.msk.f32.mxu1 %vm11046_vm0, %v11044_v30 }
 0x584   :  { %1289 = vadd.xlane.f32.xlu1 %v1288_v32 }
 0x595   :  { %954 = vrot.lane.b32.xlu1 %v11346_v45, %s11048_s21 }
 0x599   :  { %1825 = vrot.lane.b32.xlu1 %v11322_v39, %s11047_s20 }
 0x59d   :  { %1827 = vrot.lane.b32.xlu1 %v11322_v39, %s11041_s7 }
 0x5a1   :  { %1820 = vrot.lane.b32.xlu1 %v11317_v35, %s11041_s7 }
 0x5dc   :  { %v1284_v37 = vpop.xlane.xlu1 %1283 }
 0x5dd   :  { %10849 = vrcp.f32 %v1284_v37 }
 0x5e0   :  { %v1287_v38 = vpop.xlane.xlu0 %1286  ;;  %v952_v43 = vpop.permute.xlu1 %951 }
 0x5e1   :  { %10851 = vrcp.f32 %v1287_v38 }
 0x5e4   :  { %v949_v40 = vpop.permute.xlu0 %948 }
 0x5e5   :  { %9824 = vmatpush3.msra.mxu1 %v949_v40 }
 0x5e6   :  { %9828 = vmatprep.subr.mxu1 %v11044_v30 }
 0x5e7   :  { %v10850_v41 = vpop.eup %10849 }
 0x5e8   :  { %v1296_v42 = vmul.f32 %v10850_v41, %v10842_v14  ;;  %v1819_v3 = vpop.permute.xlu0 %1818 }
 0x5ea   :  { %9826 = vmatmul.mubr.msk.f32.vlgmr.msra.gmra.mrb[18].mxu1 %vm1254_vm3, %v1296_v42 }
 0x5eb   :  { %v10852_v44 = vpop.eup %10851  ;;  %9829 = vmatpush3.msra.mxu1 %v952_v43  ;;  %9830 = vmatprep.mubr.msk.f32.mxu1 %vm11046_vm0, %v11044_v30 }
 0x5ec   :  { %v1297_v45 = vmul.f32 %v10852_v44, %v10844_v18  ;;  %9833 = vmatprep.subr.mxu1 %v11044_v30  ;;  %v1830_v5 = vpop.permute.xlu0 %1829 }
 0x5ee   :  { %9831 = vmatmul.mubr.msk.f32.vlgmr.msra.gmra.mrb[20].mxu1 %vm1254_vm3, %v1297_v45 }
 0x5ef   :  { %9835 = vmatprep.mubr.msk.f32.mxu1 %vm11046_vm0, %v11044_v30 }
 0x611   :  { %v1290_v46 = vpop.xlane.xlu1 %1289 }
 0x612   :  { %10853 = vrcp.f32 %v1290_v46 }
 0x615   :  { %v955_v47 = vpop.permute.xlu1 %954 }
 0x616   :  { %9834 = vmatpush3.msra.mxu1 %v955_v47 }
 0x617   :  { %9846 = vmatprep.subr.bf16.mxu1 %v11044_v30 }
 0x619   :  { %v1826_v4 = vpop.permute.xlu1 %1825 }
 0x61c   :  { %v10854_v48 = vpop.eup %10853 }
 0x61d   :  { %v1298_v51 = vmul.f32 %v10854_v48, %v10848_v31  ;;  %v1828_v8 = vpop.permute.xlu1 %1827 }
 0x61f   :  { %9836 = vmatmul.mubr.msk.f32.vlgmr.msra.gmra.mrb[22].mxu1 %vm1254_vm3, %v1298_v51 }
 0x620   :  { %9847 = vmatpush3.bf16.msra.mxu1 %v11414_v50  ;;  %9850 = vmatprep.mubr.msk.bf16.mxu1 %vm11046_vm0, %v11044_v30 }
 0x621   :  { %9848 = vmatprep.subr.bf16.mxu1 %v11044_v30  ;;  %v1821_v9 = vpop.permute.xlu1 %1820 }
 0x624   :  { %9849 = vmatpush3.bf16.msra.mxu1 %v11421_v52 }
 0x625   :  { %9862 = vmatprep.subr.bf16.mxu1 %v11044_v30 }
 0x64a   :  { %v1368_v53 = vpop.f32.mrb[16].mxu1 }
 0x64b   :  { %v1591_v54 = vpack.c.bf16 %v1368_v53, %v1368_v53  ;;  %v9822_v55 = vpop.f32.mrb[17].mxu1 }
 0x64d   :  { %9851 = vmatmul.mubr.msk.bf16.vlgmr.msra.gmra.mrb[24].mxu1 %vm957_vm1, %v1591_v54 }
 0x64e   :  { %9866 = vmatprep.mubr.msk.bf16.mxu1 %vm11046_vm0, %v11044_v30  ;;  %9863 = vmatpush3.bf16.msra.mxu1 %v11434_v56 }
 0x64f   :  { %9864 = vmatprep.subr.bf16.mxu1 %v11044_v30 }
 0x652   :  { %9865 = vmatpush3.bf16.msra.mxu1 %v11440_v57 }
 0x653   :  { %9880 = vmatprep.subr.mxu1 %v11044_v30 }
 0x6bd   :  { %v1441_v58 = vpop.f32.mrb[18].mxu1 }
 0x6be   :  { %v1592_v60 = vpack.c.bf16 %v1441_v58, %v1441_v58  ;;  %v9827_v62 = vpop.f32.mrb[19].mxu1 }
 0x6c0   :  { %9843 = vmatmul.mubr.msk.bf16.vlgmr.msra.gmra.mrb[12].mxu0 %vm957_vm1, %v1592_v60 }
 0x6c1   :  { %9855 = vmatpush3.bf16.msra.mxu0 %v11448_v59  ;;  %v1514_v63 = vpop.f32.mrb[20].mxu1  ;;  %9858 = vmatprep.mubr.msk.bf16.mxu0 %vm11046_vm0, %v11044_v30 }
 0x6c2   :  { %v9832_v1 = vpop.f32.mrb[21].mxu1  ;;  %9856 = vmatprep.subr.bf16.mxu0 %v11044_v30  ;;  %v1703_v2 = vpack.c.bf16 %v1514_v63, %v1514_v63 }
 0x6c5   :  { %9857 = vmatpush3.bf16.msra.mxu0 %v11455_v0 }
 0x6c6   :  { %9870 = vmatprep.subr.mxu0 %v11044_v30 }
 0x6c8   :  { %9859 = vmatmul.mubr.msk.bf16.vlgmr.msra.gmra.mrb[16].mxu0 %vm957_vm1, %v1703_v2 }
 0x6c9   :  { %9872 = vmatprep.mubr.msk.f32.mxu0 %vm11046_vm0, %v11044_v30 }
 0x6ce   :  { %9871 = vmatpush3.xpose.msk.msra.mxu0 %vm957_vm1, %v11322_v39  ;;  %v1823_v39 = vpop.permute.xlu0 %1822 }
 0x6cf   :  { %9875 = vmatprep.subr.mxu0 %v11044_v30 }
 0x6d1   :  { %9873 = vmatmul.mubr.msk.f32.vlgmr.msra.gmra.mrb[20].mxu0 %vm957_vm1, %v11317_v35 }
 0x6d2   :  { %9876 = vmatpush3.xpose.msk.msra.mxu0 %vm957_vm1, %v1826_v4  ;;  %9877 = vmatprep.mubr.msk.f32.mxu0 %vm11046_vm0, %v11044_v30 }
 0x6d3   :  { %9885 = vmatprep.subr.mxu0 %v11044_v30 }
 0x6d5   :  { %9878 = vmatmul.mubr.msk.f32.vlgmr.msra.gmra.mrb[22].mxu0 %vm957_vm1, %v1819_v3 }
 0x6d6   :  { %9886 = vmatpush3.xpose.msk.msra.mxu0 %vm957_vm1, %v1830_v5  ;;  %9887 = vmatprep.mubr.msk.f32.mxu0 %vm11046_vm0, %v11044_v30 }
 0x6d7   :  { %9895 = vmatprep.subr.mxu0 %v11044_v30 }
 0x6d9   :  { %9888 = vmatmul.mubr.msk.f32.vlgmr.msra.gmra.mrb[24].mxu0 %vm957_vm1, %v1823_v39 }
 0x6da   :  { %9897 = vmatprep.mubr.msk.f32.mxu0 %vm11046_vm0, %v11044_v30 }
 0x6f2   :  { %v1587_v35 = vpop.f32.mrb[22].mxu1 }
 0x6f3   :  { %v1760_v6 = vpack.c.bf16 %v1587_v35, %v1587_v35  ;;  %v9837_v7 = vpop.f32.mrb[23].mxu1 }
 0x6f5   :  { %9867 = vmatmul.mubr.msk.bf16.vlgmr.msra.gmra.mrb[28].mxu1 %vm957_vm1, %v1760_v6 }
 0x6f6   :  { %9881 = vmatpush3.xpose.msk.msra.mxu1 %vm957_vm1, %v1828_v8  ;;  %9882 = vmatprep.mubr.msk.f32.mxu1 %vm11046_vm0, %v11044_v30 }
 0x6f7   :  { %9890 = vmatprep.subr.mxu1 %v11044_v30 }
 0x6fd   :  { %9883 = vmatmul.mubr.msk.f32.vlgmr.msra.gmra.mrb[32].mxu1 %vm957_vm1, %v1821_v9 }
 0x6fe   :  { %9891 = vmatpush3.msra.mxu1 %v11319_v36  ;;  %9892 = vmatprep.mubr.msk.f32.mxu1 %vm11046_vm0, %v11044_v30 }
 0x6ff   :  { %9900 = vmatprep.subr.mxu1 %v11044_v30 }
 0x720   :  { %v1697_v10 = vpop.f32.mrb[24].mxu1 }
 0x721   :  { %v9852_v11 = vpop.f32.mrb[25].mxu1 }
 0x722   :  { %v1700_v12 = vpop.f32.mrb[26].mxu1 }
 0x723   :  { %v9853_v13 = vpop.f32.mrb[27].mxu1 }
 0x793   :  { %v1642_v14 = vpop.f32.mrb[12].mxu0 }
 0x794   :  { %v1698_v15 = vadd.f32 %v1697_v10, %v1642_v14  ;;  %v9844_v18 = vpop.f32.mrb[13].mxu0 }
 0x795   :  { %v1645_v20 = vpop.f32.mrb[14].mxu0 }
 0x796   :  { %v9845_v22 = vpop.f32.mrb[15].mxu0 }
 0x79b   :  { %v1753_v23 = vpop.f32.mrb[16].mxu0 }
 0x79c   :  { %v1759_v24 = vadd.f32 %v1753_v23, %v1698_v15  ;;  %v9860_v26 = vpop.f32.mrb[17].mxu0 }
 0x79d   :  { %v1756_v28 = vpop.f32.mrb[18].mxu0  ;;  %v11515_v26 = vld [vmem:[%s12874_s6 + $0xa] ss:$0 sm:$0xff] }
 0x79e   :  { %v9861_v29 = vpop.f32.mrb[19].mxu0 }
 0x7a4   :  { %v1911_v31 = vpop.f32.mrb[20].mxu0 }
 0x7a5   :  { %v1912_v32 = vadd.f32 %v1911_v31, %v11353_v49  ;;  %v9874_v37 = vpop.f32.mrb[21].mxu0 }
 0x7a7   :  { %v2137_v38 = vsel %vm1254_vm3, %v1912_v32, -inf }
 0x7a8   :  { %2138 = vmax.xlane.f32.xlu0 %v2137_v38  ;;  %v1985_v40 = vpop.f32.mrb[22].mxu0 }
 0x7a9   :  { %v1986_v41 = vadd.f32 %v1985_v40, %v11353_v49  ;;  %v9879_v42 = vpop.f32.mrb[23].mxu0 }
 0x7ab   :  { %v2140_v43 = vsel %vm1254_vm3, %v1986_v41, -inf }
 0x7ac   :  { %2141 = vmax.xlane.f32.xlu1 %v2140_v43  ;;  %v2133_v44 = vpop.f32.mrb[24].mxu0 }
 0x7ad   :  { %v9889_v45 = vpop.f32.mrb[25].mxu0  ;;  %v2134_v60 = vadd.f32 %v2133_v44, %v11353_v49 }
 0x7af   :  { %v2146_v63 = vsel %vm1254_vm3, %v2134_v60, -inf }
 0x7bd   :  { %1832 = vrot.lane.b32.xlu1 %v11319_v36, %s11047_s20 }
 0x7c8   :  { %v1810_v46 = vpop.f32.mrb[28].mxu1 }
 0x7c9   :  { %v1816_v47 = vadd.f32 %v1810_v46, %v1759_v24  ;;  %v9868_v48 = vpop.f32.mrb[29].mxu1 }
 0x7ca   :  { %v1813_v51 = vpop.f32.mrb[30].mxu1 }
 0x7cb   :  { %v9869_v53 = vpop.f32.mrb[31].mxu1  ;;  %v2651_v24 = vadd.f32 %v1816_v47, %v11187_v25 }
 0x7cd   :  { %v11518_v28 = vadd.f32 %v11515_v26, %v2651_v24  ;;  %v10472_v24 = vld [vmem:[%s12872_s4 + $0x1c] ss:$48 sps:$4 sm:$0xff]  }
 0x7d0   :  { %v2059_v54 = vpop.f32.mrb[32].mxu1 }
 0x7d1   :  { %v2060_v55 = vadd.f32 %v2059_v54, %v11353_v49  ;;  %v9884_v58 = vpop.f32.mrb[33].mxu1 }
 0x7d3   :  { %v2143_v62 = vsel %vm1254_vm3, %v2060_v55, -inf }
 0x7d4   :  { %2144 = vmax.xlane.f32.xlu0 %v2143_v62 }
 0x7d8   :  { %2147 = vmax.xlane.f32.xlu0 %v2146_v63 }
 0x835   :  { %v2139_v1 = vpop.xlane.xlu0 %2138 }
 0x836   :  { %v2149_v2 = vsub.f32 %v1912_v32, %v2139_v1 }
 0x838   :  { %v2153_v3 = vmul.f32 1.442695, %v2149_v2 }
 0x839   :  { %v2142_v4 = vpop.xlane.xlu1 %2141 }
 0x83a   :  { %10855 = vpow2.f32 %v2153_v3  ;;  %v2150_v6 = vsub.f32 %v1986_v41, %v2142_v4 }
 0x83c   :  { %v2155_v9 = vmul.f32 1.442695, %v2150_v6 }
 0x83d   :  { %v1833_v5 = vpop.permute.xlu1 %1832 }
 0x83e   :  { %9896 = vmatpush3.msra.mxu0 %v1833_v5 }
 0x83f   :  { %9905 = vmatprep.subr.mxu0 %v11044_v30 }
 0x844   :  { %v10856_v39 = vpop.eup %10855 }
 0x845   :  { %v2161_v35 = vsel %vm1254_vm3, %v10856_v39, 0.0 }
 0x846   :  { %2162 = vadd.xlane.f32.xlu0 %v2161_v35 }
 0x861   :  { %v2145_v7 = vpop.xlane.xlu0 %2144 }
 0x862   :  { %v2151_v8 = vsub.f32 %v2060_v55, %v2145_v7 }
 0x864   :  { %v2157_v10 = vmul.f32 1.442695, %v2151_v8 }
 0x865   :  { %v2148_v11 = vpop.xlane.xlu0 %2147 }
 0x866   :  { %10857 = vpow2.f32 %v2157_v10  ;;  %v2152_v12 = vsub.f32 %v2134_v60, %v2148_v11 }
 0x867   :  { %10859 = vpow2.f32 %v2155_v9 }
 0x868   :  { %v2159_v13 = vmul.f32 1.442695, %v2152_v12 }
 0x86a   :  { %10861 = vpow2.f32 %v2159_v13 }
 0x870   :  { %v10858_v14 = vpop.eup %10857 }
 0x871   :  { %v2167_v15 = vsel %vm1254_vm3, %v10858_v14, 0.0  ;;  %v10860_v18 = vpop.eup %10859 }
 0x872   :  { %2168 = vadd.xlane.f32.xlu1 %v2167_v15  ;;  %v2164_v22 = vsel %vm1254_vm3, %v10860_v18, 0.0 }
 0x874   :  { %v10862_v20 = vpop.eup %10861 }
 0x875   :  { %v2170_v23 = vsel %vm1254_vm3, %v10862_v20, 0.0 }
 0x876   :  { %2165 = vadd.xlane.f32.xlu1 %v2164_v22  ;;  %2171 = vadd.xlane.f32.xlu0 %v2170_v23  ;;  %v10467_v22 = vld [vmem:[%s12872_s4 + $0x10] ss:$48 sps:$4 sm:$0xff]   ;;  %v10470_v23 = vld [vmem:[%s12872_s4 + $0x18] ss:$48 sps:$4 sm:$0xff]  }
 0x887   :  { %1838 = vrot.lane.b32.xlu1 %v11319_v36, %s11048_s21 }
 0x88c   :  { %1835 = vrot.lane.b32.xlu0 %v11319_v36, %s11041_s7 }
 0x8ab   :  { %2659 = vadd.xlane.f32.xlu1 %v11518_v28 }
 0x8d3   :  { %v2163_v29 = vpop.xlane.xlu0 %2162 }
 0x8d4   :  { %10863 = vrcp.f32 %v2163_v29  ;;  %v10478_v29 = vld [vmem:[%s12872_s4 + $0x7c] ss:$48 sps:$4 sm:$0xff]  }
 0x8de   :  { %v10864_v31 = vpop.eup %10863 }
 0x8df   :  { %v2177_v32 = vmul.f32 %v10864_v31, %v10856_v39  ;;  %v10473_v31 = vld [vmem:[%s12872_s4 + $0x70] ss:$48 sps:$4 sm:$0xff]  }
 0x8e1   :  { %9893 = vmatmul.mubr.msk.f32.vlgmr.msra.gmra.mrb[34].mxu1 %vm1254_vm3, %v2177_v32  ;;  %v10476_v32 = vld [vmem:[%s12872_s4 + $0x78] ss:$48 sps:$4 sm:$0xff]  }
 0x8e2   :  { %9902 = vmatprep.mubr.msk.f32.mxu1 %vm11046_vm0, %v11044_v30 }
 0x8ff   :  { %v2169_v25 = vpop.xlane.xlu1 %2168 }
 0x900   :  { %10865 = vrcp.f32 %v2169_v25  ;;  %v10481_v25 = vld [vmem:[%s12872_s4 + $0xd4] ss:$48 sps:$4 sm:$0xff]  }
 0x903   :  { %v2166_v36 = vpop.xlane.xlu1 %2165  ;;  %v2172_v37 = vpop.xlane.xlu0 %2171 }
 0x904   :  { %10867 = vrcp.f32 %v2166_v36  ;;  %v10484_v36 = vld [vmem:[%s12872_s4 + $0xdc] ss:$48 sps:$4 sm:$0xff]  }
 0x905   :  { %10869 = vrcp.f32 %v2172_v37  ;;  %v10479_v37 = vld [vmem:[%s12872_s4 + $0xd0] ss:$48 sps:$4 sm:$0xff]  }
 0x907   :  { %v1836_v38 = vpop.permute.xlu0 %1835  ;;  %v1839_v45 = vpop.permute.xlu1 %1838 }
 0x908   :  { %9901 = vmatpush3.msra.mxu1 %v1836_v38  ;;  %v10482_v38 = vld [vmem:[%s12872_s4 + $0xd8] ss:$48 sps:$4 sm:$0xff]  }
 0x909   :  { %9910 = vmatprep.subr.bf16.mxu1 %v11044_v30 }
 0x90a   :  { %v10866_v40 = vpop.eup %10865 }
 0x90b   :  { %v2179_v41 = vmul.f32 %v10866_v40, %v10858_v14 }
 0x90d   :  { %9903 = vmatmul.mubr.msk.f32.vlgmr.msra.gmra.mrb[36].mxu1 %vm1254_vm3, %v2179_v41 }
 0x90e   :  { %v10868_v42 = vpop.eup %10867  ;;  %9911 = vmatpush3.bf16.msra.mxu1 %v11391_v33  ;;  %9914 = vmatprep.mubr.msk.bf16.mxu1 %vm11046_vm0, %v11044_v30 }
 0x90f   :  { %v2178_v43 = vmul.f32 %v10868_v42, %v10860_v18  ;;  %9912 = vmatprep.subr.bf16.mxu1 %v11044_v30  ;;  %v10870_v44 = vpop.eup %10869 }
 0x910   :  { %v2180_v46 = vmul.f32 %v10870_v44, %v10862_v20  ;;  %v10487_v44 = vld [vmem:[%s12872_s4 + $0x134] ss:$48 sps:$4 sm:$0xff]  }
 0x911   :  { %9898 = vmatmul.mubr.msk.f32.vlgmr.msra.gmra.mrb[26].mxu0 %vm1254_vm3, %v2178_v43 }
 0x912   :  { %9906 = vmatpush3.msra.mxu0 %v1839_v45  ;;  %9907 = vmatprep.mubr.msk.f32.mxu0 %vm11046_vm0, %v11044_v30  ;;  %v10490_v45 = vld [vmem:[%s12872_s4 + $0x13c] ss:$48 sps:$4 sm:$0xff]  }
 0x913   :  { %9918 = vmatprep.subr.bf16.mxu0 %v11044_v30  ;;  %9913 = vmatpush3.bf16.msra.mxu1 %v11397_v34 }
 0x914   :  { %9926 = vmatprep.subr.bf16.mxu1 %v11044_v30 }
 0x915   :  { %9908 = vmatmul.mubr.msk.f32.vlgmr.msra.gmra.mrb[28].mxu0 %vm1254_vm3, %v2180_v46  ;;  %v10485_v46 = vld [vmem:[%s12872_s4 + $0x130] ss:$48 sps:$4 sm:$0xff]  }
 0x916   :  { %9919 = vmatpush3.bf16.msra.mxu0 %v11414_v50  ;;  %9922 = vmatprep.mubr.msk.bf16.mxu0 %vm11046_vm0, %v11044_v30 }
 0x917   :  { %9920 = vmatprep.subr.bf16.mxu0 %v11044_v30 }
 0x91a   :  { %9921 = vmatpush3.bf16.msra.mxu0 %v11421_v52 }
 0x91b   :  { %9934 = vmatprep.subr.bf16.mxu0 %v11044_v30 }
 0x938   :  { %v2660_v6 = vpop.xlane.xlu1 %2659 }
 0x939   :  { %v2663_v11 = vmul.f32 0.0078125, %v2660_v6  ;;  %v8829_v6 = vld [vmem:[%s12874_s6 + $0xc] ss:$0 sm:$0xff] }
 0x93b   :  { %v11561_v15 = vsub.f32 %v11518_v28, %v2663_v11 }
 0x93d   :  { %v2667_v20 = vmul.f32 %v11561_v15, %v11561_v15 }
 0x9b4   :  { %v2250_v33 = vpop.f32.mrb[34].mxu1 }
 0x9b5   :  { %v2473_v47 = vpack.c.bf16 %v2250_v33, %v2250_v33  ;;  %v9894_v48 = vpop.f32.mrb[35].mxu1  ;;  %v10488_v33 = vld [vmem:[%s12872_s4 + $0x138] ss:$48 sps:$4 sm:$0xff]  }
 0x9b6   :  { %v10496_v48 = vld [vmem:[%s12872_s4 + $0x19c] ss:$48 sps:$4 sm:$0xff]  }
 0x9b7   :  { %9923 = vmatmul.mubr.msk.bf16.vlgmr.msra.gmra.mrb[32].mxu0 %vm957_vm1, %v2473_v47  ;;  %v10493_v47 = vld [vmem:[%s12872_s4 + $0x194] ss:$48 sps:$4 sm:$0xff]  }
 0x9b8   :  { %9935 = vmatpush3.bf16.msra.mxu0 %v11434_v56  ;;  %9938 = vmatprep.mubr.msk.bf16.mxu0 %vm11046_vm0, %v11044_v30 }
 0x9b9   :  { %9936 = vmatprep.subr.bf16.mxu0 %v11044_v30 }
 0x9bc   :  { %9937 = vmatpush3.bf16.msra.mxu0 %v11440_v57 }
 0x9bd   :  { %3014 = vmatprep.subr.bf16.mxu0 %v10472_v24  ;;  %v10520_v24 = vld [vmem:[%s12873_s5 + $0xc8] sm:$0xff]  }
 0x9e0   :  { %v2396_v34 = vpop.f32.mrb[36].mxu1 }
 0x9e1   :  { %v9904_v50 = vpop.f32.mrb[37].mxu1  ;;  %v2561_v57 = vpack.c.bf16 %v2396_v34, %v2396_v34  ;;  %v10491_v34 = vld [vmem:[%s12872_s4 + $0x190] ss:$48 sps:$4 sm:$0xff]  }
 0x9e2   :  { %v10494_v50 = vld [vmem:[%s12872_s4 + $0x198] ss:$48 sps:$4 sm:$0xff]  }
 0x9e4   :  { %v2323_v51 = vpop.f32.mrb[26].mxu0 }
 0x9e5   :  { %v2474_v52 = vpack.c.bf16 %v2323_v51, %v2323_v51  ;;  %v9899_v53 = vpop.f32.mrb[27].mxu0  ;;  %v10499_v51 = vld [vmem:[%s12872_s4 + $0x1f4] ss:$48 sps:$4 sm:$0xff]  }
 0x9e6   :  { %v10497_v53 = vld [vmem:[%s12872_s4 + $0x1f0] ss:$48 sps:$4 sm:$0xff]  }
 0x9e7   :  { %9915 = vmatmul.mubr.msk.bf16.vlgmr.msra.gmra.mrb[40].mxu1 %vm957_vm1, %v2474_v52  ;;  %v10502_v52 = vld [vmem:[%s12872_s4 + $0x1fc] ss:$48 sps:$4 sm:$0xff]  }
 0x9e8   :  { %v2469_v54 = vpop.f32.mrb[28].mxu0  ;;  %9927 = vmatpush3.bf16.msra.mxu1 %v11448_v59  ;;  %9930 = vmatprep.mubr.msk.bf16.mxu1 %vm11046_vm0, %v11044_v30 }
 0x9e9   :  { %v2606_v56 = vpack.c.bf16 %v2469_v54, %v2469_v54  ;;  %v9909_v55 = vpop.f32.mrb[29].mxu0  ;;  %9928 = vmatprep.subr.bf16.mxu1 %v11044_v30  ;;  %v10500_v54 = vld [vmem:[%s12872_s4 + $0x1f8] ss:$48 sps:$4 sm:$0xff]  }
 0x9ea   :  { %v10508_v55 = vld [vmem:[%s12872_s4 + $0x25c] ss:$48 sps:$4 sm:$0xff]  }
 0x9eb   :  { %9939 = vmatmul.mubr.msk.bf16.vlgmr.msra.gmra.mrb[36].mxu0 %vm957_vm1, %v2606_v56  ;;  %v10505_v56 = vld [vmem:[%s12872_s4 + $0x254] ss:$48 sps:$4 sm:$0xff]  }
 0x9ec   :  { %9929 = vmatpush3.bf16.msra.mxu1 %v11455_v0  ;;  %3046 = vmatprep.mubr.bf16.mxu0 %v11045_v61 }
 0x9ed   :  { %3015 = vmatpush1.bf16.msra.mxu0 %v10470_v23  ;;  %v10519_v23 = vld [vmem:[%s12873_s5 + $0x48] sm:$0xff]  }
 0x9ee   :  { %3016 = vmatprep.subr.bf16.mxu0 %v10478_v29  ;;  %v10522_v29 = vld [vmem:[%s12873_s5 + $0x88] sm:$0xff]  }
 0x9ef   :  { %9931 = vmatmul.mubr.msk.bf16.vlgmr.msra.gmra.mrb[44].mxu1 %vm957_vm1, %v2561_v57  ;;  %v10503_v57 = vld [vmem:[%s12872_s4 + $0x250] ss:$48 sps:$4 sm:$0xff]  }
 0x9f0   :  { %3003 = vmatprep.mubr.bf16.mxu1 %v11045_v61 }
 0x9f1   :  { %3017 = vmatpush1.bf16.msra.mxu0 %v10476_v32  ;;  %v10524_v32 = vld [vmem:[%s12873_s5 + $0xd0] sm:$0xff]  }
 0x9f2   :  { %3018 = vmatprep.subr.bf16.mxu0 %v10484_v36  ;;  %v10526_v36 = vld [vmem:[%s12873_s5 + $0x90] sm:$0xff]  }
 0x9f5   :  { %3019 = vmatpush1.bf16.msra.mxu0 %v10482_v38  ;;  %v10528_v38 = vld [vmem:[%s12873_s5 + $0xd8] sm:$0xff]  }
 0x9f6   :  { %3020 = vmatprep.subr.bf16.mxu0 %v10490_v45  ;;  %v10534_v45 = vld [vmem:[%s12873_s5 + $0xa0] sm:$0xff]  }
 0x9f9   :  { %3021 = vmatpush1.bf16.msra.mxu0 %v10488_v33  ;;  %v10536_v33 = vld [vmem:[%s12873_s5 + $0xe8] sm:$0xff]  }
 0x9fa   :  { %3022 = vmatprep.subr.bf16.mxu0 %v10496_v48  ;;  %v10538_v48 = vld [vmem:[%s12873_s5 + $0xa8] sm:$0xff]  }
 0x9fd   :  { %3023 = vmatpush1.bf16.msra.mxu0 %v10494_v50  ;;  %v10540_v50 = vld [vmem:[%s12873_s5 + $0xf0] sm:$0xff]  }
 0x9fe   :  { %3024 = vmatprep.subr.bf16.mxu0 %v10502_v52  ;;  %v10542_v52 = vld [vmem:[%s12873_s5 + $0xb0] sm:$0xff]  }
 0xa01   :  { %3025 = vmatpush1.bf16.msra.mxu0 %v10500_v54  ;;  %v10544_v54 = vld [vmem:[%s12873_s5 + $0xf8] sm:$0xff]  }
 0xa02   :  { %3026 = vmatprep.subr.bf16.mxu0 %v10508_v55  ;;  %v10546_v55 = vld [vmem:[%s12873_s5 + $0xb8] sm:$0xff]  }
 0xa8a   :  { %v2555_v58 = vpop.f32.mrb[32].mxu0 }
 0xa8b   :  { %v9924_v59 = vpop.f32.mrb[33].mxu0 }
 0xa8c   :  { %v2558_v60 = vpop.f32.mrb[34].mxu0  ;;  %v10511_v59 = vld [vmem:[%s12872_s4 + $0x2b4] ss:$48 sps:$4 sm:$0xff]  }
 0xa8d   :  { %v9925_v62 = vpop.f32.mrb[35].mxu0  ;;  %v10514_v60 = vld [vmem:[%s12872_s4 + $0x2bc] ss:$48 sps:$4 sm:$0xff]  }
 0xa8e   :  { %v10509_v62 = vld [vmem:[%s12872_s4 + $0x2b0] ss:$48 sps:$4 sm:$0xff]  }
 0xaba   :  { %v2512_v63 = vpop.f32.mrb[40].mxu1 }
 0xabb   :  { %v2556_v1 = vadd.f32 %v2555_v58, %v2512_v63  ;;  %v9916_v2 = vpop.f32.mrb[41].mxu1  ;;  %v10506_v58 = vld [vmem:[%s12872_s4 + $0x258] ss:$48 sps:$4 sm:$0xff]  }
 0xabc   :  { %v2515_v3 = vpop.f32.mrb[42].mxu1  ;;  %3027 = vmatpush1.bf16.msra.mxu0 %v10506_v58  ;;  %v10512_v63 = vld [vmem:[%s12872_s4 + $0x2b8] ss:$48 sps:$4 sm:$0xff]   ;;  %v11775_v58 = vsub.s32 3, %v11300_v16 }
 0xabd   :  { %v9917_v4 = vpop.f32.mrb[43].mxu1  ;;  %3028 = vmatprep.subr.bf16.mxu0 %v10514_v60 }
 0xabe   :  { %v2644_v5 = vpop.f32.mrb[36].mxu0 }
 0xabf   :  { %v9940_v39 = vpop.f32.mrb[37].mxu0 }
 0xac0   :  { %v2647_v35 = vpop.f32.mrb[38].mxu0  ;;  %3029 = vmatpush1.bf16.msra.mxu0 %v10512_v63 }
 0xac1   :  { %v9941_v0 = vpop.f32.mrb[39].mxu0 }
 0xac2   :  { %v2599_v7 = vpop.f32.mrb[44].mxu1 }
 0xac3   :  { %v2605_v8 = vadd.f32 %v2599_v7, %v2556_v1  ;;  %v9932_v9 = vpop.f32.mrb[45].mxu1 }
 0xac4   :  { %v2602_v10 = vpop.f32.mrb[46].mxu1 }
 0xac5   :  { %v2650_v12 = vadd.f32 %v2644_v5, %v2605_v8  ;;  %v9933_v13 = vpop.f32.mrb[47].mxu1  ;;  %v8830_v10 = vld [vmem:[%s12874_s6 + $0xe] ss:$0 sm:$0xff] }
 0xac7   :  { %v2652_v14 = vadd.f32 %v2650_v12, %v11189_v27  ;;  %v10469_v27 = vld [vmem:[%s12872_s4 + $0x14] ss:$48 sps:$4 sm:$0xff]  }
 0xac8   :  { %2971 = vmatprep.subr.bf16.mxu1 %v10469_v27  ;;  %v10518_v27 = vld [vmem:[%s12873_s5 + $0x80] sm:$0xff]  }
 0xac9   :  { %v11564_v18 = vadd.f32 %v11515_v26, %v2652_v14  ;;  %v10475_v26 = vld [vmem:[%s12872_s4 + $0x74] ss:$48 sps:$4 sm:$0xff]   ;;  %2972 = vmatpush1.bf16.msra.mxu1 %v10467_v22 }
 0xaca   :  { %2973 = vmatprep.subr.bf16.mxu1 %v10475_v26  ;;  %v10517_v22 = vld [vmem:[%s12873_s5] sm:$0xff]   ;;  %v10521_v26 = vld [vmem:[%s12873_s5 + $0x8] sm:$0xff]  }
 0xacb   :  { %2661 = vadd.xlane.f32.xlu0 %v11564_v18 }
 0xacd   :  { %2974 = vmatpush1.bf16.msra.mxu1 %v10473_v31  ;;  %v10523_v31 = vld [vmem:[%s12873_s5 + $0x50] sm:$0xff]  }
 0xace   :  { %2975 = vmatprep.subr.bf16.mxu1 %v10481_v25  ;;  %v10525_v25 = vld [vmem:[%s12873_s5 + $0x10] sm:$0xff]  }
 0xacf   :  { %2669 = vadd.xlane.f32.xlu0 %v2667_v20  ;;  %v10516_v20 = vld [vmem:[%s12873_s5 + $0xc0] sm:$0xff]  }
 0xad0   :  { %9488 = vmatprep.subr.bf16.mxu0 %v10516_v20 }
 0xad1   :  { %2976 = vmatpush1.bf16.msra.mxu1 %v10479_v37  ;;  %v10527_v37 = vld [vmem:[%s12873_s5 + $0x58] sm:$0xff]  }
 0xad2   :  { %2977 = vmatprep.subr.bf16.mxu1 %v10487_v44  ;;  %v10533_v44 = vld [vmem:[%s12873_s5 + $0x20] sm:$0xff]  }
 0xad5   :  { %2978 = vmatpush1.bf16.msra.mxu1 %v10485_v46  ;;  %v10535_v46 = vld [vmem:[%s12873_s5 + $0x68] sm:$0xff]  }
 0xad6   :  { %2979 = vmatprep.subr.bf16.mxu1 %v10493_v47  ;;  %v10537_v47 = vld [vmem:[%s12873_s5 + $0x28] sm:$0xff]  }
 0xad9   :  { %2980 = vmatpush1.bf16.msra.mxu1 %v10491_v34  ;;  %v10539_v34 = vld [vmem:[%s12873_s5 + $0x70] sm:$0xff]  }
 0xada   :  { %2981 = vmatprep.subr.bf16.mxu1 %v10499_v51  ;;  %v10541_v51 = vld [vmem:[%s12873_s5 + $0x30] sm:$0xff]  }
 0xadd   :  { %2982 = vmatpush1.bf16.msra.mxu1 %v10497_v53  ;;  %v10543_v53 = vld [vmem:[%s12873_s5 + $0x78] sm:$0xff]  }
 0xade   :  { %2983 = vmatprep.subr.bf16.mxu1 %v10505_v56  ;;  %v10545_v56 = vld [vmem:[%s12873_s5 + $0x38] sm:$0xff]  }
 0xae1   :  { %2984 = vmatpush1.bf16.msra.mxu1 %v10503_v57  ;;  %v8761_v57 = vld [vmem:[%s12874_s6 + $0x10] ss:$2 sm:$0xf] }
 0xae2   :  { %2985 = vmatprep.subr.bf16.mxu1 %v10511_v59  ;;  %v2794_v59 = vrot.slane %v8761_v57, %v11303_v17  ;;  %v2802_v60 = vrot.slane %v8761_v57, %v11313_v21  ;;  %v2806_v63 = vrot.slane %v8761_v57, %v11775_v58 }
 0xae5   :  { %2986 = vmatpush1.bf16.msra.mxu1 %v10509_v62  ;;  %v2798_v62 = vrot.slane %v8761_v57, %v11309_v19 }
 0xb58   :  { %v2662_v40 = vpop.xlane.xlu0 %2661 }
 0xb59   :  { %v2664_v41 = vmul.f32 0.0078125, %v2662_v40  ;;  %v10529_v40 = vld [vmem:[%s12873_s5 + $0x18] sm:$0xff]  }
 0xb5b   :  { %v2666_v42 = vsub.f32 %v11564_v18, %v2664_v41  ;;  %v10530_v41 = vld [vmem:[%s12873_s5 + $0x98] sm:$0xff]  }
 0xb5c   :  { %v2670_v1 = vpop.xlane.xlu0 %2669 }
 0xb5d   :  { %v2668_v43 = vmul.f32 %v2666_v42, %v2666_v42  ;;  %v2673_v2 = vmul.f32 0.0078125, %v2670_v1 }
 0xb5f   :  { %2671 = vadd.xlane.f32.xlu1 %v2668_v43  ;;  %v2675_v3 = vadd.f32 1e-06, %v2673_v2  ;;  %v10532_v43 = vld [vmem:[%s12873_s5 + $0xe0] sm:$0xff]  }
 0xb61   :  { %10871 = vrsqrt.f32 %v2675_v3 }
 0xb6b   :  { %v10872_v35 = vpop.eup %10871 }
 0xb6c   :  { %v2679_v0 = vmul.f32 %v10872_v35, %v11561_v15  ;;  %v10515_v15 = vld [vmem:[%s12873_s5 + $0x40] sm:$0xff]  }
 0xb6d   :  { %9466 = vmatprep.subr.bf16.mxu1 %v10515_v15 }
 0xb6e   :  { %v2685_v9 = vmul.f32 %v8829_v6, %v2679_v0 }
 0xb70   :  { %v2691_v12 = vadd.f32 %v8830_v10, %v2685_v9 }
 0xbec   :  { %v2672_v4 = vpop.xlane.xlu1 %2671 }
 0xbed   :  { %v2674_v5 = vmul.f32 0.0078125, %v2672_v4 }
 0xbef   :  { %v2676_v39 = vadd.f32 1e-06, %v2674_v5 }
 0xbf1   :  { %10873 = vrsqrt.f32 %v2676_v39 }
 0xbfb   :  { %v10874_v7 = vpop.eup %10873 }
 0xbfc   :  { %v2680_v8 = vmul.f32 %v10874_v7, %v2666_v42  ;;  %v10531_v42 = vld [vmem:[%s12873_s5 + $0x60] sm:$0xff]  }
 0xbfe   :  { %v2686_v11 = vmul.f32 %v8829_v6, %v2680_v8 }
 0xc00   :  { %v2692_v13 = vadd.f32 %v8830_v10, %v2686_v11 }
 0xc02   :  { %v2789_v14 = vpack.c.bf16 %v2692_v13, %v2691_v12 }
 0xc04   :  { %3004 = vmatmul.mubr.bf16.vlgmr.msra.gmra.mrb[48].mxu1 %v2789_v14  ;;  %3047 = vmatmul.mubr.bf16.vlgmr.msra.gmra.mrb[40].mxu0 %v2789_v14 }
 0xc05   :  { %9467 = vmatpush3.bf16.msra.mxu1 %v10517_v22  ;;  %9489 = vmatpush3.bf16.msra.mxu0 %v10518_v27 }
 0xc06   :  { %9468 = vmatprep.subr.bf16.mxu1 %v10519_v23  ;;  %9490 = vmatprep.subr.bf16.mxu0 %v10520_v24 }
 0xc09   :  { %9469 = vmatpush3.bf16.msra.mxu1 %v10521_v26  ;;  %9491 = vmatpush3.bf16.msra.mxu0 %v10522_v29 }
 0xc0a   :  { %9470 = vmatprep.subr.bf16.mxu1 %v10523_v31  ;;  %9492 = vmatprep.subr.bf16.mxu0 %v10524_v32 }
 0xc0d   :  { %9471 = vmatpush3.bf16.msra.mxu1 %v10525_v25  ;;  %9493 = vmatpush3.bf16.msra.mxu0 %v10526_v36 }
 0xc0e   :  { %9472 = vmatprep.subr.bf16.mxu1 %v10527_v37  ;;  %9494 = vmatprep.subr.bf16.mxu0 %v10528_v38 }
 0xc11   :  { %9473 = vmatpush3.bf16.msra.mxu1 %v10529_v40  ;;  %9495 = vmatpush3.bf16.msra.mxu0 %v10530_v41 }
 0xc12   :  { %9474 = vmatprep.subr.bf16.mxu1 %v10531_v42  ;;  %9496 = vmatprep.subr.bf16.mxu0 %v10532_v43 }
 0xc15   :  { %9475 = vmatpush3.bf16.msra.mxu1 %v10533_v44  ;;  %9497 = vmatpush3.bf16.msra.mxu0 %v10534_v45 }
 0xc16   :  { %9476 = vmatprep.subr.bf16.mxu1 %v10535_v46  ;;  %9498 = vmatprep.subr.bf16.mxu0 %v10536_v33 }
 0xc19   :  { %9477 = vmatpush3.bf16.msra.mxu1 %v10537_v47  ;;  %9499 = vmatpush3.bf16.msra.mxu0 %v10538_v48 }
 0xc1a   :  { %9478 = vmatprep.subr.bf16.mxu1 %v10539_v34  ;;  %9500 = vmatprep.subr.bf16.mxu0 %v10540_v50 }
 0xc1d   :  { %9479 = vmatpush3.bf16.msra.mxu1 %v10541_v51  ;;  %9501 = vmatpush3.bf16.msra.mxu0 %v10542_v52 }
 0xc1e   :  { %9480 = vmatprep.subr.bf16.mxu1 %v10543_v53  ;;  %9502 = vmatprep.subr.bf16.mxu0 %v10544_v54 }
 0xc21   :  { %9481 = vmatpush3.bf16.msra.mxu1 %v10545_v56  ;;  %9503 = vmatpush3.bf16.msra.mxu0 %v10546_v55 }
 0xc22   :  { %9962 = vmatprep.subr.bf16.mxu0 %v11044_v30  ;;  %9942 = vmatprep.subr.bf16.mxu1 %v11044_v30 }
 0xcd7   :  { %v3005_v1 = vpop.f32.mrb[48].mxu1  ;;  %v3048_v2 = vpop.f32.mrb[40].mxu0 }
 0xcd8   :  { %v11781_v3 = vadd.f32 %v3005_v1, %v2794_v59  ;;  %v11783_v4 = vadd.f32 %v3048_v2, %v2802_v60  ;;  %v3007_v5 = vpop.f32.mrb[49].mxu1  ;;  %v3050_v39 = vpop.f32.mrb[41].mxu0 }
 0xcd9   :  { %v11785_v35 = vadd.f32 %v3007_v5, %v2798_v62  ;;  %v11787_v0 = vadd.f32 %v3050_v39, %v2806_v63  ;;  %v3009_v6 = vpop.f32.mrb[50].mxu1  ;;  %v3052_v7 = vpop.f32.mrb[42].mxu0 }
 0xcda   :  { %v3057_v8 = vmul.f32 %v11781_v3, %v11781_v3  ;;  %v3059_v9 = vmul.f32 %v11783_v4, %v11783_v4  ;;  %v11793_v10 = vadd.f32 %v3009_v6, %v2794_v59  ;;  %v11795_v11 = vadd.f32 %v3052_v7, %v2802_v60  ;;  %v3011_v12 = vpop.f32.mrb[51].mxu1  ;;  %v3054_v13 = vpop.f32.mrb[43].mxu0 }
 0xcdb   :  { %v3058_v14 = vmul.f32 %v11785_v35, %v11785_v35  ;;  %v3060_v15 = vmul.f32 %v11787_v0, %v11787_v0  ;;  %v11801_v20 = vadd.f32 %v3011_v12, %v2798_v62  ;;  %v11803_v22 = vadd.f32 %v3054_v13, %v2806_v63 }
 0xcdc   :  { %v3065_v27 = vmul.f32 %v3057_v8, %v11781_v3  ;;  %v3067_v23 = vmul.f32 %v3059_v9, %v11783_v4  ;;  %v3061_v24 = vmul.f32 %v11793_v10, %v11793_v10  ;;  %v3063_v26 = vmul.f32 %v11795_v11, %v11795_v11 }
 0xcdd   :  { %v3066_v29 = vmul.f32 %v3058_v14, %v11785_v35  ;;  %v3068_v31 = vmul.f32 %v3060_v15, %v11787_v0  ;;  %v3062_v32 = vmul.f32 %v11801_v20, %v11801_v20  ;;  %v3064_v25 = vmul.f32 %v11803_v22, %v11803_v22 }
 0xcde   :  { %v3073_v36 = vmul.f32 0.044715, %v3065_v27  ;;  %v3075_v37 = vmul.f32 0.044715, %v3067_v23  ;;  %v3069_v38 = vmul.f32 %v3061_v24, %v11793_v10  ;;  %v3071_v40 = vmul.f32 %v3063_v26, %v11795_v11 }
 0xcdf   :  { %v3074_v41 = vmul.f32 0.044715, %v3066_v29  ;;  %v3076_v42 = vmul.f32 0.044715, %v3068_v31  ;;  %v3070_v43 = vmul.f32 %v3062_v32, %v11801_v20  ;;  %v3072_v44 = vmul.f32 %v3064_v25, %v11803_v22 }
 0xce0   :  { %v3081_v45 = vadd.f32 %v3073_v36, %v11781_v3  ;;  %v3083_v46 = vadd.f32 %v3075_v37, %v11783_v4  ;;  %v3077_v33 = vmul.f32 0.044715, %v3069_v38  ;;  %v3079_v47 = vmul.f32 0.044715, %v3071_v40 }
 0xce1   :  { %v3082_v48 = vadd.f32 %v3074_v41, %v11785_v35  ;;  %v3084_v34 = vadd.f32 %v3076_v42, %v11787_v0  ;;  %v3078_v50 = vmul.f32 0.044715, %v3070_v43  ;;  %v3080_v51 = vmul.f32 0.044715, %v3072_v44 }
 0xce2   :  { %v3089_v52 = vmul.f32 0.7978846, %v3081_v45  ;;  %v3091_v53 = vmul.f32 0.7978846, %v3083_v46  ;;  %v3085_v54 = vadd.f32 %v3077_v33, %v11793_v10  ;;  %v3087_v56 = vadd.f32 %v3079_v47, %v11795_v11 }
 0xce3   :  { %v3090_v55 = vmul.f32 0.7978846, %v3082_v48  ;;  %v3092_v57 = vmul.f32 0.7978846, %v3084_v34  ;;  %v3086_v59 = vadd.f32 %v3078_v50, %v11801_v20  ;;  %v3088_v60 = vadd.f32 %v3080_v51, %v11803_v22 }
 0xce4   :  { %10875 = vtanh.f32 %v3089_v52  ;;  %v3093_v62 = vmul.f32 0.7978846, %v3085_v54  ;;  %v3095_v63 = vmul.f32 0.7978846, %v3087_v56  ;;  %v10558_v54 = vld [vmem:[%s12872_s4 + $0x1a0] ss:$48 sps:$4 sm:$0xff]  }
 0xce5   :  { %10877 = vtanh.f32 %v3091_v53  ;;  %v3094_v1 = vmul.f32 0.7978846, %v3086_v59  ;;  %v3096_v2 = vmul.f32 0.7978846, %v3088_v60  ;;  %v10551_v53 = vld [vmem:[%s12872_s4 + $0x144] ss:$48 sps:$4 sm:$0xff]  }
 0xce6   :  { %10879 = vtanh.f32 %v3090_v55  ;;  %v10553_v56 = vld [vmem:[%s12872_s4 + $0x1a4] ss:$48 sps:$4 sm:$0xff]   ;;  %v10560_v59 = vld [vmem:[%s12872_s4 + $0x200] ss:$48 sps:$4 sm:$0xff]  }
 0xce7   :  { %10881 = vtanh.f32 %v3092_v57  ;;  %v10555_v55 = vld [vmem:[%s12872_s4 + $0x204] ss:$48 sps:$4 sm:$0xff]  }
 0xce8   :  { %10883 = vtanh.f32 %v3093_v62  ;;  %v10557_v57 = vld [vmem:[%s12872_s4 + $0x264] ss:$48 sps:$4 sm:$0xff]  }
 0xce9   :  { %10885 = vtanh.f32 %v3095_v63  ;;  %v10559_v60 = vld [vmem:[%s12872_s4 + $0x2c4] ss:$48 sps:$4 sm:$0xff]   ;;  %v605_v63 = vld [vmem:[%s12869_s1 + $0x8] sm:$0xff] }
 0xcea   :  { %10887 = vtanh.f32 %v3094_v1  ;;  %v604_v62 = vld [vmem:[%s12869_s1] sm:$0xff] }
 0xceb   :  { %10889 = vtanh.f32 %v3096_v2  ;;  %v10561_v1 = vld [vmem:[%s12872_s4 + $0x260] ss:$48 sps:$4 sm:$0xff]   ;;  %v11905_v2 = vpack.c.bf16 %v605_v63, %v604_v62 }
 0xcee   :  { %v10876_v5 = vpop.eup %10875 }
 0xcef   :  { %v10878_v39 = vpop.eup %10877  ;;  %v3105_v6 = vadd.f32 1.0, %v10876_v5  ;;  %v10562_v5 = vld [vmem:[%s12872_s4 + $0x2c0] ss:$48 sps:$4 sm:$0xff]  }
 0xcf0   :  { %v10880_v7 = vpop.eup %10879  ;;  %v3107_v8 = vadd.f32 1.0, %v10878_v39 }
 0xcf1   :  { %v10882_v9 = vpop.eup %10881  ;;  %v3106_v12 = vadd.f32 1.0, %v10880_v7  ;;  %v3113_v27 = vmul.f32 0.5, %v3105_v6 }
 0xcf2   :  { %v10884_v13 = vpop.eup %10883  ;;  %v3108_v14 = vadd.f32 1.0, %v10882_v9  ;;  %v3115_v26 = vmul.f32 0.5, %v3107_v8 }
 0xcf3   :  { %v10886_v15 = vpop.eup %10885  ;;  %v3109_v23 = vadd.f32 1.0, %v10884_v13  ;;  %v3114_v36 = vmul.f32 0.5, %v3106_v12  ;;  %v3121_v41 = vmul.f32 %v3113_v27, %v11781_v3  ;;  %v10550_v3 = vld [vmem:[%s12872_s4 + $0x20] ss:$48 sps:$4 sm:$0xff]  }
 0xcf4   :  { %v10888_v24 = vpop.eup %10887  ;;  %v3111_v29 = vadd.f32 1.0, %v10886_v15  ;;  %v3116_v40 = vmul.f32 0.5, %v3108_v14  ;;  %v3123_v44 = vmul.f32 %v3115_v26, %v11783_v4  ;;  %v10547_v4 = vld [vmem:[%s12872_s4 + $0x24] ss:$48 sps:$4 sm:$0xff]  }
 0xcf5   :  { %v10890_v31 = vpop.eup %10889  ;;  %v3117_v32 = vmul.f32 0.5, %v3109_v23  ;;  %v3110_v25 = vadd.f32 1.0, %v10888_v24  ;;  %v3122_v33 = vmul.f32 %v3114_v36, %v11785_v35  ;;  %v10552_v35 = vld [vmem:[%s12872_s4 + $0x80] ss:$48 sps:$4 sm:$0xff]  }
 0xcf6   :  { %v3119_v37 = vmul.f32 0.5, %v3111_v29  ;;  %v3112_v38 = vadd.f32 1.0, %v10890_v31  ;;  %v3124_v34 = vmul.f32 %v3116_v40, %v11787_v0  ;;  %v10548_v0 = vld [vmem:[%s12872_s4 + $0x84] ss:$48 sps:$4 sm:$0xff]  }
 0xcf7   :  { %v3125_v42 = vmul.f32 %v3117_v32, %v11793_v10  ;;  %v3118_v43 = vmul.f32 0.5, %v3110_v25  ;;  %v8895_v32 = vld [vmem:[%s12874_s6 + $0x18] ss:$0 sm:$0xff] }
 0xcf8   :  { %v3127_v45 = vmul.f32 %v3119_v37, %v11795_v11  ;;  %v3120_v46 = vmul.f32 0.5, %v3112_v38  ;;  %v10554_v11 = vld [vmem:[%s12872_s4 + $0xe0] ss:$48 sps:$4 sm:$0xff]  }
 0xcf9   :  { %v3126_v47 = vmul.f32 %v3118_v43, %v11801_v20  ;;  %v3129_v48 = vpack.c.bf16 %v3125_v42, %v3121_v41  ;;  %v10549_v20 = vld [vmem:[%s12872_s4 + $0xe4] ss:$48 sps:$4 sm:$0xff]  }
 0xcfa   :  { %v3128_v50 = vmul.f32 %v3120_v46, %v11803_v22  ;;  %v3131_v51 = vpack.c.bf16 %v3127_v45, %v3123_v44  ;;  %v10556_v22 = vld [vmem:[%s12872_s4 + $0x140] ss:$48 sps:$4 sm:$0xff]   ;;  %v10563_v46 = vld [vmem:[%s12872_s4 + $0x28] ss:$48 sps:$4 sm:$0xff]  }
 0xcfb   :  { %v3130_v52 = vpack.c.bf16 %v3126_v47, %v3122_v33  ;;  %v10564_v33 = vld [vmem:[%s12872_s4 + $0x88] ss:$48 sps:$4 sm:$0xff]  }
 0xcfc   :  { %v3132_v10 = vpack.c.bf16 %v3128_v50, %v3124_v34  ;;  %v10565_v47 = vld [vmem:[%s12872_s4 + $0xe8] ss:$48 sps:$4 sm:$0xff]  }
 0xcfd   :  { %3357 = vmatprep.mubr.bf16.mxu1 %v3130_v52  ;;  %v10567_v34 = vld [vmem:[%s12872_s4 + $0x1a8] ss:$48 sps:$4 sm:$0xff]  }
 0xcfe   :  { %3398 = vmatprep.mubr.bf16.mxu0 %v3132_v10  ;;  %3358 = vmatmul.mubr.bf16.vlgmr.msra.gmra.mrb[52].mxu1 %v3129_v48  ;;  %v10566_v48 = vld [vmem:[%s12872_s4 + $0x148] ss:$48 sps:$4 sm:$0xff]  }
 0xcff   :  { %3399 = vmatmul.mubr.bf16.vlgmr.msra.gmra.mrb[44].mxu0 %v3131_v51  ;;  %9943 = vmatpush3.bf16.msra.mxu1 %v10550_v3  ;;  %v10568_v50 = vld [vmem:[%s12872_s4 + $0x208] ss:$48 sps:$4 sm:$0xff]  }
 0xd00   :  { %9963 = vmatpush3.bf16.msra.mxu0 %v10547_v4  ;;  %9944 = vmatprep.subr.bf16.mxu1 %v11044_v30  ;;  %v10569_v51 = vld [vmem:[%s12872_s4 + $0x268] ss:$48 sps:$4 sm:$0xff]  }
 0xd01   :  { %9964 = vmatprep.subr.bf16.mxu0 %v11044_v30  ;;  %9978 = vmatprep.mubr.msk.bf16.mxu0 %vm11046_vm0, %v11044_v30  ;;  %v10570_v52 = vld [vmem:[%s12872_s4 + $0x2c8] ss:$48 sps:$4 sm:$0xff]  }
 0xd02   :  { %9958 = vmatprep.mubr.msk.bf16.mxu1 %vm11046_vm0, %v11044_v30 }
 0xd03   :  { %9945 = vmatpush3.bf16.msra.mxu1 %v10552_v35 }
 0xd04   :  { %9965 = vmatpush3.bf16.msra.mxu0 %v10548_v0  ;;  %9946 = vmatprep.subr.bf16.mxu1 %v11044_v30 }
 0xd05   :  { %9966 = vmatprep.subr.bf16.mxu0 %v11044_v30 }
 0xd07   :  { %9947 = vmatpush3.bf16.msra.mxu1 %v10554_v11 }
 0xd08   :  { %9967 = vmatpush3.bf16.msra.mxu0 %v10549_v20  ;;  %9948 = vmatprep.subr.bf16.mxu1 %v11044_v30 }
 0xd09   :  { %9968 = vmatprep.subr.bf16.mxu0 %v11044_v30 }
 0xd0b   :  { %9949 = vmatpush3.bf16.msra.mxu1 %v10556_v22 }
 0xd0c   :  { %9969 = vmatpush3.bf16.msra.mxu0 %v10551_v53  ;;  %9950 = vmatprep.subr.bf16.mxu1 %v11044_v30 }
 0xd0d   :  { %9970 = vmatprep.subr.bf16.mxu0 %v11044_v30 }
 0xd0f   :  { %9951 = vmatpush3.bf16.msra.mxu1 %v10558_v54 }
 0xd10   :  { %9971 = vmatpush3.bf16.msra.mxu0 %v10553_v56  ;;  %9952 = vmatprep.subr.bf16.mxu1 %v11044_v30 }
 0xd11   :  { %9972 = vmatprep.subr.bf16.mxu0 %v11044_v30 }
 0xd13   :  { %9953 = vmatpush3.bf16.msra.mxu1 %v10560_v59 }
 0xd14   :  { %9973 = vmatpush3.bf16.msra.mxu0 %v10555_v55  ;;  %9954 = vmatprep.subr.bf16.mxu1 %v11044_v30 }
 0xd15   :  { %9974 = vmatprep.subr.bf16.mxu0 %v11044_v30 }
 0xd17   :  { %9955 = vmatpush3.bf16.msra.mxu1 %v10561_v1 }
 0xd18   :  { %9975 = vmatpush3.bf16.msra.mxu0 %v10557_v57  ;;  %9956 = vmatprep.subr.bf16.mxu1 %v11044_v30 }
 0xd19   :  { %9976 = vmatprep.subr.bf16.mxu0 %v11044_v30 }
 0xd1b   :  { %9957 = vmatpush3.bf16.msra.mxu1 %v10562_v5 }
 0xd1c   :  { %9977 = vmatpush3.bf16.msra.mxu0 %v10559_v60  ;;  %9982 = vmatprep.subr.bf16.mxu1 %v11044_v30 }
 0xd1d   :  { %10002 = vmatprep.subr.mxu0 %v11044_v30 }
 0xd1f   :  { %9979 = vmatmul.mubr.bf16.vlgmr.msra.gmra.mrb[48].mxu0 %v11905_v2 }
 0xd20   :  { %10004 = vmatprep.mubr.msk.f32.mxu0 %vm11046_vm0, %v11044_v30 }
 0xdd1   :  { %v9482_v39 = vpop.f32.mrb[52].mxu1 }
 0xdd2   :  { %v9504_v6 = vpop.f32.mrb[44].mxu0  ;;  %v9483_v7 = vpop.f32.mrb[53].mxu1 }
 0xdd3   :  { %v9484_v8 = vadd.f32 %v9483_v7, %v9482_v39  ;;  %v9505_v9 = vpop.f32.mrb[45].mxu0  ;;  %v9485_v12 = vpop.f32.mrb[54].mxu1 }
 0xdd4   :  { %v9506_v13 = vadd.f32 %v9505_v9, %v9504_v6  ;;  %v9507_v14 = vpop.f32.mrb[46].mxu0  ;;  %v9486_v15 = vpop.f32.mrb[55].mxu1 }
 0xdd5   :  { %v9487_v27 = vadd.f32 %v9486_v15, %v9485_v12  ;;  %v9508_v23 = vpop.f32.mrb[47].mxu0  ;;  %v10571_v15 = vld [vmem:[%s12872_s4 + $0x2c] ss:$48 sps:$4 sm:$0xff]  }
 0xdd6   :  { %v3401_v24 = vadd.f32 %v9506_v13, %v9484_v8  ;;  %v9509_v26 = vadd.f32 %v9508_v23, %v9507_v14  ;;  %v10572_v23 = vld [vmem:[%s12872_s4 + $0x8c] ss:$48 sps:$4 sm:$0xff]  }
 0xdd8   :  { %v3407_v29 = vadd.f32 %v3401_v24, %v11518_v28  ;;  %v3404_v31 = vadd.f32 %v9509_v26, %v9487_v27  ;;  %v10573_v24 = vld [vmem:[%s12872_s4 + $0xec] ss:$48 sps:$4 sm:$0xff]  }
 0xdd9   :  { %v10574_v26 = vld [vmem:[%s12872_s4 + $0x14c] ss:$48 sps:$4 sm:$0xff]  }
 0xdda   :  { %v3408_v25 = vadd.f32 %v3404_v31, %v11564_v18  ;;  %v11921_v36 = vadd.f32 %v8895_v32, %v3407_v29  ;;  %v10575_v29 = vld [vmem:[%s12872_s4 + $0x1ac] ss:$48 sps:$4 sm:$0xff]  }
 0xddb   :  { %v10576_v31 = vld [vmem:[%s12872_s4 + $0x20c] ss:$48 sps:$4 sm:$0xff]  }
 0xddc   :  { %v11923_v37 = vadd.f32 %v8895_v32, %v3408_v25  ;;  %v10577_v32 = vld [vmem:[%s12872_s4 + $0x26c] ss:$48 sps:$4 sm:$0xff]  }
 0xddd   :  { %v10578_v25 = vld [vmem:[%s12872_s4 + $0x2cc] ss:$48 sps:$4 sm:$0xff]  }
 0xdde   :  { %v3479_v38 = vpack.c.bf16 %v11923_v37, %v11921_v36 }
 0xde0   :  { %9959 = vmatmul.mubr.bf16.vlgmr.msra.gmra.mrb[56].mxu1 %v3479_v38 }
 0xde1   :  { %9998 = vmatprep.mubr.msk.bf16.mxu1 %vm11046_vm0, %v11044_v30  ;;  %9983 = vmatpush3.bf16.msra.mxu1 %v10563_v46  ;;  %v10579_v46 = vld [vmem:[%s12872_s4 + $0x300] ss:$48 sps:$4 sm:$0xff]  }
 0xde2   :  { %9984 = vmatprep.subr.bf16.mxu1 %v11044_v30 }
 0xde5   :  { %9985 = vmatpush3.bf16.msra.mxu1 %v10564_v33  ;;  %v10581_v33 = vld [vmem:[%s12872_s4 + $0x304] ss:$48 sps:$4 sm:$0xff]  }
 0xde6   :  { %9986 = vmatprep.subr.bf16.mxu1 %v11044_v30 }
 0xde9   :  { %9987 = vmatpush3.bf16.msra.mxu1 %v10565_v47  ;;  %v10586_v47 = vld [vmem:[%s12872_s4 + $0x368] ss:$48 sps:$4 sm:$0xff]  }
 0xdea   :  { %9988 = vmatprep.subr.bf16.mxu1 %v11044_v30 }
 0xded   :  { %9989 = vmatpush3.bf16.msra.mxu1 %v10566_v48  ;;  %v10583_v48 = vld [vmem:[%s12872_s4 + $0x360] ss:$48 sps:$4 sm:$0xff]  }
 0xdee   :  { %9990 = vmatprep.subr.bf16.mxu1 %v11044_v30 }
 0xdf1   :  { %9991 = vmatpush3.bf16.msra.mxu1 %v10567_v34 }
 0xdf2   :  { %v3651_v40 = vpop.f32.mrb[48].mxu0  ;;  %9992 = vmatprep.subr.bf16.mxu1 %v11044_v30 }
 0xdf3   :  { %v9980_v28 = vpop.f32.mrb[49].mxu0  ;;  %10003 = vmatpush3.xpose.msra.mxu0 %v3651_v40 }
 0xdf4   :  { %v3654_v41 = vpop.f32.mrb[50].mxu0  ;;  %10007 = vmatprep.subr.mxu0 %v11044_v30 }
 0xdf5   :  { %v9981_v42 = vpop.f32.mrb[51].mxu0  ;;  %9993 = vmatpush3.bf16.msra.mxu1 %v10568_v50 }
 0xdf6   :  { %9994 = vmatprep.subr.bf16.mxu1 %v11044_v30 }
 0xdf9   :  { %9995 = vmatpush3.bf16.msra.mxu1 %v10569_v51 }
 0xdfa   :  { %9996 = vmatprep.subr.bf16.mxu1 %v11044_v30 }
 0xdfd   :  { %9997 = vmatpush3.bf16.msra.mxu1 %v10570_v52 }
 0xdfe   :  { %4369 = vmatprep.subr.bf16.mxu1 %v10581_v33 }
 0xe00   :  { %9999 = vmatmul.mubr.bf16.vlgmr.msra.gmra.mrb[60].mxu1 %v11905_v2 }
 0xe01   :  { %4401 = vmatprep.mubr.bf16.mxu1 %v11045_v61  ;;  %4370 = vmatpush1.bf16.msra.mxu1 %v10579_v46 }
 0xeb3   :  { %v3562_v43 = vpop.f32.mrb[56].mxu1 }
 0xeb4   :  { %v9960_v18 = vpop.f32.mrb[57].mxu1  ;;  %10005 = vmatmul.mubr.f32.vlgmr.msra.gmra.mrb[30].mxu0 %v3562_v43 }
 0xeb5   :  { %v3565_v44 = vpop.f32.mrb[58].mxu1  ;;  %10009 = vmatprep.mubr.msk.f32.mxu0 %vm11046_vm0, %v11044_v30 }
 0xeb6   :  { %v9961_v45 = vpop.f32.mrb[59].mxu1 }
 0xed3   :  { %v3740_v53 = vpop.f32.mrb[60].mxu1 }
 0xed4   :  { %v10000_v54 = vpop.f32.mrb[61].mxu1  ;;  %10008 = vmatpush3.msra.mxu0 %v3740_v53  ;;  %v10591_v53 = vld [vmem:[%s12872_s4 + $0x420] ss:$48 sps:$4 sm:$0xff]  }
 0xed5   :  { %v3743_v56 = vpop.f32.mrb[62].mxu1  ;;  %10012 = vmatprep.subr.mxu0 %v11044_v30  ;;  %v10594_v54 = vld [vmem:[%s12872_s4 + $0x428] ss:$48 sps:$4 sm:$0xff]  }
 0xed6   :  { %v10001_v55 = vpop.f32.mrb[63].mxu1 }
 0xed7   :  { %v10595_v55 = vld [vmem:[%s12872_s4 + $0x480] ss:$48 sps:$4 sm:$0xff]  }
 0xf87   :  { %v3813_v3 = vpop.f32.mrb[30].mxu0 }
 0xf88   :  { %v10006_v10 = vpop.f32.mrb[31].mxu0  ;;  %v3817_v4 = vsel %vm1254_vm3, %v3813_v3, -inf }
 0xf89   :  { %3818 = vmax.xlane.f32.xlu0 %v3817_v4 }
0x1016   :  { %v3819_v35 = vpop.xlane.xlu0 %3818 }
0x1017   :  { %v3820_v0 = vsub.f32 %v3813_v3, %v3819_v35 }
0x1019   :  { %v3821_v11 = vmul.f32 1.442695, %v3820_v0  ;;  %v10589_v0 = vld [vmem:[%s12872_s4 + $0x3c4] ss:$48 sps:$4 sm:$0xff]  }
0x101b   :  { %10891 = vpow2.f32 %v3821_v11  ;;  %v10587_v11 = vld [vmem:[%s12872_s4 + $0x3c0] ss:$48 sps:$4 sm:$0xff]  }
0x1025   :  { %v10892_v20 = vpop.eup %10891 }
0x1026   :  { %v3823_v22 = vsel %vm1254_vm3, %v10892_v20, 0.0 }
0x1027   :  { %3824 = vadd.xlane.f32.xlu1 %v3823_v22  ;;  %v10593_v22 = vld [vmem:[%s12872_s4 + $0x424] ss:$48 sps:$4 sm:$0xff]  }
0x10b4   :  { %v3825_v57 = vpop.xlane.xlu1 %3824 }
0x10b5   :  { %10893 = vrcp.f32 %v3825_v57  ;;  %v10598_v57 = vld [vmem:[%s12872_s4 + $0x488] ss:$48 sps:$4 sm:$0xff]  }
0x10bf   :  { %v10894_v59 = vpop.eup %10893 }
0x10c0   :  { %v3827_v60 = vmul.f32 %v10894_v59, %v10892_v20  ;;  %v10590_v20 = vld [vmem:[%s12872_s4 + $0x3c8] ss:$48 sps:$4 sm:$0xff]   ;;  %v10601_v59 = vld [vmem:[%s12872_s4 + $0x4e4] ss:$48 sps:$4 sm:$0xff]  }
0x10c2   :  { %10010 = vmatmul.mubr.msk.f32.vlgmr.msra.gmra.mrb[52].mxu0 %vm1254_vm3, %v3827_v60  ;;  %v10599_v60 = vld [vmem:[%s12872_s4 + $0x4e0] ss:$48 sps:$4 sm:$0xff]  }
0x10c3   :  { %10013 = vmatpush3.xpose.msra.mxu0 %v3654_v41  ;;  %10014 = vmatprep.mubr.msk.f32.mxu0 %vm11046_vm0, %v11044_v30 }
0x10c4   :  { %10017 = vmatprep.subr.mxu0 %v11044_v30 }
0x10c6   :  { %10015 = vmatmul.mubr.f32.vlgmr.msra.gmra.mrb[54].mxu0 %v3565_v44 }
0x10c7   :  { %10018 = vmatpush3.msra.mxu0 %v3743_v56  ;;  %10019 = vmatprep.mubr.msk.f32.mxu0 %vm11046_vm0, %v11044_v30  ;;  %v10597_v56 = vld [vmem:[%s12872_s4 + $0x484] ss:$48 sps:$4 sm:$0xff]  }
0x10c8   :  { %10022 = vmatprep.subr.bf16.mxu0 %v11044_v30 }
0x1195   :  { %v3897_v62 = vpop.f32.mrb[52].mxu0 }
0x1196   :  { %v10011_v63 = vpop.f32.mrb[53].mxu0 }
0x1197   :  { %v10605_v63 = vld [vmem:[%s12872_s4 + $0x544] ss:$48 sps:$4 sm:$0xff]  }
0x1199   :  { %v3967_v1 = vpop.f32.mrb[54].mxu0 }
0x119a   :  { %v10016_v5 = vpop.f32.mrb[55].mxu0  ;;  %v3971_v39 = vsel %vm1254_vm3, %v3967_v1, -inf }
0x119b   :  { %3972 = vmax.xlane.f32.xlu0 %v3971_v39  ;;  %v10606_v5 = vld [vmem:[%s12872_s4 + $0x548] ss:$48 sps:$4 sm:$0xff]   ;;  %v10609_v39 = vld [vmem:[%s12872_s4 + $0x5a4] ss:$48 sps:$4 sm:$0xff]  }
0x1228   :  { %v3973_v6 = vpop.xlane.xlu0 %3972 }
0x1229   :  { %v3974_v7 = vsub.f32 %v3967_v1, %v3973_v6  ;;  %v10603_v1 = vld [vmem:[%s12872_s4 + $0x540] ss:$48 sps:$4 sm:$0xff]  }
0x122a   :  { %v10607_v6 = vld [vmem:[%s12872_s4 + $0x5a0] ss:$48 sps:$4 sm:$0xff]  }
0x122b   :  { %v3975_v8 = vmul.f32 1.442695, %v3974_v7  ;;  %v10610_v7 = vld [vmem:[%s12872_s4 + $0x5a8] ss:$48 sps:$4 sm:$0xff]  }
0x122d   :  { %10895 = vpow2.f32 %v3975_v8 }
0x1237   :  { %v10896_v9 = vpop.eup %10895 }
0x1238   :  { %v3977_v12 = vsel %vm1254_vm3, %v10896_v9, 0.0 }
0x1239   :  { %3978 = vadd.xlane.f32.xlu1 %v3977_v12 }
0x12c6   :  { %v3979_v13 = vpop.xlane.xlu1 %3978 }
0x12c7   :  { %10897 = vrcp.f32 %v3979_v13 }
0x12d1   :  { %v10898_v14 = vpop.eup %10897 }
0x12d2   :  { %v3981_v27 = vmul.f32 %v10898_v14, %v10896_v9 }
0x12d4   :  { %10020 = vmatmul.mubr.msk.f32.vlgmr.msra.gmra.mrb[56].mxu0 %vm1254_vm3, %v3981_v27 }
0x12d5   :  { %10023 = vmatpush3.bf16.msra.mxu0 %v10571_v15  ;;  %10038 = vmatprep.mubr.msk.bf16.mxu0 %vm11046_vm0, %v11044_v30 }
0x12d6   :  { %10024 = vmatprep.subr.bf16.mxu0 %v11044_v30 }
0x12d9   :  { %10025 = vmatpush3.bf16.msra.mxu0 %v10572_v23  ;;  %v8932_v23 = vld [vmem:[%s12874_s6 + $0x1] ss:$0 sm:$0xff] }
0x12da   :  { %10026 = vmatprep.subr.bf16.mxu0 %v11044_v30 }
0x12dd   :  { %10027 = vmatpush3.bf16.msra.mxu0 %v10573_v24 }
0x12de   :  { %10028 = vmatprep.subr.bf16.mxu0 %v11044_v30 }
0x12e1   :  { %10029 = vmatpush3.bf16.msra.mxu0 %v10574_v26 }
0x12e2   :  { %10030 = vmatprep.subr.bf16.mxu0 %v11044_v30 }
0x12e5   :  { %10031 = vmatpush3.bf16.msra.mxu0 %v10575_v29 }
0x12e6   :  { %10032 = vmatprep.subr.bf16.mxu0 %v11044_v30 }
0x12e9   :  { %10033 = vmatpush3.bf16.msra.mxu0 %v10576_v31 }
0x12ea   :  { %10034 = vmatprep.subr.bf16.mxu0 %v11044_v30 }
0x12ed   :  { %10035 = vmatpush3.bf16.msra.mxu0 %v10577_v32  ;;  %v8933_v32 = vld [vmem:[%s12874_s6 + $0x3] ss:$0 sm:$0xff] }
0x12ee   :  { %10036 = vmatprep.subr.bf16.mxu0 %v11044_v30 }
0x12f1   :  { %10037 = vmatpush3.bf16.msra.mxu0 %v10578_v25 }
0x12f2   :  { %10042 = vmatprep.subr.bf16.mxu0 %v11044_v30 }
0x13a7   :  { %v4051_v38 = vpop.f32.mrb[56].mxu0 }
0x13a8   :  { %v4055_v40 = vpack.c.bf16 %v4051_v38, %v3897_v62  ;;  %v10021_v28 = vpop.f32.mrb[57].mxu0  ;;  %v10602_v62 = vld [vmem:[%s12872_s4 + $0x4e8] ss:$48 sps:$4 sm:$0xff]  }
0x13aa   :  { %10039 = vmatmul.mubr.bf16.vlgmr.msra.gmra.mrb[60].mxu0 %v4055_v40 }
0x13ab   :  { %10058 = vmatprep.mubr.msk.bf16.mxu0 %vm11046_vm0, %v11044_v30 }
0x147d   :  { %v4138_v41 = vpop.f32.mrb[60].mxu0 }
0x147e   :  { %v12015_v42 = vadd.f32 %v4138_v41, %v11921_v36  ;;  %v10040_v43 = vpop.f32.mrb[61].mxu0  ;;  %v10582_v36 = vld [vmem:[%s12872_s4 + $0x308] ss:$48 sps:$4 sm:$0xff]  }
0x147f   :  { %v4141_v18 = vpop.f32.mrb[62].mxu0  ;;  %10043 = vmatpush3.bf16.msra.mxu0 %v10582_v36  ;;  %v8930_v41 = vld [vmem:[%s12874_s6 + $0x5] ss:$2 sm:$0x7] }
0x1480   :  { %v12018_v44 = vadd.f32 %v4141_v18, %v11923_v37  ;;  %4157 = vadd.xlane.f32.xlu0 %v12015_v42  ;;  %v10041_v45 = vpop.f32.mrb[63].mxu0  ;;  %v10585_v37 = vld [vmem:[%s12872_s4 + $0x364] ss:$48 sps:$4 sm:$0xff]   ;;  %10044 = vmatprep.subr.bf16.mxu0 %v11044_v30  ;;  %v4229_v43 = vrot.slane %v8930_v41, %v11303_v17  ;;  %v4233_v18 = vrot.slane %v8930_v41, %v11309_v19 }
0x1481   :  { %4371 = vmatprep.subr.bf16.mxu1 %v10585_v37  ;;  %v4237_v36 = vrot.slane %v8930_v41, %v11313_v21 }
0x1482   :  { %4159 = vadd.xlane.f32.xlu1 %v12018_v44  ;;  %4372 = vmatpush1.bf16.msra.mxu1 %v10583_v48 }
0x1483   :  { %10045 = vmatpush3.bf16.msra.mxu0 %v10586_v47  ;;  %4373 = vmatprep.subr.bf16.mxu1 %v10589_v0 }
0x1484   :  { %10046 = vmatprep.subr.bf16.mxu0 %v11044_v30 }
0x1486   :  { %4374 = vmatpush1.bf16.msra.mxu1 %v10587_v11 }
0x1487   :  { %10047 = vmatpush3.bf16.msra.mxu0 %v10590_v20  ;;  %4375 = vmatprep.subr.bf16.mxu1 %v10593_v22 }
0x1488   :  { %10048 = vmatprep.subr.bf16.mxu0 %v11044_v30 }
0x148a   :  { %4376 = vmatpush1.bf16.msra.mxu1 %v10591_v53 }
0x148b   :  { %10049 = vmatpush3.bf16.msra.mxu0 %v10594_v54  ;;  %4377 = vmatprep.subr.bf16.mxu1 %v10597_v56 }
0x148c   :  { %10050 = vmatprep.subr.bf16.mxu0 %v11044_v30 }
0x148e   :  { %4378 = vmatpush1.bf16.msra.mxu1 %v10595_v55 }
0x148f   :  { %10051 = vmatpush3.bf16.msra.mxu0 %v10598_v57  ;;  %4379 = vmatprep.subr.bf16.mxu1 %v10601_v59 }
0x1490   :  { %10052 = vmatprep.subr.bf16.mxu0 %v11044_v30 }
0x1492   :  { %4380 = vmatpush1.bf16.msra.mxu1 %v10599_v60 }
0x1493   :  { %10053 = vmatpush3.bf16.msra.mxu0 %v10602_v62  ;;  %4381 = vmatprep.subr.bf16.mxu1 %v10605_v63 }
0x1494   :  { %10054 = vmatprep.subr.bf16.mxu0 %v11044_v30 }
0x1496   :  { %4382 = vmatpush1.bf16.msra.mxu1 %v10603_v1 }
0x1497   :  { %10055 = vmatpush3.bf16.msra.mxu0 %v10606_v5  ;;  %4383 = vmatprep.subr.bf16.mxu1 %v10609_v39 }
0x1498   :  { %10056 = vmatprep.subr.bf16.mxu0 %v11044_v30 }
0x149a   :  { %4384 = vmatpush1.bf16.msra.mxu1 %v10607_v6 }
0x149b   :  { %10057 = vmatpush3.bf16.msra.mxu0 %v10610_v7  ;;  %10062 = vmatprep.subr.mxu1 %v11044_v30 }
0x149c   :  { %10102 = vmatprep.subr.bf16.mxu0 %v11044_v30 }
0x150d   :  { %v4158_v34 = vpop.xlane.xlu0 %4157 }
0x150e   :  { %v4161_v50 = vmul.f32 0.0078125, %v4158_v34 }
0x150f   :  { %v4160_v51 = vpop.xlane.xlu1 %4159 }
0x1510   :  { %v4163_v52 = vsub.f32 %v12015_v42, %v4161_v50  ;;  %v4162_v3 = vmul.f32 0.0078125, %v4160_v51 }
0x1512   :  { %v4164_v10 = vsub.f32 %v12018_v44, %v4162_v3  ;;  %v4165_v4 = vmul.f32 %v4163_v52, %v4163_v52 }
0x1514   :  { %4167 = vadd.xlane.f32.xlu0 %v4165_v4  ;;  %v4166_v35 = vmul.f32 %v4164_v10, %v4164_v10 }
0x1516   :  { %4169 = vadd.xlane.f32.xlu1 %v4166_v35 }
0x15a1   :  { %v4168_v8 = vpop.xlane.xlu0 %4167 }
0x15a2   :  { %v4171_v9 = vmul.f32 0.0078125, %v4168_v8 }
0x15a3   :  { %v4170_v12 = vpop.xlane.xlu1 %4169 }
0x15a4   :  { %v4173_v13 = vadd.f32 1e-06, %v4171_v9  ;;  %v4172_v14 = vmul.f32 0.0078125, %v4170_v12 }
0x15a6   :  { %10899 = vrsqrt.f32 %v4173_v13  ;;  %v4174_v15 = vadd.f32 1e-06, %v4172_v14 }
0x15a8   :  { %10901 = vrsqrt.f32 %v4174_v15 }
0x15b0   :  { %v10900_v27 = vpop.eup %10899 }
0x15b1   :  { %v4177_v24 = vmul.f32 %v10900_v27, %v4163_v52 }
0x15b2   :  { %v10902_v26 = vpop.eup %10901 }
0x15b3   :  { %v4178_v29 = vmul.f32 %v10902_v26, %v4164_v10  ;;  %v4183_v31 = vmul.f32 %v8932_v23, %v4177_v24 }
0x15b5   :  { %v4184_v25 = vmul.f32 %v8932_v23, %v4178_v29  ;;  %v4189_v38 = vadd.f32 %v8933_v32, %v4183_v31 }
0x15b7   :  { %v4190_v40 = vadd.f32 %v8933_v32, %v4184_v25 }
0x15b9   :  { %v4224_v28 = vpack.c.bf16 %v4190_v40, %v4189_v38 }
0x15bb   :  { %4402 = vmatmul.mubr.bf16.vlgmr.msra.gmra.mrb[64].mxu1 %v4224_v28  ;;  %10059 = vmatmul.mubr.bf16.vlgmr.msra.gmra.mrb[64].mxu0 %v4224_v28 }
0x15bc   :  { %10064 = vmatprep.mubr.msk.f32.mxu1 %vm11046_vm0, %v11044_v30  ;;  %10106 = vmatprep.mubr.msk.bf16.mxu0 %vm11046_vm0, %v11044_v30 }
0x168e   :  { %v4403_v45 = vpop.f32.mrb[64].mxu1  ;;  %v4446_v46 = vpop.f32.mrb[64].mxu0 }
0x168f   :  { %v4404_v33 = vadd.f32 %v4403_v45, %v4229_v43  ;;  %v4405_v37 = vpop.f32.mrb[65].mxu1  ;;  %v10060_v47 = vpop.f32.mrb[65].mxu0  ;;  %v12150_v53 = vadd.f32 %v4446_v46, %v4237_v36 }
0x1690   :  { %v4406_v48 = vadd.f32 %v4405_v37, %v4233_v18  ;;  %v4407_v34 = vpop.f32.mrb[66].mxu1  ;;  %v4449_v50 = vpop.f32.mrb[66].mxu0 }
0x1691   :  { %v12121_v51 = vadd.f32 %v4407_v34, %v4229_v43  ;;  %v12123_v52 = vadd.f32 %v4449_v50, %v4237_v36  ;;  %v4409_v3 = vpop.f32.mrb[67].mxu1  ;;  %v10061_v10 = vpop.f32.mrb[67].mxu0  ;;  %4470 = vrot.lane.b32.xlu1 %v4404_v33, %s11047_s20  ;;  %v12193_v34 = vld [vmem:[%s12872_s4 + $0x3cc] ss:$48 sps:$4 sm:$0xff]  }
0x1692   :  { %v12126_v4 = vadd.f32 %v4409_v3, %v4233_v18  ;;  %4477 = vrot.lane.b32.xlu0 %v4406_v48, %s11047_s20  ;;  %10063 = vmatpush3.xpose.msk.msra.mxu1 %vm957_vm1, %v4406_v48  ;;  %v12199_v50 = vld [vmem:[%s12872_s4 + $0x42c] ss:$48 sps:$4 sm:$0xff]  }
0x1693   :  { %10067 = vmatprep.subr.mxu1 %v11044_v30  ;;  %10103 = vmatpush3.bf16.msra.mxu0 %v12193_v34 }
0x1694   :  { %10104 = vmatprep.subr.bf16.mxu0 %v11044_v30 }
0x1695   :  { %4479 = vrot.lane.b32.xlu1 %v4406_v48, %s11041_s7  ;;  %10065 = vmatmul.mubr.msk.f32.vlgmr.msra.gmra.mrb[38].mxu1 %vm957_vm1, %v4404_v33 }
0x1696   :  { %4481 = vrot.lane.b32.xlu0 %v4406_v48, %s11048_s21  ;;  %10069 = vmatprep.mubr.msk.f32.mxu1 %vm11046_vm0, %v11044_v30 }
0x1697   :  { %10105 = vmatpush3.bf16.msra.mxu0 %v12199_v50 }
0x1698   :  { %10118 = vmatprep.subr.bf16.mxu0 %v11044_v30 }
0x1699   :  { %4472 = vrot.lane.b32.xlu1 %v4404_v33, %s11041_s7 }
0x169d   :  { %4474 = vrot.lane.b32.xlu1 %v4404_v33, %s11048_s21 }
0x1703   :  { %v4471_v35 = vpop.permute.xlu1 %4470 }
0x1704   :  { %v4478_v0 = vpop.permute.xlu0 %4477 }
0x1705   :  { %10068 = vmatpush3.xpose.msk.msra.mxu1 %vm957_vm1, %v4478_v0 }
0x1706   :  { %10072 = vmatprep.subr.mxu1 %v11044_v30 }
0x1707   :  { %v4480_v11 = vpop.permute.xlu1 %4479 }
0x1708   :  { %10070 = vmatmul.mubr.msk.f32.vlgmr.msra.gmra.mrb[68].mxu1 %vm957_vm1, %v4471_v35  ;;  %v4482_v22 = vpop.permute.xlu0 %4481 }
0x1709   :  { %10073 = vmatpush3.xpose.msk.msra.mxu1 %vm957_vm1, %v4480_v11  ;;  %10074 = vmatprep.mubr.msk.f32.mxu1 %vm11046_vm0, %v11044_v30 }
0x170a   :  { %10077 = vmatprep.subr.mxu1 %v11044_v30 }
0x170b   :  { %v4473_v20 = vpop.permute.xlu1 %4472 }
0x170c   :  { %10075 = vmatmul.mubr.msk.f32.vlgmr.msra.gmra.mrb[70].mxu1 %vm957_vm1, %v4473_v20 }
0x170d   :  { %10078 = vmatpush3.xpose.msk.msra.mxu1 %vm957_vm1, %v4482_v22  ;;  %10079 = vmatprep.mubr.msk.f32.mxu1 %vm11046_vm0, %v11044_v30 }
0x170e   :  { %10082 = vmatprep.subr.mxu1 %v11044_v30 }
0x170f   :  { %v4475_v54 = vpop.permute.xlu1 %4474 }
0x1710   :  { %10080 = vmatmul.mubr.msk.f32.vlgmr.msra.gmra.mrb[72].mxu1 %vm957_vm1, %v4475_v54 }
0x1711   :  { %10083 = vmatpush3.msra.mxu1 %v12150_v53  ;;  %10084 = vmatprep.mubr.msk.f32.mxu1 %vm11046_vm0, %v11044_v30 }
0x1712   :  { %10087 = vmatprep.subr.mxu1 %v11044_v30 }
0x1768   :  { %v4563_v56 = vpop.f32.mrb[38].mxu1 }
0x1769   :  { %v4564_v55 = vadd.f32 %v4563_v56, %v11353_v49  ;;  %v10066_v57 = vpop.f32.mrb[39].mxu1 }
0x176a   :  { %v12216_v57 = vld [vmem:[%s12872_s4 + $0x30c] ss:$48 sps:$4 sm:$0xff]  }
0x176b   :  { %v4789_v59 = vsel %vm1254_vm3, %v4564_v55, -inf }
0x176c   :  { %4790 = vmax.xlane.f32.xlu0 %v4789_v59 }
0x17db   :  { %v4637_v60 = vpop.f32.mrb[68].mxu1 }
0x17dc   :  { %v4638_v62 = vadd.f32 %v4637_v60, %v11353_v49  ;;  %v10071_v63 = vpop.f32.mrb[69].mxu1  ;;  %v12223_v60 = vld [vmem:[%s12872_s4 + $0x36c] ss:$48 sps:$4 sm:$0xff]  }
0x17de   :  { %v4792_v1 = vsel %vm1254_vm3, %v4638_v62, -inf }
0x17df   :  { %4793 = vmax.xlane.f32.xlu1 %v4792_v1  ;;  %v4711_v5 = vpop.f32.mrb[70].mxu1 }
0x17e0   :  { %v4712_v39 = vadd.f32 %v4711_v5, %v11353_v49  ;;  %v10076_v6 = vpop.f32.mrb[71].mxu1  ;;  %v12236_v5 = vld [vmem:[%s12872_s4 + $0x54c] ss:$48 sps:$4 sm:$0xff]  }
0x17e2   :  { %v4795_v7 = vsel %vm1254_vm3, %v4712_v39, -inf }
0x17e3   :  { %4796 = vmax.xlane.f32.xlu0 %v4795_v7  ;;  %v4785_v8 = vpop.f32.mrb[72].mxu1  ;;  %v12250_v7 = vld [vmem:[%s12872_s4 + $0x48c] ss:$48 sps:$4 sm:$0xff]  }
0x17e4   :  { %v4786_v9 = vadd.f32 %v4785_v8, %v11353_v49  ;;  %v10081_v12 = vpop.f32.mrb[73].mxu1 }
0x17e6   :  { %v4798_v13 = vsel %vm1254_vm3, %v4786_v9, -inf }
0x17e7   :  { %4799 = vmax.xlane.f32.xlu0 %v4798_v13  ;;  %v12257_v13 = vld [vmem:[%s12872_s4 + $0x4ec] ss:$48 sps:$4 sm:$0xff]  }
0x17f9   :  { %v4791_v14 = vpop.xlane.xlu0 %4790 }
0x17fa   :  { %v4801_v15 = vsub.f32 %v4564_v55, %v4791_v14 }
0x17fc   :  { %v4805_v27 = vmul.f32 1.442695, %v4801_v15 }
0x17fe   :  { %10903 = vpow2.f32 %v4805_v27 }
0x1808   :  { %v10904_v23 = vpop.eup %10903 }
0x1809   :  { %v4813_v24 = vsel %vm1254_vm3, %v10904_v23, 0.0 }
0x180a   :  { %4814 = vadd.xlane.f32.xlu0 %v4813_v24 }
0x186c   :  { %v4794_v26 = vpop.xlane.xlu1 %4793 }
0x186d   :  { %v4802_v29 = vsub.f32 %v4638_v62, %v4794_v26 }
0x186f   :  { %v4807_v31 = vmul.f32 1.442695, %v4802_v29 }
0x1870   :  { %v4797_v32 = vpop.xlane.xlu0 %4796 }
0x1871   :  { %10905 = vpow2.f32 %v4807_v31  ;;  %v4803_v25 = vsub.f32 %v4712_v39, %v4797_v32  ;;  %v12242_v39 = vld [vmem:[%s12872_s4 + $0x5ac] ss:$48 sps:$4 sm:$0xff]  }
0x1873   :  { %v4809_v38 = vmul.f32 1.442695, %v4803_v25 }
0x1874   :  { %v4800_v18 = vpop.xlane.xlu0 %4799 }
0x1875   :  { %10907 = vpow2.f32 %v4809_v38  ;;  %v4804_v46 = vsub.f32 %v4786_v9, %v4800_v18 }
0x1877   :  { %v4811_v33 = vmul.f32 1.442695, %v4804_v46 }
0x187b   :  { %v10906_v40 = vpop.eup %10905 }
0x187c   :  { %v4816_v28 = vsel %vm1254_vm3, %v10906_v40, 0.0 }
0x187d   :  { %4817 = vadd.xlane.f32.xlu1 %v4816_v28 }
0x187f   :  { %v10908_v41 = vpop.eup %10907 }
0x1880   :  { %v4819_v43 = vsel %vm1254_vm3, %v10908_v41, 0.0 }
0x1881   :  { %4820 = vadd.xlane.f32.xlu0 %v4819_v43 }
0x188e   :  { %4487 = vrot.lane.b32.xlu1 %v12150_v53, %s11041_s7 }
0x1897   :  { %4484 = vrot.lane.b32.xlu0 %v12150_v53, %s11047_s20  ;;  %v4815_v45 = vpop.xlane.xlu0 %4814 }
0x1898   :  { %10909 = vrcp.f32 %v4815_v45 }
0x1899   :  { %10911 = vpow2.f32 %v4811_v33 }
0x189b   :  { %5352 = vrot.lane.b32.xlu0 %v12121_v51, %s11047_s20 }
0x189f   :  { %5363 = vrot.lane.b32.xlu0 %v12126_v4, %s11048_s21 }
0x18a2   :  { %v10910_v36 = vpop.eup %10909 }
0x18a3   :  { %v4829_v37 = vmul.f32 %v10910_v36, %v10904_v23  ;;  %5356 = vrot.lane.b32.xlu0 %v12121_v51, %s11048_s21  ;;  %v10912_v47 = vpop.eup %10911 }
0x18a4   :  { %v4822_v48 = vsel %vm1254_vm3, %v10912_v47, 0.0 }
0x18a5   :  { %10085 = vmatmul.mubr.msk.f32.vlgmr.msra.gmra.mrb[74].mxu1 %vm1254_vm3, %v4829_v37 }
0x18a6   :  { %10089 = vmatprep.mubr.msk.f32.mxu1 %vm11046_vm0, %v11044_v30 }
0x18b2   :  { %4823 = vadd.xlane.f32.xlu1 %v4822_v48 }
0x18c3   :  { %4490 = vrot.lane.b32.xlu1 %v12150_v53, %s11048_s21 }
0x18c7   :  { %5359 = vrot.lane.b32.xlu1 %v12126_v4, %s11047_s20 }
0x18cb   :  { %5361 = vrot.lane.b32.xlu1 %v12126_v4, %s11041_s7 }
0x18cf   :  { %5354 = vrot.lane.b32.xlu1 %v12121_v51, %s11041_s7 }
0x190a   :  { %v4818_v3 = vpop.xlane.xlu1 %4817 }
0x190b   :  { %10913 = vrcp.f32 %v4818_v3 }
0x190e   :  { %v4821_v10 = vpop.xlane.xlu0 %4820  ;;  %v4488_v20 = vpop.permute.xlu1 %4487 }
0x190f   :  { %10915 = vrcp.f32 %v4821_v10 }
0x1912   :  { %v4485_v35 = vpop.permute.xlu0 %4484 }
0x1913   :  { %10088 = vmatpush3.msra.mxu1 %v4485_v35 }
0x1914   :  { %10092 = vmatprep.subr.mxu1 %v11044_v30 }
0x1915   :  { %v10914_v0 = vpop.eup %10913 }
0x1916   :  { %v4830_v11 = vmul.f32 %v10914_v0, %v10906_v40  ;;  %v5353_v29 = vpop.permute.xlu0 %5352 }
0x1918   :  { %10090 = vmatmul.mubr.msk.f32.vlgmr.msra.gmra.mrb[76].mxu1 %vm1254_vm3, %v4830_v11 }
0x1919   :  { %v10916_v22 = vpop.eup %10915  ;;  %10093 = vmatpush3.msra.mxu1 %v4488_v20  ;;  %10094 = vmatprep.mubr.msk.f32.mxu1 %vm11046_vm0, %v11044_v30 }
0x191a   :  { %v4831_v53 = vmul.f32 %v10916_v22, %v10908_v41  ;;  %10097 = vmatprep.subr.mxu1 %v11044_v30  ;;  %v5364_v31 = vpop.permute.xlu0 %5363 }
0x191c   :  { %10095 = vmatmul.mubr.msk.f32.vlgmr.msra.gmra.mrb[78].mxu1 %vm1254_vm3, %v4831_v53 }
0x191d   :  { %10099 = vmatprep.mubr.msk.f32.mxu1 %vm11046_vm0, %v11044_v30 }
0x191e   :  { %v5357_v32 = vpop.permute.xlu0 %5356 }
0x193f   :  { %v4824_v54 = vpop.xlane.xlu1 %4823 }
0x1940   :  { %10917 = vrcp.f32 %v4824_v54 }
0x1943   :  { %v4491_v56 = vpop.permute.xlu1 %4490 }
0x1944   :  { %10098 = vmatpush3.msra.mxu1 %v4491_v56 }
0x1945   :  { %10110 = vmatprep.subr.bf16.mxu1 %v11044_v30 }
0x1947   :  { %v5360_v27 = vpop.permute.xlu1 %5359 }
0x194a   :  { %v10918_v55 = vpop.eup %10917 }
0x194b   :  { %v4832_v59 = vmul.f32 %v10918_v55, %v10912_v47  ;;  %v5362_v23 = vpop.permute.xlu1 %5361 }
0x194d   :  { %10100 = vmatmul.mubr.msk.f32.vlgmr.msra.gmra.mrb[80].mxu1 %vm1254_vm3, %v4832_v59 }
0x194e   :  { %10111 = vmatpush3.bf16.msra.mxu1 %v12216_v57  ;;  %10114 = vmatprep.mubr.msk.bf16.mxu1 %vm11046_vm0, %v11044_v30 }
0x194f   :  { %10112 = vmatprep.subr.bf16.mxu1 %v11044_v30  ;;  %v5355_v24 = vpop.permute.xlu1 %5354 }
0x1952   :  { %10113 = vmatpush3.bf16.msra.mxu1 %v12223_v60 }
0x1953   :  { %10126 = vmatprep.subr.bf16.mxu1 %v11044_v30 }
0x1978   :  { %v4902_v62 = vpop.f32.mrb[74].mxu1 }
0x1979   :  { %v5125_v63 = vpack.c.bf16 %v4902_v62, %v4902_v62  ;;  %v10086_v1 = vpop.f32.mrb[75].mxu1 }
0x197b   :  { %10115 = vmatmul.mubr.msk.bf16.vlgmr.msra.gmra.mrb[84].mxu1 %vm957_vm1, %v5125_v63 }
0x197c   :  { %10130 = vmatprep.mubr.msk.bf16.mxu1 %vm11046_vm0, %v11044_v30  ;;  %10127 = vmatpush3.bf16.msra.mxu1 %v12236_v5 }
0x197d   :  { %10128 = vmatprep.subr.bf16.mxu1 %v11044_v30 }
0x1980   :  { %10129 = vmatpush3.bf16.msra.mxu1 %v12242_v39 }
0x1981   :  { %10139 = vmatprep.subr.mxu1 %v11044_v30 }
0x19eb   :  { %v4975_v6 = vpop.f32.mrb[76].mxu1 }
0x19ec   :  { %v5126_v8 = vpack.c.bf16 %v4975_v6, %v4975_v6  ;;  %v10091_v9 = vpop.f32.mrb[77].mxu1 }
0x19ee   :  { %10107 = vmatmul.mubr.msk.bf16.vlgmr.msra.gmra.mrb[68].mxu0 %vm957_vm1, %v5126_v8 }
0x19ef   :  { %10119 = vmatpush3.bf16.msra.mxu0 %v12250_v7  ;;  %v5048_v12 = vpop.f32.mrb[78].mxu1  ;;  %10122 = vmatprep.mubr.msk.bf16.mxu0 %vm11046_vm0, %v11044_v30 }
0x19f0   :  { %v10096_v14 = vpop.f32.mrb[79].mxu1  ;;  %10120 = vmatprep.subr.bf16.mxu0 %v11044_v30  ;;  %v5237_v15 = vpack.c.bf16 %v5048_v12, %v5048_v12 }
0x19f3   :  { %10121 = vmatpush3.bf16.msra.mxu0 %v12257_v13 }
0x19f4   :  { %10134 = vmatprep.subr.mxu0 %v11044_v30 }
0x19f6   :  { %10123 = vmatmul.mubr.msk.bf16.vlgmr.msra.gmra.mrb[72].mxu0 %vm957_vm1, %v5237_v15 }
0x19f7   :  { %10136 = vmatprep.mubr.msk.f32.mxu0 %vm11046_vm0, %v11044_v30 }
0x19fc   :  { %10135 = vmatpush3.xpose.msk.msra.mxu0 %vm957_vm1, %v12126_v4 }
0x19fd   :  { %10144 = vmatprep.subr.mxu0 %v11044_v30 }
0x19ff   :  { %10137 = vmatmul.mubr.msk.f32.vlgmr.msra.gmra.mrb[58].mxu0 %vm957_vm1, %v12121_v51 }
0x1a00   :  { %10145 = vmatpush3.xpose.msk.msra.mxu0 %vm957_vm1, %v5362_v23  ;;  %10146 = vmatprep.mubr.msk.f32.mxu0 %vm11046_vm0, %v11044_v30 }
0x1a01   :  { %10154 = vmatprep.subr.mxu0 %v11044_v30 }
0x1a03   :  { %10147 = vmatmul.mubr.msk.f32.vlgmr.msra.gmra.mrb[76].mxu0 %vm957_vm1, %v5355_v24 }
0x1a04   :  { %10155 = vmatpush3.msra.mxu0 %v12123_v52  ;;  %10156 = vmatprep.mubr.msk.f32.mxu0 %vm11046_vm0, %v11044_v30 }
0x1a05   :  { %10164 = vmatprep.subr.mxu0 %v11044_v30 }
0x1a20   :  { %v5121_v4 = vpop.f32.mrb[80].mxu1 }
0x1a21   :  { %v5294_v26 = vpack.c.bf16 %v5121_v4, %v5121_v4  ;;  %v10101_v51 = vpop.f32.mrb[81].mxu1 }
0x1a23   :  { %10131 = vmatmul.mubr.msk.bf16.vlgmr.msra.gmra.mrb[88].mxu1 %vm957_vm1, %v5294_v26 }
0x1a24   :  { %10140 = vmatpush3.xpose.msk.msra.mxu1 %vm957_vm1, %v5360_v27  ;;  %10141 = vmatprep.mubr.msk.f32.mxu1 %vm11046_vm0, %v11044_v30 }
0x1a25   :  { %10149 = vmatprep.subr.mxu1 %v11044_v30 }
0x1a2b   :  { %10142 = vmatmul.mubr.msk.f32.vlgmr.msra.gmra.mrb[82].mxu1 %vm957_vm1, %v5353_v29 }
0x1a2c   :  { %10150 = vmatpush3.xpose.msk.msra.mxu1 %vm957_vm1, %v5364_v31  ;;  %10151 = vmatprep.mubr.msk.f32.mxu1 %vm11046_vm0, %v11044_v30 }
0x1a2d   :  { %10159 = vmatprep.subr.mxu1 %v11044_v30 }
0x1a2f   :  { %10152 = vmatmul.mubr.msk.f32.vlgmr.msra.gmra.mrb[92].mxu1 %vm957_vm1, %v5357_v32 }
0x1a30   :  { %10161 = vmatprep.mubr.msk.f32.mxu1 %vm11046_vm0, %v11044_v30 }
0x1a4e   :  { %v5231_v25 = vpop.f32.mrb[84].mxu1 }
0x1a4f   :  { %v10116_v38 = vpop.f32.mrb[85].mxu1 }
0x1a50   :  { %v5234_v40 = vpop.f32.mrb[86].mxu1 }
0x1a51   :  { %v10117_v28 = vpop.f32.mrb[87].mxu1 }
0x1ac1   :  { %v5176_v41 = vpop.f32.mrb[68].mxu0 }
0x1ac2   :  { %v5232_v43 = vadd.f32 %v5231_v25, %v5176_v41  ;;  %v10108_v18 = vpop.f32.mrb[69].mxu0 }
0x1ac3   :  { %v5179_v45 = vpop.f32.mrb[70].mxu0 }
0x1ac4   :  { %v10109_v46 = vpop.f32.mrb[71].mxu0 }
0x1ac9   :  { %v5287_v33 = vpop.f32.mrb[72].mxu0 }
0x1aca   :  { %v5293_v36 = vadd.f32 %v5287_v33, %v5232_v43  ;;  %v10124_v37 = vpop.f32.mrb[73].mxu0 }
0x1acb   :  { %v5290_v47 = vpop.f32.mrb[74].mxu0 }
0x1acc   :  { %v10125_v48 = vpop.f32.mrb[75].mxu0  ;;  %v12317_v47 = vld [vmem:[%s12874_s6 + $0xb] ss:$0 sm:$0xff] }
0x1ad2   :  { %v5445_v3 = vpop.f32.mrb[58].mxu0 }
0x1ad3   :  { %v5446_v10 = vadd.f32 %v5445_v3, %v11353_v49  ;;  %v10138_v35 = vpop.f32.mrb[59].mxu0 }
0x1ad5   :  { %v5671_v0 = vsel %vm1254_vm3, %v5446_v10, -inf }
0x1ad6   :  { %5672 = vmax.xlane.f32.xlu0 %v5671_v0  ;;  %v5593_v11 = vpop.f32.mrb[76].mxu0 }
0x1ad7   :  { %v5594_v20 = vadd.f32 %v5593_v11, %v11353_v49  ;;  %v10148_v22 = vpop.f32.mrb[77].mxu0 }
0x1ad9   :  { %v5677_v53 = vsel %vm1254_vm3, %v5594_v20, -inf }
0x1ada   :  { %5678 = vmax.xlane.f32.xlu0 %v5677_v53 }
0x1af6   :  { %v5344_v54 = vpop.f32.mrb[88].mxu1 }
0x1af7   :  { %v5350_v56 = vadd.f32 %v5344_v54, %v5293_v36  ;;  %v10132_v55 = vpop.f32.mrb[89].mxu1 }
0x1af8   :  { %v5347_v59 = vpop.f32.mrb[90].mxu1 }
0x1af9   :  { %v10133_v62 = vpop.f32.mrb[91].mxu1  ;;  %v6185_v37 = vadd.f32 %v5350_v56, %v12015_v42 }
0x1afb   :  { %v12320_v48 = vadd.f32 %v12317_v47, %v6185_v37  ;;  %v10622_v37 = vld [vmem:[%s12872_s4 + $0x318] ss:$48 sps:$4 sm:$0xff]  }
0x1afe   :  { %v5519_v63 = vpop.f32.mrb[82].mxu1 }
0x1aff   :  { %v5520_v1 = vadd.f32 %v5519_v63, %v11353_v49  ;;  %v10143_v6 = vpop.f32.mrb[83].mxu1 }
0x1b01   :  { %v5674_v8 = vsel %vm1254_vm3, %v5520_v1, -inf }
0x1b02   :  { %5675 = vmax.xlane.f32.xlu1 %v5674_v8  ;;  %v5667_v9 = vpop.f32.mrb[92].mxu1 }
0x1b03   :  { %v5668_v12 = vadd.f32 %v5667_v9, %v11353_v49  ;;  %v10153_v14 = vpop.f32.mrb[93].mxu1 }
0x1b05   :  { %v5680_v15 = vsel %vm1254_vm3, %v5668_v12, -inf }
0x1b06   :  { %5681 = vmax.xlane.f32.xlu0 %v5680_v15 }
0x1b13   :  { %5366 = vrot.lane.b32.xlu1 %v12123_v52, %s11047_s20 }
0x1b63   :  { %v5673_v27 = vpop.xlane.xlu0 %5672 }
0x1b64   :  { %v5683_v23 = vsub.f32 %v5446_v10, %v5673_v27 }
0x1b66   :  { %v5687_v24 = vmul.f32 1.442695, %v5683_v23 }
0x1b67   :  { %v5679_v51 = vpop.xlane.xlu0 %5678 }
0x1b68   :  { %10919 = vpow2.f32 %v5687_v24  ;;  %v5685_v29 = vsub.f32 %v5594_v20, %v5679_v51 }
0x1b6a   :  { %v5691_v49 = vmul.f32 1.442695, %v5685_v29 }
0x1b72   :  { %v10920_v4 = vpop.eup %10919 }
0x1b73   :  { %v5695_v26 = vsel %vm1254_vm3, %v10920_v4, 0.0 }
0x1b74   :  { %5696 = vadd.xlane.f32.xlu0 %v5695_v26 }
0x1b8f   :  { %v5676_v31 = vpop.xlane.xlu1 %5675 }
0x1b90   :  { %v5684_v32 = vsub.f32 %v5520_v1, %v5676_v31 }
0x1b92   :  { %v5689_v25 = vmul.f32 1.442695, %v5684_v32 }
0x1b93   :  { %v5367_v38 = vpop.permute.xlu1 %5366  ;;  %v5682_v40 = vpop.xlane.xlu0 %5681 }
0x1b94   :  { %10921 = vpow2.f32 %v5689_v25  ;;  %v5686_v28 = vsub.f32 %v5668_v12, %v5682_v40  ;;  %10160 = vmatpush3.msra.mxu1 %v5367_v38 }
0x1b95   :  { %10169 = vmatprep.subr.mxu1 %v11044_v30  ;;  %10923 = vpow2.f32 %v5691_v49 }
0x1b96   :  { %v5693_v41 = vmul.f32 1.442695, %v5686_v28 }
0x1b98   :  { %10925 = vpow2.f32 %v5693_v41 }
0x1b9e   :  { %v10922_v43 = vpop.eup %10921 }
0x1b9f   :  { %v5698_v18 = vsel %vm1254_vm3, %v10922_v43, 0.0  ;;  %v10924_v45 = vpop.eup %10923 }
0x1ba0   :  { %5699 = vadd.xlane.f32.xlu1 %v5698_v18  ;;  %v5701_v33 = vsel %vm1254_vm3, %v10924_v45, 0.0 }
0x1ba2   :  { %v10926_v46 = vpop.eup %10925 }
0x1ba3   :  { %v5704_v36 = vsel %vm1254_vm3, %v10926_v46, 0.0 }
0x1ba4   :  { %5702 = vadd.xlane.f32.xlu1 %v5701_v33  ;;  %5705 = vadd.xlane.f32.xlu0 %v5704_v36  ;;  %v10619_v36 = vld [vmem:[%s12872_s4 + $0x310] ss:$48 sps:$4 sm:$0xff]  }
0x1bb5   :  { %5372 = vrot.lane.b32.xlu1 %v12123_v52, %s11048_s21 }
0x1bba   :  { %5369 = vrot.lane.b32.xlu0 %v12123_v52, %s11041_s7 }
0x1bd9   :  { %6193 = vadd.xlane.f32.xlu1 %v12320_v48 }
0x1c01   :  { %v5697_v3 = vpop.xlane.xlu0 %5696 }
0x1c02   :  { %10927 = vrcp.f32 %v5697_v3  ;;  %v10627_v3 = vld [vmem:[%s12872_s4 + $0x374] ss:$48 sps:$4 sm:$0xff]  }
0x1c0c   :  { %v10928_v10 = vpop.eup %10927 }
0x1c0d   :  { %v5711_v35 = vmul.f32 %v10928_v10, %v10920_v4  ;;  %v10630_v10 = vld [vmem:[%s12872_s4 + $0x37c] ss:$48 sps:$4 sm:$0xff]  }
0x1c0f   :  { %10157 = vmatmul.mubr.msk.f32.vlgmr.msra.gmra.mrb[78].mxu0 %vm1254_vm3, %v5711_v35  ;;  %v10625_v35 = vld [vmem:[%s12872_s4 + $0x370] ss:$48 sps:$4 sm:$0xff]  }
0x1c10   :  { %10166 = vmatprep.mubr.msk.f32.mxu0 %vm11046_vm0, %v11044_v30 }
0x1c2d   :  { %v5700_v42 = vpop.xlane.xlu1 %5699 }
0x1c2e   :  { %10929 = vrcp.f32 %v5700_v42  ;;  %v10628_v42 = vld [vmem:[%s12872_s4 + $0x378] ss:$48 sps:$4 sm:$0xff]  }
0x1c31   :  { %v5703_v52 = vpop.xlane.xlu1 %5702  ;;  %v5706_v0 = vpop.xlane.xlu0 %5705 }
0x1c32   :  { %10931 = vrcp.f32 %v5703_v52  ;;  %v10633_v52 = vld [vmem:[%s12872_s4 + $0x3d4] ss:$48 sps:$4 sm:$0xff]  }
0x1c33   :  { %10933 = vrcp.f32 %v5706_v0  ;;  %v10636_v0 = vld [vmem:[%s12872_s4 + $0x3dc] ss:$48 sps:$4 sm:$0xff]  }
0x1c35   :  { %v5370_v11 = vpop.permute.xlu0 %5369  ;;  %v5373_v53 = vpop.permute.xlu1 %5372 }
0x1c36   :  { %10165 = vmatpush3.msra.mxu0 %v5370_v11  ;;  %v10631_v11 = vld [vmem:[%s12872_s4 + $0x3d0] ss:$48 sps:$4 sm:$0xff]  }
0x1c37   :  { %10174 = vmatprep.subr.bf16.mxu0 %v11044_v30 }
0x1c38   :  { %v10930_v20 = vpop.eup %10929 }
0x1c39   :  { %v5712_v22 = vmul.f32 %v10930_v20, %v10922_v43  ;;  %v10634_v20 = vld [vmem:[%s12872_s4 + $0x3d8] ss:$48 sps:$4 sm:$0xff]  }
0x1c3b   :  { %10162 = vmatmul.mubr.msk.f32.vlgmr.msra.gmra.mrb[94].mxu1 %vm1254_vm3, %v5712_v22 }
0x1c3c   :  { %v10932_v54 = vpop.eup %10931  ;;  %10170 = vmatpush3.msra.mxu1 %v5373_v53  ;;  %10171 = vmatprep.mubr.msk.f32.mxu1 %vm11046_vm0, %v11044_v30 }
0x1c3d   :  { %v10934_v56 = vpop.eup %10933  ;;  %v5713_v55 = vmul.f32 %v10932_v54, %v10924_v45  ;;  %10182 = vmatprep.subr.bf16.mxu1 %v11044_v30 }
0x1c3e   :  { %v5714_v59 = vmul.f32 %v10934_v56, %v10926_v46 }
0x1c3f   :  { %10167 = vmatmul.mubr.msk.f32.vlgmr.msra.gmra.mrb[80].mxu0 %vm1254_vm3, %v5713_v55  ;;  %v10639_v55 = vld [vmem:[%s12872_s4 + $0x434] ss:$48 sps:$4 sm:$0xff]  }
0x1c40   :  { %10172 = vmatmul.mubr.msk.f32.vlgmr.msra.gmra.mrb[96].mxu1 %vm1254_vm3, %v5714_v59  ;;  %10175 = vmatpush3.bf16.msra.mxu0 %v12193_v34  ;;  %v10642_v59 = vld [vmem:[%s12872_s4 + $0x43c] ss:$48 sps:$4 sm:$0xff]  }
0x1c41   :  { %10183 = vmatpush3.bf16.msra.mxu1 %v12216_v57  ;;  %10186 = vmatprep.mubr.msk.bf16.mxu1 %vm11046_vm0, %v11044_v30 }
0x1c42   :  { %10184 = vmatprep.subr.bf16.mxu1 %v11044_v30  ;;  %10176 = vmatprep.subr.bf16.mxu0 %v11044_v30 }
0x1c43   :  { %10178 = vmatprep.mubr.msk.bf16.mxu0 %vm11046_vm0, %v11044_v30 }
0x1c44   :  { %10177 = vmatpush3.bf16.msra.mxu0 %v12199_v50 }
0x1c45   :  { %10185 = vmatpush3.bf16.msra.mxu1 %v12223_v60  ;;  %10190 = vmatprep.subr.bf16.mxu0 %v11044_v30 }
0x1c46   :  { %10198 = vmatprep.subr.bf16.mxu1 %v11044_v30 }
0x1c66   :  { %v6194_v31 = vpop.xlane.xlu1 %6193 }
0x1c67   :  { %v6197_v28 = vmul.f32 0.0078125, %v6194_v31 }
0x1c69   :  { %v12363_v45 = vsub.f32 %v12320_v48, %v6197_v28  ;;  %v9048_v28 = vld [vmem:[%s12874_s6 + $0xf] ss:$0 sm:$0xff] }
0x1c6b   :  { %v6201_v33 = vmul.f32 %v12363_v45, %v12363_v45 }
0x1ce2   :  { %v5784_v34 = vpop.f32.mrb[78].mxu0 }
0x1ce3   :  { %v6007_v57 = vpack.c.bf16 %v5784_v34, %v5784_v34  ;;  %v10158_v62 = vpop.f32.mrb[79].mxu0  ;;  %v10637_v34 = vld [vmem:[%s12872_s4 + $0x430] ss:$48 sps:$4 sm:$0xff]  }
0x1ce4   :  { %v10645_v62 = vld [vmem:[%s12872_s4 + $0x494] ss:$48 sps:$4 sm:$0xff]  }
0x1ce5   :  { %10187 = vmatmul.mubr.msk.bf16.vlgmr.msra.gmra.mrb[100].mxu1 %vm957_vm1, %v6007_v57  ;;  %v10640_v57 = vld [vmem:[%s12872_s4 + $0x438] ss:$48 sps:$4 sm:$0xff]  }
0x1ce6   :  { %10199 = vmatpush3.bf16.msra.mxu1 %v12236_v5  ;;  %10202 = vmatprep.mubr.msk.bf16.mxu1 %vm11046_vm0, %v11044_v30 }
0x1ce7   :  { %10200 = vmatprep.subr.bf16.mxu1 %v11044_v30 }
0x1cea   :  { %10201 = vmatpush3.bf16.msra.mxu1 %v12242_v39 }
0x1d0e   :  { %v5857_v50 = vpop.f32.mrb[94].mxu1 }
0x1d0f   :  { %v6008_v60 = vpack.c.bf16 %v5857_v50, %v5857_v50  ;;  %v10163_v63 = vpop.f32.mrb[95].mxu1  ;;  %v10648_v50 = vld [vmem:[%s12872_s4 + $0x49c] ss:$48 sps:$4 sm:$0xff]  }
0x1d10   :  { %v10646_v63 = vld [vmem:[%s12872_s4 + $0x498] ss:$48 sps:$4 sm:$0xff]  }
0x1d11   :  { %10179 = vmatmul.mubr.msk.bf16.vlgmr.msra.gmra.mrb[84].mxu0 %vm957_vm1, %v6008_v60  ;;  %v10643_v60 = vld [vmem:[%s12872_s4 + $0x490] ss:$48 sps:$4 sm:$0xff]  }
0x1d12   :  { %v5930_v1 = vpop.f32.mrb[80].mxu0  ;;  %10191 = vmatpush3.bf16.msra.mxu0 %v12250_v7  ;;  %10194 = vmatprep.mubr.msk.bf16.mxu0 %vm11046_vm0, %v11044_v30 }
0x1d13   :  { %v6003_v6 = vpop.f32.mrb[96].mxu1  ;;  %v10168_v5 = vpop.f32.mrb[81].mxu0  ;;  %10192 = vmatprep.subr.bf16.mxu0 %v11044_v30  ;;  %v6095_v39 = vpack.c.bf16 %v5930_v1, %v5930_v1  ;;  %v10651_v1 = vld [vmem:[%s12872_s4 + $0x4f4] ss:$48 sps:$4 sm:$0xff]  }
0x1d14   :  { %v6140_v8 = vpack.c.bf16 %v6003_v6, %v6003_v6  ;;  %v10173_v9 = vpop.f32.mrb[97].mxu1  ;;  %v10654_v6 = vld [vmem:[%s12872_s4 + $0x4fc] ss:$48 sps:$4 sm:$0xff]   ;;  %v10649_v5 = vld [vmem:[%s12872_s4 + $0x4f0] ss:$48 sps:$4 sm:$0xff]  }
0x1d15   :  { %v10657_v9 = vld [vmem:[%s12872_s4 + $0x554] ss:$48 sps:$4 sm:$0xff]  }
0x1d16   :  { %10203 = vmatmul.mubr.msk.bf16.vlgmr.msra.gmra.mrb[104].mxu1 %vm957_vm1, %v6140_v8  ;;  %10193 = vmatpush3.bf16.msra.mxu0 %v12257_v13  ;;  %v10652_v8 = vld [vmem:[%s12872_s4 + $0x4f8] ss:$48 sps:$4 sm:$0xff]  }
0x1d17   :  { %6580 = vmatprep.mubr.bf16.mxu1 %v11045_v61 }
0x1d19   :  { %10195 = vmatmul.mubr.msk.bf16.vlgmr.msra.gmra.mrb[88].mxu0 %vm957_vm1, %v6095_v39  ;;  %v10660_v39 = vld [vmem:[%s12872_s4 + $0x55c] ss:$48 sps:$4 sm:$0xff]  }
0x1d1a   :  { %6537 = vmatprep.mubr.bf16.mxu0 %v11045_v61 }
0x1db8   :  { %v6089_v7 = vpop.f32.mrb[100].mxu1 }
0x1db9   :  { %v10188_v12 = vpop.f32.mrb[101].mxu1 }
0x1dba   :  { %v6092_v14 = vpop.f32.mrb[102].mxu1  ;;  %v10658_v12 = vld [vmem:[%s12872_s4 + $0x558] ss:$48 sps:$4 sm:$0xff]  }
0x1dbb   :  { %v10189_v15 = vpop.f32.mrb[103].mxu1  ;;  %v10663_v14 = vld [vmem:[%s12872_s4 + $0x5b4] ss:$48 sps:$4 sm:$0xff]  }
0x1dbc   :  { %v10666_v15 = vld [vmem:[%s12872_s4 + $0x5bc] ss:$48 sps:$4 sm:$0xff]  }
0x1de4   :  { %v6046_v27 = vpop.f32.mrb[84].mxu0 }
0x1de5   :  { %v6090_v23 = vadd.f32 %v6089_v7, %v6046_v27  ;;  %v10180_v24 = vpop.f32.mrb[85].mxu0  ;;  %v10655_v7 = vld [vmem:[%s12872_s4 + $0x550] ss:$48 sps:$4 sm:$0xff]  }
0x1de6   :  { %v6049_v4 = vpop.f32.mrb[86].mxu0  ;;  %v10661_v27 = vld [vmem:[%s12872_s4 + $0x5b0] ss:$48 sps:$4 sm:$0xff]  }
0x1de7   :  { %v10181_v26 = vpop.f32.mrb[87].mxu0 }
0x1de9   :  { %v6178_v51 = vpop.f32.mrb[104].mxu1 }
0x1dea   :  { %v10204_v29 = vpop.f32.mrb[105].mxu1 }
0x1deb   :  { %v6181_v13 = vpop.f32.mrb[106].mxu1 }
0x1dec   :  { %v10205_v32 = vpop.f32.mrb[107].mxu1  ;;  %v6133_v49 = vpop.f32.mrb[88].mxu0 }
0x1ded   :  { %v6139_v25 = vadd.f32 %v6133_v49, %v6090_v23  ;;  %v10196_v38 = vpop.f32.mrb[89].mxu0  ;;  %v10664_v23 = vld [vmem:[%s12872_s4 + $0x5b8] ss:$48 sps:$4 sm:$0xff]   ;;  %v9047_v49 = vld [vmem:[%s12874_s6 + $0xd] ss:$0 sm:$0xff] }
0x1dee   :  { %v6136_v40 = vpop.f32.mrb[90].mxu0 }
0x1def   :  { %v6184_v41 = vadd.f32 %v6178_v51, %v6139_v25  ;;  %v10197_v43 = vpop.f32.mrb[91].mxu0 }
0x1df1   :  { %v6186_v18 = vadd.f32 %v6184_v41, %v12018_v44  ;;  %v10621_v44 = vld [vmem:[%s12872_s4 + $0x314] ss:$48 sps:$4 sm:$0xff]  }
0x1df2   :  { %6505 = vmatprep.subr.bf16.mxu0 %v10621_v44  ;;  %v10669_v44 = vld [vmem:[%s12873_s5 + $0x100] sm:$0xff]  }
0x1df3   :  { %v12366_v46 = vadd.f32 %v12317_v47, %v6186_v18  ;;  %v10624_v47 = vld [vmem:[%s12872_s4 + $0x31c] ss:$48 sps:$4 sm:$0xff]   ;;  %6506 = vmatpush1.bf16.msra.mxu0 %v10619_v36  ;;  %v10668_v36 = vld [vmem:[%s12873_s5 + $0x1c0] sm:$0xff]  }
0x1df4   :  { %6548 = vmatprep.subr.bf16.mxu1 %v10624_v47  ;;  %6507 = vmatprep.subr.bf16.mxu0 %v10627_v3  ;;  %v10671_v47 = vld [vmem:[%s12873_s5 + $0x148] sm:$0xff]  }
0x1df5   :  { %6195 = vadd.xlane.f32.xlu0 %v12366_v46  ;;  %6549 = vmatpush1.bf16.msra.mxu1 %v10622_v37  ;;  %v10670_v37 = vld [vmem:[%s12873_s5 + $0x180] sm:$0xff]   ;;  %v10672_v3 = vld [vmem:[%s12873_s5 + $0x1c8] sm:$0xff]  }
0x1df6   :  { %6550 = vmatprep.subr.bf16.mxu1 %v10630_v10  ;;  %v10673_v10 = vld [vmem:[%s12873_s5 + $0x108] sm:$0xff]  }
0x1df7   :  { %6508 = vmatpush1.bf16.msra.mxu0 %v10625_v35  ;;  %v10674_v35 = vld [vmem:[%s12873_s5 + $0x188] sm:$0xff]  }
0x1df8   :  { %6509 = vmatprep.subr.bf16.mxu0 %v10633_v52  ;;  %v10676_v52 = vld [vmem:[%s12873_s5 + $0x1d0] sm:$0xff]  }
0x1df9   :  { %6203 = vadd.xlane.f32.xlu0 %v6201_v33  ;;  %6551 = vmatpush1.bf16.msra.mxu1 %v10628_v42  ;;  %v10675_v42 = vld [vmem:[%s12873_s5 + $0x150] sm:$0xff]  }
0x1dfa   :  { %6552 = vmatprep.subr.bf16.mxu1 %v10636_v0  ;;  %v10677_v0 = vld [vmem:[%s12873_s5 + $0x110] sm:$0xff]  }
0x1dfb   :  { %6510 = vmatpush1.bf16.msra.mxu0 %v10631_v11  ;;  %v10678_v11 = vld [vmem:[%s12873_s5 + $0x190] sm:$0xff]  }
0x1dfc   :  { %6511 = vmatprep.subr.bf16.mxu0 %v10639_v55  ;;  %v10684_v55 = vld [vmem:[%s12873_s5 + $0x1e0] sm:$0xff]  }
0x1dfd   :  { %6553 = vmatpush1.bf16.msra.mxu1 %v10634_v20  ;;  %v10679_v20 = vld [vmem:[%s12873_s5 + $0x158] sm:$0xff]  }
0x1dfe   :  { %6554 = vmatprep.subr.bf16.mxu1 %v10642_v59  ;;  %v10685_v59 = vld [vmem:[%s12873_s5 + $0x120] sm:$0xff]  }
0x1dff   :  { %6512 = vmatpush1.bf16.msra.mxu0 %v10637_v34  ;;  %v10686_v34 = vld [vmem:[%s12873_s5 + $0x1a0] sm:$0xff]  }
0x1e00   :  { %6513 = vmatprep.subr.bf16.mxu0 %v10645_v62  ;;  %v10688_v62 = vld [vmem:[%s12873_s5 + $0x1e8] sm:$0xff]  }
0x1e01   :  { %6555 = vmatpush1.bf16.msra.mxu1 %v10640_v57  ;;  %v10687_v57 = vld [vmem:[%s12873_s5 + $0x168] sm:$0xff]  }
0x1e02   :  { %6556 = vmatprep.subr.bf16.mxu1 %v10648_v50  ;;  %v10689_v50 = vld [vmem:[%s12873_s5 + $0x128] sm:$0xff]  }
0x1e03   :  { %6514 = vmatpush1.bf16.msra.mxu0 %v10643_v60  ;;  %v10690_v60 = vld [vmem:[%s12873_s5 + $0x1a8] sm:$0xff]  }
0x1e04   :  { %6515 = vmatprep.subr.bf16.mxu0 %v10651_v1  ;;  %v10692_v1 = vld [vmem:[%s12873_s5 + $0x1f0] sm:$0xff]  }
0x1e05   :  { %6557 = vmatpush1.bf16.msra.mxu1 %v10646_v63  ;;  %v10691_v63 = vld [vmem:[%s12873_s5 + $0x170] sm:$0xff]  }
0x1e06   :  { %6558 = vmatprep.subr.bf16.mxu1 %v10654_v6  ;;  %v10693_v6 = vld [vmem:[%s12873_s5 + $0x130] sm:$0xff]  }
0x1e07   :  { %6516 = vmatpush1.bf16.msra.mxu0 %v10649_v5  ;;  %v10694_v5 = vld [vmem:[%s12873_s5 + $0x1b0] sm:$0xff]  }
0x1e08   :  { %6517 = vmatprep.subr.bf16.mxu0 %v10657_v9  ;;  %v10696_v9 = vld [vmem:[%s12873_s5 + $0x1f8] sm:$0xff]  }
0x1e09   :  { %6559 = vmatpush1.bf16.msra.mxu1 %v10652_v8  ;;  %v10695_v8 = vld [vmem:[%s12873_s5 + $0x178] sm:$0xff]  }
0x1e0a   :  { %6560 = vmatprep.subr.bf16.mxu1 %v10660_v39  ;;  %v10697_v39 = vld [vmem:[%s12873_s5 + $0x138] sm:$0xff]  }
0x1e0b   :  { %6518 = vmatpush1.bf16.msra.mxu0 %v10655_v7  ;;  %v10698_v7 = vld [vmem:[%s12873_s5 + $0x1b8] sm:$0xff]  }
0x1e0c   :  { %6519 = vmatprep.subr.bf16.mxu0 %v10663_v14 }
0x1e0d   :  { %6561 = vmatpush1.bf16.msra.mxu1 %v10658_v12  ;;  %v8931_v12 = vld [vmem:[%s12874_s6 + $0x11] ss:$2 sm:$0xf] }
0x1e0e   :  { %6562 = vmatprep.subr.bf16.mxu1 %v10666_v15  ;;  %v6328_v14 = vrot.slane %v8931_v12, %v11303_v17  ;;  %v6336_v15 = vrot.slane %v8931_v12, %v11313_v21 }
0x1e0f   :  { %6520 = vmatpush1.bf16.msra.mxu0 %v10661_v27  ;;  %v6332_v27 = vrot.slane %v8931_v12, %v11309_v19 }
0x1e11   :  { %6563 = vmatpush1.bf16.msra.mxu1 %v10664_v23  ;;  %v6340_v23 = vrot.slane %v8931_v12, %v11775_v58 }
0x1e12   :  { %9641 = vmatprep.subr.bf16.mxu1 %v10668_v36 }
0x1e82   :  { %v6196_v22 = vpop.xlane.xlu0 %6195 }
0x1e83   :  { %v6198_v53 = vmul.f32 0.0078125, %v6196_v22  ;;  %v10680_v22 = vld [vmem:[%s12873_s5 + $0x1d8] sm:$0xff]  }
0x1e85   :  { %v6200_v54 = vsub.f32 %v12366_v46, %v6198_v53  ;;  %v10681_v53 = vld [vmem:[%s12873_s5 + $0x118] sm:$0xff]  }
0x1e86   :  { %v6204_v24 = vpop.xlane.xlu0 %6203 }
0x1e87   :  { %v6202_v56 = vmul.f32 %v6200_v54, %v6200_v54  ;;  %v6207_v4 = vmul.f32 0.0078125, %v6204_v24 }
0x1e89   :  { %6205 = vadd.xlane.f32.xlu1 %v6202_v56  ;;  %v6209_v26 = vadd.f32 1e-06, %v6207_v4  ;;  %v10683_v56 = vld [vmem:[%s12873_s5 + $0x160] sm:$0xff]  }
0x1e8b   :  { %10935 = vrsqrt.f32 %v6209_v26 }
0x1e95   :  { %v10936_v13 = vpop.eup %10935 }
0x1e96   :  { %v6213_v32 = vmul.f32 %v10936_v13, %v12363_v45  ;;  %v10667_v45 = vld [vmem:[%s12873_s5 + $0x140] sm:$0xff]  }
0x1e97   :  { %9619 = vmatprep.subr.bf16.mxu0 %v10667_v45 }
0x1e98   :  { %v6219_v40 = vmul.f32 %v9047_v49, %v6213_v32 }
0x1e9a   :  { %v6225_v43 = vadd.f32 %v9048_v28, %v6219_v40 }
0x1f16   :  { %v6206_v51 = vpop.xlane.xlu1 %6205 }
0x1f17   :  { %v6208_v29 = vmul.f32 0.0078125, %v6206_v51 }
0x1f19   :  { %v6210_v31 = vadd.f32 1e-06, %v6208_v29 }
0x1f1b   :  { %10937 = vrsqrt.f32 %v6210_v31 }
0x1f25   :  { %v10938_v25 = vpop.eup %10937 }
0x1f26   :  { %v6214_v38 = vmul.f32 %v10938_v25, %v6200_v54  ;;  %v10682_v54 = vld [vmem:[%s12873_s5 + $0x198] sm:$0xff]  }
0x1f28   :  { %v6220_v41 = vmul.f32 %v9047_v49, %v6214_v38 }
0x1f2a   :  { %v6226_v18 = vadd.f32 %v9048_v28, %v6220_v41 }
0x1f2c   :  { %v6323_v33 = vpack.c.bf16 %v6226_v18, %v6225_v43 }
0x1f2e   :  { %6538 = vmatmul.mubr.bf16.vlgmr.msra.gmra.mrb[92].mxu0 %v6323_v33  ;;  %6581 = vmatmul.mubr.bf16.vlgmr.msra.gmra.mrb[108].mxu1 %v6323_v33 }
0x1f2f   :  { %9620 = vmatpush3.bf16.msra.mxu0 %v10669_v44  ;;  %9642 = vmatpush3.bf16.msra.mxu1 %v10670_v37 }
0x1f30   :  { %9621 = vmatprep.subr.bf16.mxu0 %v10671_v47  ;;  %9643 = vmatprep.subr.bf16.mxu1 %v10672_v3 }
0x1f33   :  { %9622 = vmatpush3.bf16.msra.mxu0 %v10673_v10  ;;  %9644 = vmatpush3.bf16.msra.mxu1 %v10674_v35 }
0x1f34   :  { %9623 = vmatprep.subr.bf16.mxu0 %v10675_v42  ;;  %9645 = vmatprep.subr.bf16.mxu1 %v10676_v52 }
0x1f37   :  { %9624 = vmatpush3.bf16.msra.mxu0 %v10677_v0  ;;  %9646 = vmatpush3.bf16.msra.mxu1 %v10678_v11 }
0x1f38   :  { %9625 = vmatprep.subr.bf16.mxu0 %v10679_v20  ;;  %9647 = vmatprep.subr.bf16.mxu1 %v10680_v22 }
0x1f3b   :  { %9626 = vmatpush3.bf16.msra.mxu0 %v10681_v53  ;;  %9648 = vmatpush3.bf16.msra.mxu1 %v10682_v54 }
0x1f3c   :  { %9627 = vmatprep.subr.bf16.mxu0 %v10683_v56  ;;  %9649 = vmatprep.subr.bf16.mxu1 %v10684_v55 }
0x1f3f   :  { %9628 = vmatpush3.bf16.msra.mxu0 %v10685_v59  ;;  %9650 = vmatpush3.bf16.msra.mxu1 %v10686_v34 }
0x1f40   :  { %9629 = vmatprep.subr.bf16.mxu0 %v10687_v57  ;;  %9651 = vmatprep.subr.bf16.mxu1 %v10688_v62 }
0x1f43   :  { %9630 = vmatpush3.bf16.msra.mxu0 %v10689_v50  ;;  %9652 = vmatpush3.bf16.msra.mxu1 %v10690_v60 }
0x1f44   :  { %9631 = vmatprep.subr.bf16.mxu0 %v10691_v63  ;;  %9653 = vmatprep.subr.bf16.mxu1 %v10692_v1 }
0x1f47   :  { %9632 = vmatpush3.bf16.msra.mxu0 %v10693_v6  ;;  %9654 = vmatpush3.bf16.msra.mxu1 %v10694_v5 }
0x1f48   :  { %9633 = vmatprep.subr.bf16.mxu0 %v10695_v8  ;;  %9655 = vmatprep.subr.bf16.mxu1 %v10696_v9 }
0x1f4b   :  { %9634 = vmatpush3.bf16.msra.mxu0 %v10697_v39  ;;  %9656 = vmatpush3.bf16.msra.mxu1 %v10698_v7 }
0x1f4c   :  { %10226 = vmatprep.subr.bf16.mxu1 %v11044_v30  ;;  %10206 = vmatprep.subr.bf16.mxu0 %v11044_v30 }
0x2001   :  { %v6539_v24 = vpop.f32.mrb[92].mxu0  ;;  %v6582_v4 = vpop.f32.mrb[108].mxu1 }
0x2002   :  { %v12580_v26 = vadd.f32 %v6539_v24, %v6328_v14  ;;  %v12582_v51 = vadd.f32 %v6582_v4, %v6336_v15  ;;  %v6541_v29 = vpop.f32.mrb[93].mxu0  ;;  %v6584_v31 = vpop.f32.mrb[109].mxu1 }
0x2003   :  { %v12584_v13 = vadd.f32 %v6541_v29, %v6332_v27  ;;  %v12586_v32 = vadd.f32 %v6584_v31, %v6340_v23  ;;  %v6543_v49 = vpop.f32.mrb[94].mxu0  ;;  %v6586_v25 = vpop.f32.mrb[110].mxu1 }
0x2004   :  { %v6591_v38 = vmul.f32 %v12580_v26, %v12580_v26  ;;  %v6593_v40 = vmul.f32 %v12582_v51, %v12582_v51  ;;  %v12592_v28 = vadd.f32 %v6543_v49, %v6328_v14  ;;  %v12594_v41 = vadd.f32 %v6586_v25, %v6336_v15  ;;  %v6545_v43 = vpop.f32.mrb[95].mxu0  ;;  %v6588_v18 = vpop.f32.mrb[111].mxu1 }
0x2005   :  { %v6592_v33 = vmul.f32 %v12584_v13, %v12584_v13  ;;  %v6594_v45 = vmul.f32 %v12586_v32, %v12586_v32  ;;  %v12600_v36 = vadd.f32 %v6545_v43, %v6332_v27  ;;  %v12602_v44 = vadd.f32 %v6588_v18, %v6340_v23 }
0x2006   :  { %v6599_v37 = vmul.f32 %v6591_v38, %v12580_v26  ;;  %v6601_v47 = vmul.f32 %v6593_v40, %v12582_v51  ;;  %v6595_v3 = vmul.f32 %v12592_v28, %v12592_v28  ;;  %v6597_v10 = vmul.f32 %v12594_v41, %v12594_v41 }
0x2007   :  { %v6600_v35 = vmul.f32 %v6592_v33, %v12584_v13  ;;  %v6602_v42 = vmul.f32 %v6594_v45, %v12586_v32  ;;  %v6596_v52 = vmul.f32 %v12600_v36, %v12600_v36  ;;  %v6598_v0 = vmul.f32 %v12602_v44, %v12602_v44 }
0x2008   :  { %v6607_v11 = vmul.f32 0.044715, %v6599_v37  ;;  %v6609_v20 = vmul.f32 0.044715, %v6601_v47  ;;  %v6603_v22 = vmul.f32 %v6595_v3, %v12592_v28  ;;  %v6605_v53 = vmul.f32 %v6597_v10, %v12594_v41 }
0x2009   :  { %v6608_v54 = vmul.f32 0.044715, %v6600_v35  ;;  %v6610_v56 = vmul.f32 0.044715, %v6602_v42  ;;  %v6604_v55 = vmul.f32 %v6596_v52, %v12600_v36  ;;  %v6606_v59 = vmul.f32 %v6598_v0, %v12602_v44 }
0x200a   :  { %v6615_v34 = vadd.f32 %v6607_v11, %v12580_v26  ;;  %v6617_v57 = vadd.f32 %v6609_v20, %v12582_v51  ;;  %v6611_v62 = vmul.f32 0.044715, %v6603_v22  ;;  %v6613_v50 = vmul.f32 0.044715, %v6605_v53 }
0x200b   :  { %v6616_v60 = vadd.f32 %v6608_v54, %v12584_v13  ;;  %v6618_v63 = vadd.f32 %v6610_v56, %v12586_v32  ;;  %v6612_v1 = vmul.f32 0.044715, %v6604_v55  ;;  %v6614_v6 = vmul.f32 0.044715, %v6606_v59 }
0x200c   :  { %v6623_v5 = vmul.f32 0.7978846, %v6615_v34  ;;  %v6625_v8 = vmul.f32 0.7978846, %v6617_v57  ;;  %v6619_v9 = vadd.f32 %v6611_v62, %v12592_v28  ;;  %v6621_v39 = vadd.f32 %v6613_v50, %v12594_v41 }
0x200d   :  { %v6624_v7 = vmul.f32 0.7978846, %v6616_v60  ;;  %v6626_v12 = vmul.f32 0.7978846, %v6618_v63  ;;  %v6620_v14 = vadd.f32 %v6612_v1, %v12600_v36  ;;  %v6622_v15 = vadd.f32 %v6614_v6, %v12602_v44 }
0x200e   :  { %10939 = vtanh.f32 %v6623_v5  ;;  %v6627_v27 = vmul.f32 0.7978846, %v6619_v9  ;;  %v6629_v23 = vmul.f32 0.7978846, %v6621_v39  ;;  %v10710_v9 = vld [vmem:[%s12872_s4 + $0x4a0] ss:$48 sps:$4 sm:$0xff]  }
0x200f   :  { %10941 = vtanh.f32 %v6625_v8  ;;  %v6628_v24 = vmul.f32 0.7978846, %v6620_v14  ;;  %v6630_v4 = vmul.f32 0.7978846, %v6622_v15  ;;  %v10703_v8 = vld [vmem:[%s12872_s4 + $0x444] ss:$48 sps:$4 sm:$0xff]  }
0x2010   :  { %10943 = vtanh.f32 %v6624_v7  ;;  %v10705_v39 = vld [vmem:[%s12872_s4 + $0x4a4] ss:$48 sps:$4 sm:$0xff]   ;;  %v10712_v14 = vld [vmem:[%s12872_s4 + $0x500] ss:$48 sps:$4 sm:$0xff]  }
0x2011   :  { %10945 = vtanh.f32 %v6626_v12  ;;  %v10707_v7 = vld [vmem:[%s12872_s4 + $0x504] ss:$48 sps:$4 sm:$0xff]  }
0x2012   :  { %10947 = vtanh.f32 %v6627_v27  ;;  %v10709_v12 = vld [vmem:[%s12872_s4 + $0x564] ss:$48 sps:$4 sm:$0xff]   ;;  %v10713_v27 = vld [vmem:[%s12872_s4 + $0x560] ss:$48 sps:$4 sm:$0xff]  }
0x2013   :  { %10949 = vtanh.f32 %v6629_v23  ;;  %v10711_v15 = vld [vmem:[%s12872_s4 + $0x5c4] ss:$48 sps:$4 sm:$0xff]   ;;  %v10714_v23 = vld [vmem:[%s12872_s4 + $0x5c0] ss:$48 sps:$4 sm:$0xff]  }
0x2014   :  { %10951 = vtanh.f32 %v6628_v24 }
0x2015   :  { %10953 = vtanh.f32 %v6630_v4 }
0x2018   :  { %v10940_v29 = vpop.eup %10939 }
0x2019   :  { %v10942_v31 = vpop.eup %10941  ;;  %v6639_v49 = vadd.f32 1.0, %v10940_v29 }
0x201a   :  { %v10944_v25 = vpop.eup %10943  ;;  %v6641_v38 = vadd.f32 1.0, %v10942_v31 }
0x201b   :  { %v10946_v40 = vpop.eup %10945  ;;  %v6640_v43 = vadd.f32 1.0, %v10944_v25  ;;  %v6647_v37 = vmul.f32 0.5, %v6639_v49 }
0x201c   :  { %v10948_v18 = vpop.eup %10947  ;;  %v6642_v33 = vadd.f32 1.0, %v10946_v40  ;;  %v6649_v10 = vmul.f32 0.5, %v6641_v38 }
0x201d   :  { %v10950_v45 = vpop.eup %10949  ;;  %v6643_v47 = vadd.f32 1.0, %v10948_v18  ;;  %v6648_v11 = vmul.f32 0.5, %v6640_v43  ;;  %v6655_v54 = vmul.f32 %v6647_v37, %v12580_v26  ;;  %v10702_v26 = vld [vmem:[%s12872_s4 + $0x320] ss:$48 sps:$4 sm:$0xff]  }
0x201e   :  { %v10952_v3 = vpop.eup %10951  ;;  %v6645_v35 = vadd.f32 1.0, %v10950_v45  ;;  %v6650_v53 = vmul.f32 0.5, %v6642_v33  ;;  %v6657_v59 = vmul.f32 %v6649_v10, %v12582_v51  ;;  %v10699_v51 = vld [vmem:[%s12872_s4 + $0x324] ss:$48 sps:$4 sm:$0xff]   ;;  %v9145_v10 = vld [vmem:[%s12874_s6 + $0x19] ss:$0 sm:$0xff] }
0x201f   :  { %v10954_v42 = vpop.eup %10953  ;;  %v6651_v52 = vmul.f32 0.5, %v6643_v47  ;;  %v6644_v0 = vadd.f32 1.0, %v10952_v3  ;;  %v6656_v62 = vmul.f32 %v6648_v11, %v12584_v13  ;;  %v10704_v13 = vld [vmem:[%s12872_s4 + $0x380] ss:$48 sps:$4 sm:$0xff]  }
0x2020   :  { %v6653_v20 = vmul.f32 0.5, %v6645_v35  ;;  %v6646_v22 = vadd.f32 1.0, %v10954_v42  ;;  %v6658_v63 = vmul.f32 %v6650_v53, %v12586_v32  ;;  %v10700_v32 = vld [vmem:[%s12872_s4 + $0x384] ss:$48 sps:$4 sm:$0xff]  }
0x2021   :  { %v6659_v56 = vmul.f32 %v6651_v52, %v12592_v28  ;;  %v6652_v55 = vmul.f32 0.5, %v6644_v0 }
0x2022   :  { %v6661_v34 = vmul.f32 %v6653_v20, %v12594_v41  ;;  %v6654_v57 = vmul.f32 0.5, %v6646_v22  ;;  %v10706_v41 = vld [vmem:[%s12872_s4 + $0x3e0] ss:$48 sps:$4 sm:$0xff]  }
0x2023   :  { %v6660_v50 = vmul.f32 %v6652_v55, %v12600_v36  ;;  %v6663_v60 = vpack.c.bf16 %v6659_v56, %v6655_v54  ;;  %v10701_v36 = vld [vmem:[%s12872_s4 + $0x3e4] ss:$48 sps:$4 sm:$0xff]   ;;  %v10715_v55 = vld [vmem:[%s12872_s4 + $0x328] ss:$48 sps:$4 sm:$0xff]  }
0x2024   :  { %v6662_v1 = vmul.f32 %v6654_v57, %v12602_v44  ;;  %v6665_v6 = vpack.c.bf16 %v6661_v34, %v6657_v59  ;;  %v10708_v44 = vld [vmem:[%s12872_s4 + $0x440] ss:$48 sps:$4 sm:$0xff]   ;;  %v10716_v59 = vld [vmem:[%s12872_s4 + $0x388] ss:$48 sps:$4 sm:$0xff]  }
0x2025   :  { %v6664_v5 = vpack.c.bf16 %v6660_v50, %v6656_v62  ;;  %v10717_v34 = vld [vmem:[%s12872_s4 + $0x3e8] ss:$48 sps:$4 sm:$0xff]  }
0x2026   :  { %v6666_v28 = vpack.c.bf16 %v6662_v1, %v6658_v63  ;;  %v10718_v57 = vld [vmem:[%s12872_s4 + $0x448] ss:$48 sps:$4 sm:$0xff]  }
0x2027   :  { %6891 = vmatprep.mubr.bf16.mxu0 %v6664_v5  ;;  %v10719_v62 = vld [vmem:[%s12872_s4 + $0x4a8] ss:$48 sps:$4 sm:$0xff]  }
0x2028   :  { %6932 = vmatprep.mubr.bf16.mxu1 %v6666_v28  ;;  %6892 = vmatmul.mubr.bf16.vlgmr.msra.gmra.mrb[96].mxu0 %v6663_v60  ;;  %v10720_v50 = vld [vmem:[%s12872_s4 + $0x508] ss:$48 sps:$4 sm:$0xff]  }
0x2029   :  { %6933 = vmatmul.mubr.bf16.vlgmr.msra.gmra.mrb[112].mxu1 %v6665_v6  ;;  %10207 = vmatpush3.bf16.msra.mxu0 %v10702_v26  ;;  %v10721_v60 = vld [vmem:[%s12872_s4 + $0x568] ss:$48 sps:$4 sm:$0xff]  }
0x202a   :  { %10227 = vmatpush3.bf16.msra.mxu1 %v10699_v51  ;;  %10208 = vmatprep.subr.bf16.mxu0 %v11044_v30  ;;  %v10722_v63 = vld [vmem:[%s12872_s4 + $0x5c8] ss:$48 sps:$4 sm:$0xff]  }
0x202b   :  { %10228 = vmatprep.subr.bf16.mxu1 %v11044_v30  ;;  %10242 = vmatprep.mubr.msk.bf16.mxu1 %vm11046_vm0, %v11044_v30 }
0x202c   :  { %10222 = vmatprep.mubr.msk.bf16.mxu0 %vm11046_vm0, %v11044_v30 }
0x202d   :  { %10209 = vmatpush3.bf16.msra.mxu0 %v10704_v13 }
0x202e   :  { %10229 = vmatpush3.bf16.msra.mxu1 %v10700_v32  ;;  %10210 = vmatprep.subr.bf16.mxu0 %v11044_v30 }
0x202f   :  { %10230 = vmatprep.subr.bf16.mxu1 %v11044_v30 }
0x2031   :  { %10211 = vmatpush3.bf16.msra.mxu0 %v10706_v41 }
0x2032   :  { %10231 = vmatpush3.bf16.msra.mxu1 %v10701_v36  ;;  %10212 = vmatprep.subr.bf16.mxu0 %v11044_v30 }
0x2033   :  { %10232 = vmatprep.subr.bf16.mxu1 %v11044_v30 }
0x2035   :  { %10213 = vmatpush3.bf16.msra.mxu0 %v10708_v44 }
0x2036   :  { %10233 = vmatpush3.bf16.msra.mxu1 %v10703_v8  ;;  %10214 = vmatprep.subr.bf16.mxu0 %v11044_v30 }
0x2037   :  { %10234 = vmatprep.subr.bf16.mxu1 %v11044_v30 }
0x2039   :  { %10215 = vmatpush3.bf16.msra.mxu0 %v10710_v9 }
0x203a   :  { %10235 = vmatpush3.bf16.msra.mxu1 %v10705_v39  ;;  %10216 = vmatprep.subr.bf16.mxu0 %v11044_v30 }
0x203b   :  { %10236 = vmatprep.subr.bf16.mxu1 %v11044_v30 }
0x203d   :  { %10217 = vmatpush3.bf16.msra.mxu0 %v10712_v14 }
0x203e   :  { %10237 = vmatpush3.bf16.msra.mxu1 %v10707_v7  ;;  %10218 = vmatprep.subr.bf16.mxu0 %v11044_v30 }
0x203f   :  { %10238 = vmatprep.subr.bf16.mxu1 %v11044_v30 }
0x2041   :  { %10219 = vmatpush3.bf16.msra.mxu0 %v10713_v27 }
0x2042   :  { %10239 = vmatpush3.bf16.msra.mxu1 %v10709_v12  ;;  %10220 = vmatprep.subr.bf16.mxu0 %v11044_v30 }
0x2043   :  { %10240 = vmatprep.subr.bf16.mxu1 %v11044_v30 }
0x2045   :  { %10221 = vmatpush3.bf16.msra.mxu0 %v10714_v23 }
0x2046   :  { %10241 = vmatpush3.bf16.msra.mxu1 %v10711_v15  ;;  %10246 = vmatprep.subr.bf16.mxu0 %v11044_v30 }
0x2047   :  { %10266 = vmatprep.subr.mxu1 %v11044_v30 }
0x2049   :  { %10243 = vmatmul.mubr.bf16.vlgmr.msra.gmra.mrb[116].mxu1 %v11905_v2 }
0x204a   :  { %10268 = vmatprep.mubr.msk.f32.mxu1 %vm11046_vm0, %v11044_v30 }
0x20fb   :  { %v9635_v24 = vpop.f32.mrb[96].mxu0 }
0x20fc   :  { %v9657_v4 = vpop.f32.mrb[112].mxu1  ;;  %v9636_v29 = vpop.f32.mrb[97].mxu0 }
0x20fd   :  { %v9637_v31 = vadd.f32 %v9636_v29, %v9635_v24  ;;  %v9658_v49 = vpop.f32.mrb[113].mxu1  ;;  %v9638_v25 = vpop.f32.mrb[98].mxu0 }
0x20fe   :  { %v9659_v38 = vadd.f32 %v9658_v49, %v9657_v4  ;;  %v9660_v40 = vpop.f32.mrb[114].mxu1  ;;  %v9639_v43 = vpop.f32.mrb[99].mxu0 }
0x20ff   :  { %v9640_v18 = vadd.f32 %v9639_v43, %v9638_v25  ;;  %v9661_v33 = vpop.f32.mrb[115].mxu1  ;;  %v10724_v43 = vld [vmem:[%s12872_s4 + $0x38c] ss:$48 sps:$4 sm:$0xff]  }
0x2100   :  { %v6935_v45 = vadd.f32 %v9659_v38, %v9637_v31  ;;  %v9662_v37 = vadd.f32 %v9661_v33, %v9660_v40  ;;  %v10723_v38 = vld [vmem:[%s12872_s4 + $0x32c] ss:$48 sps:$4 sm:$0xff]  }
0x2101   :  { %v10726_v33 = vld [vmem:[%s12872_s4 + $0x44c] ss:$48 sps:$4 sm:$0xff]  }
0x2102   :  { %v6941_v47 = vadd.f32 %v6935_v45, %v12320_v48  ;;  %v6938_v3 = vadd.f32 %v9662_v37, %v9640_v18  ;;  %v10725_v18 = vld [vmem:[%s12872_s4 + $0x3ec] ss:$48 sps:$4 sm:$0xff]  }
0x2103   :  { %v10727_v45 = vld [vmem:[%s12872_s4 + $0x4ac] ss:$48 sps:$4 sm:$0xff]  }
0x2104   :  { %v6942_v35 = vadd.f32 %v6938_v3, %v12366_v46  ;;  %v12712_v42 = vadd.f32 %v9145_v10, %v6941_v47  ;;  %v10728_v37 = vld [vmem:[%s12872_s4 + $0x50c] ss:$48 sps:$4 sm:$0xff]  }
0x2105   :  { %v10729_v47 = vld [vmem:[%s12872_s4 + $0x56c] ss:$48 sps:$4 sm:$0xff]  }
0x2106   :  { %v12714_v52 = vadd.f32 %v9145_v10, %v6942_v35  ;;  %v10730_v3 = vld [vmem:[%s12872_s4 + $0x5cc] ss:$48 sps:$4 sm:$0xff]  }
0x2108   :  { %v7013_v0 = vpack.c.bf16 %v12714_v52, %v12712_v42 }
0x210a   :  { %10223 = vmatmul.mubr.bf16.vlgmr.msra.gmra.mrb[100].mxu0 %v7013_v0 }
0x210b   :  { %10262 = vmatprep.mubr.msk.bf16.mxu0 %vm11046_vm0, %v11044_v30  ;;  %10247 = vmatpush3.bf16.msra.mxu0 %v10715_v55  ;;  %v10734_v55 = vld [vmem:[#allocation4 + $0x8] ss:$24 sps:$4 sm:$0xff]  }
0x210c   :  { %10248 = vmatprep.subr.bf16.mxu0 %v11044_v30 }
0x210f   :  { %10249 = vmatpush3.bf16.msra.mxu0 %v10716_v59  ;;  %v10736_v59 = vld [vmem:[#allocation4 + $0xc] ss:$24 sps:$4 sm:$0xff]  }
0x2110   :  { %10250 = vmatprep.subr.bf16.mxu0 %v11044_v30 }
0x2113   :  { %10251 = vmatpush3.bf16.msra.mxu0 %v10717_v34  ;;  %v10739_v34 = vld [vmem:[#allocation4 + $0x34] ss:$24 sps:$4 sm:$0xff]  }
0x2114   :  { %10252 = vmatprep.subr.bf16.mxu0 %v11044_v30 }
0x2117   :  { %10253 = vmatpush3.bf16.msra.mxu0 %v10718_v57  ;;  %v10742_v57 = vld [vmem:[#allocation4 + $0x3c] ss:$24 sps:$4 sm:$0xff]  }
0x2118   :  { %10254 = vmatprep.subr.bf16.mxu0 %v11044_v30 }
0x211b   :  { %10255 = vmatpush3.bf16.msra.mxu0 %v10719_v62 }
0x211c   :  { %v7185_v11 = vpop.f32.mrb[116].mxu1  ;;  %10256 = vmatprep.subr.bf16.mxu0 %v11044_v30 }
0x211d   :  { %v10244_v48 = vpop.f32.mrb[117].mxu1  ;;  %10267 = vmatpush3.xpose.msra.mxu1 %v7185_v11 }
0x211e   :  { %v7188_v20 = vpop.f32.mrb[118].mxu1  ;;  %10271 = vmatprep.subr.mxu1 %v11044_v30 }
0x211f   :  { %v10245_v22 = vpop.f32.mrb[119].mxu1  ;;  %10257 = vmatpush3.bf16.msra.mxu0 %v10720_v50 }
0x2120   :  { %10258 = vmatprep.subr.bf16.mxu0 %v11044_v30 }
0x2123   :  { %10259 = vmatpush3.bf16.msra.mxu0 %v10721_v60 }
0x2124   :  { %10260 = vmatprep.subr.bf16.mxu0 %v11044_v30 }
0x2127   :  { %10261 = vmatpush3.bf16.msra.mxu0 %v10722_v63 }
0x212a   :  { %10263 = vmatmul.mubr.bf16.vlgmr.msra.gmra.mrb[104].mxu0 %v11905_v2 }
0x212b   :  { %8054 = vmatprep.mubr.bf16.mxu0 %v11045_v61 }
0x21dd   :  { %v7096_v53 = vpop.f32.mrb[100].mxu0 }
0x21de   :  { %v10224_v46 = vpop.f32.mrb[101].mxu0  ;;  %10269 = vmatmul.mubr.f32.vlgmr.msra.gmra.mrb[98].mxu1 %v7096_v53 }
0x21df   :  { %v7099_v54 = vpop.f32.mrb[102].mxu0  ;;  %10273 = vmatprep.mubr.msk.f32.mxu1 %vm11046_vm0, %v11044_v30 }
0x21e0   :  { %v10225_v56 = vpop.f32.mrb[103].mxu0 }
0x21e1   :  { %v10733_v56 = vld [vmem:[#allocation4 + $0x4] ss:$24 sps:$4 sm:$0xff]  }
0x21e2   :  { %8022 = vmatprep.subr.bf16.mxu0 %v10733_v56  ;;  %v10781_v56 = vld [vmem:[#allocation4 + $0x40] ss:$24 sps:$4 sm:$0xff]  }
0x21fd   :  { %v7274_v41 = vpop.f32.mrb[104].mxu0 }
0x21fe   :  { %v10264_v36 = vpop.f32.mrb[105].mxu0  ;;  %10272 = vmatpush3.msra.mxu1 %v7274_v41  ;;  %v10754_v41 = vld [vmem:[#allocation4 + $0x9c] ss:$24 sps:$4 sm:$0xff]  }
0x21ff   :  { %v7277_v44 = vpop.f32.mrb[106].mxu0  ;;  %10276 = vmatprep.subr.mxu1 %v11044_v30  ;;  %v10749_v36 = vld [vmem:[#allocation4 + $0x90] ss:$24 sps:$4 sm:$0xff]  }
0x2200   :  { %v10265_v2 = vpop.f32.mrb[107].mxu0 }
0x2201   :  { %v10757_v2 = vld [vmem:[#allocation4 + $0xc4] ss:$24 sps:$4 sm:$0xff]  }
0x22b1   :  { %v7347_v1 = vpop.f32.mrb[98].mxu1 }
0x22b2   :  { %v10270_v6 = vpop.f32.mrb[99].mxu1  ;;  %v7351_v5 = vsel %vm1254_vm3, %v7347_v1, -inf }
0x22b3   :  { %7352 = vmax.xlane.f32.xlu0 %v7351_v5 }
0x2340   :  { %v7353_v26 = vpop.xlane.xlu0 %7352 }
0x2341   :  { %v7354_v28 = vsub.f32 %v7347_v1, %v7353_v26  ;;  %v10745_v26 = vld [vmem:[#allocation4 + $0x64] ss:$24 sps:$4 sm:$0xff]  }
0x2343   :  { %v7355_v51 = vmul.f32 1.442695, %v7354_v28  ;;  %v10748_v28 = vld [vmem:[#allocation4 + $0x6c] ss:$24 sps:$4 sm:$0xff]  }
0x2345   :  { %10955 = vpow2.f32 %v7355_v51  ;;  %v10743_v51 = vld [vmem:[#allocation4 + $0x60] ss:$24 sps:$4 sm:$0xff]  }
0x234f   :  { %v10956_v13 = vpop.eup %10955 }
0x2350   :  { %v7357_v32 = vsel %vm1254_vm3, %v10956_v13, 0.0 }
0x2351   :  { %7358 = vadd.xlane.f32.xlu1 %v7357_v32  ;;  %v10751_v32 = vld [vmem:[#allocation4 + $0x94] ss:$24 sps:$4 sm:$0xff]  }
0x23de   :  { %v7359_v8 = vpop.xlane.xlu1 %7358 }
0x23df   :  { %10957 = vrcp.f32 %v7359_v8  ;;  %v10760_v8 = vld [vmem:[#allocation4 + $0xcc] ss:$24 sps:$4 sm:$0xff]  }
0x23e9   :  { %v10958_v9 = vpop.eup %10957 }
0x23ea   :  { %v7361_v39 = vmul.f32 %v10958_v9, %v10956_v13  ;;  %v10746_v13 = vld [vmem:[#allocation4 + $0x68] ss:$24 sps:$4 sm:$0xff]  }
0x23eb   :  { %v10755_v9 = vld [vmem:[#allocation4 + $0xc0] ss:$24 sps:$4 sm:$0xff]  }
0x23ec   :  { %10274 = vmatmul.mubr.msk.f32.vlgmr.msra.gmra.mrb[120].mxu1 %vm1254_vm3, %v7361_v39  ;;  %v10758_v39 = vld [vmem:[#allocation4 + $0xc8] ss:$24 sps:$4 sm:$0xff]  }
0x23ed   :  { %10277 = vmatpush3.xpose.msra.mxu1 %v7188_v20  ;;  %10278 = vmatprep.mubr.msk.f32.mxu1 %vm11046_vm0, %v11044_v30 }
0x23ee   :  { %10281 = vmatprep.subr.mxu1 %v11044_v30 }
0x23f0   :  { %10279 = vmatmul.mubr.f32.vlgmr.msra.gmra.mrb[122].mxu1 %v7099_v54  ;;  %v10731_v54 = vld [vmem:[#allocation4] ss:$24 sps:$4 sm:$0xff]  }
0x23f1   :  { %10282 = vmatpush3.msra.mxu1 %v7277_v44  ;;  %10283 = vmatprep.mubr.msk.f32.mxu1 %vm11046_vm0, %v11044_v30  ;;  %v10752_v44 = vld [vmem:[#allocation4 + $0x98] ss:$24 sps:$4 sm:$0xff]  }
0x23f2   :  { %10286 = vmatprep.subr.bf16.mxu1 %v11044_v30  ;;  %8023 = vmatpush1.bf16.msra.mxu0 %v10731_v54 }
0x23f3   :  { %8024 = vmatprep.subr.bf16.mxu0 %v10739_v34  ;;  %v10784_v34 = vld [vmem:[#allocation4 + $0x74] ss:$24 sps:$4 sm:$0xff]  }
0x24bf   :  { %v7431_v7 = vpop.f32.mrb[120].mxu1 }
0x24c0   :  { %v10275_v12 = vpop.f32.mrb[121].mxu1 }
0x24c1   :  { %v10766_v12 = vld [vmem:[#allocation4 + $0xfc] ss:$24 sps:$4 sm:$0xff]  }
0x24c3   :  { %v7501_v14 = vpop.f32.mrb[122].mxu1 }
0x24c4   :  { %v10280_v15 = vpop.f32.mrb[123].mxu1  ;;  %v7505_v27 = vsel %vm1254_vm3, %v7501_v14, -inf }
0x24c5   :  { %7506 = vmax.xlane.f32.xlu0 %v7505_v27  ;;  %v10764_v15 = vld [vmem:[#allocation4 + $0xf8] ss:$24 sps:$4 sm:$0xff]   ;;  %v10769_v27 = vld [vmem:[#allocation4 + $0x124] ss:$24 sps:$4 sm:$0xff]  }
0x2552   :  { %v7507_v23 = vpop.xlane.xlu0 %7506 }
0x2553   :  { %v7508_v24 = vsub.f32 %v7501_v14, %v7507_v23  ;;  %v10761_v14 = vld [vmem:[#allocation4 + $0xf0] ss:$24 sps:$4 sm:$0xff]   ;;  %v10772_v23 = vld [vmem:[#allocation4 + $0x12c] ss:$24 sps:$4 sm:$0xff]  }
0x2555   :  { %v7509_v4 = vmul.f32 1.442695, %v7508_v24  ;;  %v10767_v24 = vld [vmem:[#allocation4 + $0x120] ss:$24 sps:$4 sm:$0xff]  }
0x2557   :  { %10959 = vpow2.f32 %v7509_v4  ;;  %v10770_v4 = vld [vmem:[#allocation4 + $0x128] ss:$24 sps:$4 sm:$0xff]  }
0x2561   :  { %v10960_v29 = vpop.eup %10959 }
0x2562   :  { %v7511_v31 = vsel %vm1254_vm3, %v10960_v29, 0.0 }
0x2563   :  { %7512 = vadd.xlane.f32.xlu1 %v7511_v31  ;;  %v10773_v31 = vld [vmem:[#allocation4 + $0x150] ss:$24 sps:$4 sm:$0xff]  }
0x25f0   :  { %v7513_v49 = vpop.xlane.xlu1 %7512 }
0x25f1   :  { %10961 = vrcp.f32 %v7513_v49  ;;  %v10776_v49 = vld [vmem:[#allocation4 + $0x158] ss:$24 sps:$4 sm:$0xff]  }
0x25fb   :  { %v10962_v25 = vpop.eup %10961 }
0x25fc   :  { %v7515_v40 = vmul.f32 %v10962_v25, %v10960_v29  ;;  %v10775_v29 = vld [vmem:[#allocation4 + $0x154] ss:$24 sps:$4 sm:$0xff]  }
0x25fd   :  { %v10778_v25 = vld [vmem:[#allocation4 + $0x15c] ss:$24 sps:$4 sm:$0xff]  }
0x25fe   :  { %10284 = vmatmul.mubr.msk.f32.vlgmr.msra.gmra.mrb[124].mxu1 %vm1254_vm3, %v7515_v40 }
0x25ff   :  { %10287 = vmatpush3.bf16.msra.mxu1 %v10723_v38  ;;  %10302 = vmatprep.mubr.msk.bf16.mxu1 %vm11046_vm0, %v11044_v30 }
0x2600   :  { %10288 = vmatprep.subr.bf16.mxu1 %v11044_v30 }
0x2603   :  { %10289 = vmatpush3.bf16.msra.mxu1 %v10724_v43 }
0x2604   :  { %10290 = vmatprep.subr.bf16.mxu1 %v11044_v30 }
0x2607   :  { %10291 = vmatpush3.bf16.msra.mxu1 %v10725_v18 }
0x2608   :  { %10292 = vmatprep.subr.bf16.mxu1 %v11044_v30 }
0x260b   :  { %10293 = vmatpush3.bf16.msra.mxu1 %v10726_v33 }
0x260c   :  { %10294 = vmatprep.subr.bf16.mxu1 %v11044_v30 }
0x260f   :  { %10295 = vmatpush3.bf16.msra.mxu1 %v10727_v45 }
0x2610   :  { %10296 = vmatprep.subr.bf16.mxu1 %v11044_v30 }
0x2613   :  { %10297 = vmatpush3.bf16.msra.mxu1 %v10728_v37 }
0x2614   :  { %10298 = vmatprep.subr.bf16.mxu1 %v11044_v30 }
0x2617   :  { %10299 = vmatpush3.bf16.msra.mxu1 %v10729_v47  ;;  %v9244_v47 = vld [vmem:[%s12877_s9] ss:$0 sm:$0xff] }
0x2618   :  { %10300 = vmatprep.subr.bf16.mxu1 %v11044_v30 }
0x261b   :  { %10301 = vmatpush3.bf16.msra.mxu1 %v10730_v3 }
0x261c   :  { %8065 = vmatprep.subr.bf16.mxu1 %v10736_v59  ;;  %v10783_v59 = vld [vmem:[#allocation4 + $0x70] ss:$24 sps:$4 sm:$0xff]  }
0x26d1   :  { %v7585_v10 = vpop.f32.mrb[124].mxu1 }
0x26d2   :  { %v7589_v35 = vpack.c.bf16 %v7585_v10, %v7431_v7  ;;  %v10285_v0 = vpop.f32.mrb[125].mxu1  ;;  %v10763_v7 = vld [vmem:[#allocation4 + $0xf4] ss:$24 sps:$4 sm:$0xff]  }
0x26d4   :  { %10303 = vmatmul.mubr.bf16.vlgmr.msra.gmra.mrb[128].mxu1 %v7589_v35 }
0x26d5   :  { %8097 = vmatprep.mubr.bf16.mxu1 %v11045_v61  ;;  %v10737_v61 = vld [vmem:[#allocation4 + $0x30] ss:$24 sps:$4 sm:$0xff]   ;;  %8066 = vmatpush1.bf16.msra.mxu1 %v10734_v55  ;;  %v10782_v55 = vld [vmem:[#allocation4 + $0x44] ss:$24 sps:$4 sm:$0xff]  }
0x26d6   :  { %8067 = vmatprep.subr.bf16.mxu1 %v10742_v57  ;;  %8025 = vmatpush1.bf16.msra.mxu0 %v10737_v61  ;;  %v10785_v57 = vld [vmem:[#allocation4 + $0xa0] ss:$24 sps:$4 sm:$0xff]   ;;  %v10786_v61 = vld [vmem:[#allocation4 + $0xa4] ss:$24 sps:$4 sm:$0xff]  }
0x26d7   :  { %8026 = vmatprep.subr.bf16.mxu0 %v10745_v26  ;;  %v10797_v26 = vld [vmem:[#allocation6 + $0xc0] sm:$0xff]  }
0x26da   :  { %8027 = vmatpush1.bf16.msra.mxu0 %v10743_v51  ;;  %v10798_v51 = vld [vmem:[#allocation6 + $0x80] sm:$0xff]  }
0x26db   :  { %8028 = vmatprep.subr.bf16.mxu0 %v10751_v32  ;;  %v10801_v32 = vld [vmem:[#allocation6 + $0xc8] sm:$0xff]  }
0x26de   :  { %8029 = vmatpush1.bf16.msra.mxu0 %v10749_v36  ;;  %v10802_v36 = vld [vmem:[#allocation6 + $0x88] sm:$0xff]  }
0x26df   :  { %8030 = vmatprep.subr.bf16.mxu0 %v10757_v2  ;;  %v10805_v2 = vld [vmem:[#allocation6 + $0xd0] sm:$0xff]  }
0x26e2   :  { %8031 = vmatpush1.bf16.msra.mxu0 %v10755_v9  ;;  %v10806_v9 = vld [vmem:[#allocation6 + $0x90] sm:$0xff]  }
0x26e3   :  { %8032 = vmatprep.subr.bf16.mxu0 %v10763_v7  ;;  %v10809_v7 = vld [vmem:[#allocation6 + $0xd8] sm:$0xff]  }
0x26e6   :  { %8033 = vmatpush1.bf16.msra.mxu0 %v10761_v14  ;;  %v10810_v14 = vld [vmem:[#allocation6 + $0x98] sm:$0xff]  }
0x26e7   :  { %8034 = vmatprep.subr.bf16.mxu0 %v10769_v27  ;;  %v10813_v27 = vld [vmem:[#allocation6 + $0xe0] sm:$0xff]  }
0x26ea   :  { %8035 = vmatpush1.bf16.msra.mxu0 %v10767_v24  ;;  %v10814_v24 = vld [vmem:[#allocation6 + $0xa0] sm:$0xff]  }
0x26eb   :  { %8036 = vmatprep.subr.bf16.mxu0 %v10775_v29  ;;  %v10817_v29 = vld [vmem:[#allocation6 + $0xe8] sm:$0xff]  }
0x26ee   :  { %8037 = vmatpush1.bf16.msra.mxu0 %v10773_v31  ;;  %v10816_v31 = vld [vmem:[#allocation6 + $0x28] sm:$0xff]  }
0x26ef   :  { %10306 = vmatprep.subr.bf16.mxu0 %v11044_v30 }
0x27a7   :  { %v7672_v11 = vpop.f32.mrb[128].mxu1 }
0x27a8   :  { %v7679_v48 = vadd.f32 %v7672_v11, %v12712_v42  ;;  %v10304_v20 = vpop.f32.mrb[129].mxu1  ;;  %v10740_v42 = vld [vmem:[#allocation4 + $0x38] ss:$24 sps:$4 sm:$0xff]   ;;  %v9245_v11 = vld [vmem:[%s12877_s9 + $0x1] ss:$0 sm:$0xff] }
0x27a9   :  { %v7675_v22 = vpop.f32.mrb[130].mxu1  ;;  %8068 = vmatpush1.bf16.msra.mxu1 %v10740_v42  ;;  %v10787_v42 = vld [vmem:[#allocation4 + $0xd0] ss:$24 sps:$4 sm:$0xff]  }
0x27aa   :  { %v7680_v53 = vadd.f32 %v7675_v22, %v12714_v52  ;;  %7685 = vadd.xlane.f32.xlu0 %v7679_v48  ;;  %v10305_v46 = vpop.f32.mrb[131].mxu1  ;;  %8069 = vmatprep.subr.bf16.mxu1 %v10748_v28  ;;  %v10796_v28 = vld [vmem:[#allocation6] sm:$0xff]  }
0x27ab   :  { %v10780_v46 = vld [vmem:[#allocation4 + $0x14] ss:$24 sps:$4 sm:$0xff]  }
0x27ac   :  { %7687 = vadd.xlane.f32.xlu1 %v7680_v53 }
0x27ad   :  { %8070 = vmatpush1.bf16.msra.mxu1 %v10746_v13  ;;  %v10799_v13 = vld [vmem:[#allocation6 + $0x48] sm:$0xff]  }
0x27ae   :  { %8071 = vmatprep.subr.bf16.mxu1 %v10754_v41  ;;  %v10800_v41 = vld [vmem:[#allocation6 + $0x8] sm:$0xff]  }
0x27b1   :  { %8072 = vmatpush1.bf16.msra.mxu1 %v10752_v44  ;;  %v10803_v44 = vld [vmem:[#allocation6 + $0x50] sm:$0xff]  }
0x27b2   :  { %8073 = vmatprep.subr.bf16.mxu1 %v10760_v8  ;;  %v10804_v8 = vld [vmem:[#allocation6 + $0x10] sm:$0xff]  }
0x27b5   :  { %8074 = vmatpush1.bf16.msra.mxu1 %v10758_v39  ;;  %v10807_v39 = vld [vmem:[#allocation6 + $0x58] sm:$0xff]  }
0x27b6   :  { %8075 = vmatprep.subr.bf16.mxu1 %v10766_v12  ;;  %v10808_v12 = vld [vmem:[#allocation6 + $0x18] sm:$0xff]  }
0x27b9   :  { %8076 = vmatpush1.bf16.msra.mxu1 %v10764_v15  ;;  %v10811_v15 = vld [vmem:[#allocation6 + $0x60] sm:$0xff]  }
0x27ba   :  { %8077 = vmatprep.subr.bf16.mxu1 %v10772_v23  ;;  %v10812_v23 = vld [vmem:[#allocation6 + $0x20] sm:$0xff]  }
0x27bd   :  { %8078 = vmatpush1.bf16.msra.mxu1 %v10770_v4  ;;  %v10815_v4 = vld [vmem:[#allocation6 + $0x68] sm:$0xff]  }
0x27be   :  { %8079 = vmatprep.subr.bf16.mxu1 %v10778_v25  ;;  %v10819_v25 = vld [vmem:[#allocation6 + $0x70] sm:$0xff]  }
0x27c1   :  { %8080 = vmatpush1.bf16.msra.mxu1 %v10776_v49  ;;  %v10818_v49 = vld [vmem:[#allocation6 + $0xa8] sm:$0xff]  }
0x27c2   :  { %10326 = vmatprep.subr.bf16.mxu1 %v11044_v30 }
0x2837   :  { %v7686_v52 = vpop.xlane.xlu0 %7685 }
0x2838   :  { %v7689_v62 = vmul.f32 0.0078125, %v7686_v52  ;;  %v10788_v52 = vld [vmem:[#allocation4 + $0xd4] ss:$24 sps:$4 sm:$0xff]  }
0x2839   :  { %v7688_v50 = vpop.xlane.xlu1 %7687 }
0x283a   :  { %v12805_v60 = vsub.f32 %v7679_v48, %v7689_v62  ;;  %v7690_v63 = vmul.f32 0.0078125, %v7688_v50  ;;  %v10789_v62 = vld [vmem:[#allocation4 + $0x100] ss:$24 sps:$4 sm:$0xff]   ;;  %v10790_v50 = vld [vmem:[#allocation4 + $0x104] ss:$24 sps:$4 sm:$0xff]  }
0x283c   :  { %v12807_v1 = vsub.f32 %v7680_v53, %v7690_v63  ;;  %v7693_v6 = vmul.f32 %v12805_v60, %v12805_v60  ;;  %v10779_v53 = vld [vmem:[#allocation4 + $0x10] ss:$24 sps:$4 sm:$0xff]   ;;  %v10792_v63 = vld [vmem:[#allocation4 + $0x134] ss:$24 sps:$4 sm:$0xff]  }
0x283e   :  { %7695 = vadd.xlane.f32.xlu0 %v7693_v6  ;;  %v7694_v5 = vmul.f32 %v12807_v1, %v12807_v1  ;;  %v10794_v6 = vld [vmem:[#allocation4 + $0x164] ss:$24 sps:$4 sm:$0xff]  }
0x2840   :  { %7697 = vadd.xlane.f32.xlu1 %v7694_v5  ;;  %v10795_v5 = vld [vmem:[#allocation6 + $0x40] sm:$0xff]  }
0x28cb   :  { %v7696_v38 = vpop.xlane.xlu0 %7695 }
0x28cc   :  { %v7699_v40 = vmul.f32 0.0078125, %v7696_v38  ;;  %v10820_v38 = vld [vmem:[#allocation6 + $0x30] sm:$0xff]  }
0x28cd   :  { %v7698_v43 = vpop.xlane.xlu1 %7697 }
0x28ce   :  { %v7701_v18 = vadd.f32 1e-06, %v7699_v40  ;;  %v7700_v33 = vmul.f32 0.0078125, %v7698_v43  ;;  %v10821_v40 = vld [vmem:[#allocation6 + $0xf0] sm:$0xff]  }
0x28cf   :  { %v10822_v43 = vld [vmem:[#allocation6 + $0xb0] sm:$0xff]  }
0x28d0   :  { %10963 = vrsqrt.f32 %v7701_v18  ;;  %v7702_v45 = vadd.f32 1e-06, %v7700_v33  ;;  %v10823_v18 = vld [vmem:[#allocation6 + $0x78] sm:$0xff]  }
0x28d1   :  { %v10824_v33 = vld [vmem:[#allocation6 + $0x38] sm:$0xff]  }
0x28d2   :  { %10965 = vrsqrt.f32 %v7702_v45  ;;  %v10825_v45 = vld [vmem:[#allocation6 + $0xf8] sm:$0xff]  }
0x28da   :  { %v10964_v37 = vpop.eup %10963 }
0x28db   :  { %v7705_v3 = vmul.f32 %v10964_v37, %v12805_v60  ;;  %v10791_v60 = vld [vmem:[#allocation4 + $0x130] ss:$24 sps:$4 sm:$0xff]   ;;  %v10826_v37 = vld [vmem:[#allocation6 + $0xb8] sm:$0xff]  }
0x28dc   :  { %v10966_v10 = vpop.eup %10965 }
0x28dd   :  { %v7706_v35 = vmul.f32 %v10966_v10, %v12807_v1  ;;  %v7713_v0 = vmul.f32 %v9244_v47, %v7705_v3  ;;  %v10793_v1 = vld [vmem:[#allocation4 + $0x160] ss:$24 sps:$4 sm:$0xff]  }
0x28df   :  { %v7714_v48 = vmul.f32 %v9244_v47, %v7706_v35  ;;  %v7721_v20 = vadd.f32 %v9245_v11, %v7713_v0  ;;  %v7683_v47 = vld [vmem:[%s12877_s9 + $0x2] sm:$0x1f] }
0x28e0   :  { %v7792_v3 = vrot.slane %v7683_v47, %v11303_v17  ;;  %v7800_v10 = vrot.slane %v7683_v47, %v11313_v21  ;;  %v7796_v35 = vrot.slane %v7683_v47, %v11309_v19  ;;  %v7804_v0 = vrot.slane %v7683_v47, %v11775_v58 }
0x28e1   :  { %v7722_v22 = vadd.f32 %v9245_v11, %v7714_v48 }
0x28e3   :  { %v7787_v54 = vpack.c.bf16 %v7722_v22, %v7721_v20 }
0x28e5   :  { %8055 = vmatmul.mubr.bf16.vlgmr.msra.gmra.mrb[108].mxu0 %v7787_v54  ;;  %8098 = vmatmul.mubr.bf16.vlgmr.msra.gmra.mrb[132].mxu1 %v7787_v54 }
0x28e6   :  { %10307 = vmatpush3.bf16.msra.mxu0 %v10779_v53  ;;  %10327 = vmatpush3.bf16.msra.mxu1 %v10780_v46 }
0x28e7   :  { %10308 = vmatprep.subr.bf16.mxu0 %v11044_v30  ;;  %10328 = vmatprep.subr.bf16.mxu1 %v11044_v30 }
0x28e8   :  { %10322 = vmatprep.mubr.msk.bf16.mxu0 %vm11046_vm0, %v11044_v30  ;;  %10342 = vmatprep.mubr.msk.bf16.mxu1 %vm11046_vm0, %v11044_v30 }
0x28ea   :  { %10309 = vmatpush3.bf16.msra.mxu0 %v10781_v56  ;;  %10329 = vmatpush3.bf16.msra.mxu1 %v10782_v55 }
0x28eb   :  { %10310 = vmatprep.subr.bf16.mxu0 %v11044_v30  ;;  %10330 = vmatprep.subr.bf16.mxu1 %v11044_v30 }
0x28ee   :  { %10311 = vmatpush3.bf16.msra.mxu0 %v10783_v59  ;;  %10331 = vmatpush3.bf16.msra.mxu1 %v10784_v34 }
0x28ef   :  { %10312 = vmatprep.subr.bf16.mxu0 %v11044_v30  ;;  %10332 = vmatprep.subr.bf16.mxu1 %v11044_v30 }
0x28f2   :  { %10313 = vmatpush3.bf16.msra.mxu0 %v10785_v57  ;;  %10333 = vmatpush3.bf16.msra.mxu1 %v10786_v61 }
0x28f3   :  { %10314 = vmatprep.subr.bf16.mxu0 %v11044_v30  ;;  %10334 = vmatprep.subr.bf16.mxu1 %v11044_v30 }
0x28f6   :  { %10315 = vmatpush3.bf16.msra.mxu0 %v10787_v42  ;;  %10335 = vmatpush3.bf16.msra.mxu1 %v10788_v52 }
0x28f7   :  { %10316 = vmatprep.subr.bf16.mxu0 %v11044_v30  ;;  %10336 = vmatprep.subr.bf16.mxu1 %v11044_v30 }
0x28fa   :  { %10317 = vmatpush3.bf16.msra.mxu0 %v10789_v62  ;;  %10337 = vmatpush3.bf16.msra.mxu1 %v10790_v50 }
0x28fb   :  { %10318 = vmatprep.subr.bf16.mxu0 %v11044_v30  ;;  %10338 = vmatprep.subr.bf16.mxu1 %v11044_v30 }
0x28fe   :  { %10319 = vmatpush3.bf16.msra.mxu0 %v10791_v60  ;;  %10339 = vmatpush3.bf16.msra.mxu1 %v10792_v63 }
0x28ff   :  { %10320 = vmatprep.subr.bf16.mxu0 %v11044_v30  ;;  %10340 = vmatprep.subr.bf16.mxu1 %v11044_v30 }
0x2902   :  { %10321 = vmatpush3.bf16.msra.mxu0 %v10793_v1  ;;  %10341 = vmatpush3.bf16.msra.mxu1 %v10794_v6 }
0x2903   :  { %9725 = vmatprep.subr.bf16.mxu0 %v10795_v5  ;;  %9747 = vmatprep.subr.bf16.mxu1 %v10797_v26 }
0x2905   :  { %10323 = vmatmul.mubr.bf16.vlgmr.msra.gmra.mrb[112].mxu0 %v7787_v54  ;;  %10343 = vmatmul.mubr.bf16.vlgmr.msra.gmra.mrb[136].mxu1 %v7787_v54 }
0x2906   :  { %9726 = vmatpush3.bf16.msra.mxu0 %v10796_v28  ;;  %9748 = vmatpush3.bf16.msra.mxu1 %v10798_v51  ;;  %v10827_v51 = vld [vmem:[#allocation6 + $0x100] sm:$0xff]  }
0x2907   :  { %9727 = vmatprep.subr.bf16.mxu0 %v10799_v13  ;;  %9749 = vmatprep.subr.bf16.mxu1 %v10801_v32  ;;  %v10828_v13 = vld [vmem:[#allocation6 + $0x108] sm:$0xff]   ;;  %v10829_v32 = vld [vmem:[#allocation6 + $0x110] sm:$0xff]  }
0x290a   :  { %9728 = vmatpush3.bf16.msra.mxu0 %v10800_v41  ;;  %9750 = vmatpush3.bf16.msra.mxu1 %v10802_v36  ;;  %v10830_v41 = vld [vmem:[#allocation6 + $0x118] sm:$0xff]   ;;  %v10831_v36 = vld [vmem:[#allocation6 + $0x120] sm:$0xff]  }
0x290b   :  { %9729 = vmatprep.subr.bf16.mxu0 %v10803_v44  ;;  %9751 = vmatprep.subr.bf16.mxu1 %v10805_v2  ;;  %v7807_v44 = vsub.s32 4, %v11300_v16  ;;  %v10832_v2 = vld [vmem:[#allocation6 + $0x128] sm:$0xff]   ;;  %v10834_v16 = vld [vmem:[#allocation6 + $0x138] sm:$0xff]  }
0x290e   :  { %9730 = vmatpush3.bf16.msra.mxu0 %v10804_v8  ;;  %9752 = vmatpush3.bf16.msra.mxu1 %v10806_v9  ;;  %v7808_v8 = vrot.slane %v7683_v47, %v7807_v44 }
0x290f   :  { %9731 = vmatprep.subr.bf16.mxu0 %v10807_v39  ;;  %9753 = vmatprep.subr.bf16.mxu1 %v10809_v7  ;;  %v10833_v7 = vld [vmem:[#allocation6 + $0x130] sm:$0xff]  }
0x2912   :  { %9732 = vmatpush3.bf16.msra.mxu0 %v10808_v12  ;;  %9754 = vmatpush3.bf16.msra.mxu1 %v10810_v14 }
0x2913   :  { %9733 = vmatprep.subr.bf16.mxu0 %v10811_v15  ;;  %9755 = vmatprep.subr.bf16.mxu1 %v10813_v27 }
0x2916   :  { %9734 = vmatpush3.bf16.msra.mxu0 %v10812_v23  ;;  %9756 = vmatpush3.bf16.msra.mxu1 %v10814_v24 }
0x2917   :  { %9735 = vmatprep.subr.bf16.mxu0 %v10815_v4  ;;  %9757 = vmatprep.subr.bf16.mxu1 %v10817_v29 }
0x291a   :  { %9736 = vmatpush3.bf16.msra.mxu0 %v10816_v31  ;;  %9758 = vmatpush3.bf16.msra.mxu1 %v10818_v49 }
0x291b   :  { %9737 = vmatprep.subr.bf16.mxu0 %v10819_v25  ;;  %9759 = vmatprep.subr.bf16.mxu1 %v10821_v40 }
0x291e   :  { %9738 = vmatpush3.bf16.msra.mxu0 %v10820_v38  ;;  %9760 = vmatpush3.bf16.msra.mxu1 %v10822_v43 }
0x291f   :  { %9739 = vmatprep.subr.bf16.mxu0 %v10823_v18  ;;  %9761 = vmatprep.subr.bf16.mxu1 %v10825_v45 }
0x2922   :  { %9740 = vmatpush3.bf16.msra.mxu0 %v10824_v33  ;;  %9762 = vmatpush3.bf16.msra.mxu1 %v10826_v37 }
0x2923   :  { %10346 = vmatprep.subr.bf16.mxu0 %v11044_v30 }
0x29b8   :  { %v8056_v11 = vpop.f32.mrb[108].mxu0  ;;  %v8099_v48 = vpop.f32.mrb[132].mxu1 }
0x29b9   :  { %v8057_v20 = vadd.f32 %v8056_v11, %v7792_v3  ;;  %v8100_v22 = vadd.f32 %v8099_v48, %v7800_v10  ;;  %v8058_v53 = vpop.f32.mrb[109].mxu0  ;;  %v8101_v46 = vpop.f32.mrb[133].mxu1 }
0x29ba   :  { %v8059_v54 = vadd.f32 %v8058_v53, %v7796_v35  ;;  %v8102_v56 = vadd.f32 %v8101_v46, %v7804_v0  ;;  %v8060_v55 = vpop.f32.mrb[110].mxu0  ;;  %v8103_v59 = vpop.f32.mrb[134].mxu1 }
0x29bb   :  { %v8061_v34 = vadd.f32 %v8060_v55, %v7792_v3  ;;  %v8104_v57 = vadd.f32 %v8103_v59, %v7800_v10  ;;  %v8062_v61 = vpop.f32.mrb[111].mxu0  ;;  %v8105_v17 = vpop.f32.mrb[135].mxu1  ;;  %v8149_v52 = vmax.f32 %v8057_v20, 0.0  ;;  %v8151_v19 = vmax.f32 %v8100_v22, 0.0 }
0x29bc   :  { %v8063_v42 = vadd.f32 %v8062_v61, %v7796_v35  ;;  %v8106_v21 = vadd.f32 %v8105_v17, %v7804_v0  ;;  %v8150_v50 = vmax.f32 %v8059_v54, 0.0  ;;  %v8152_v60 = vmax.f32 %v8102_v56, 0.0 }
0x29bd   :  { %v8154_v62 = vmax.f32 %v8061_v34, 0.0  ;;  %v8156_v58 = vmax.f32 %v8104_v57, 0.0 }
0x29be   :  { %v8155_v63 = vmax.f32 %v8063_v42, 0.0  ;;  %v8157_v1 = vmax.f32 %v8106_v21, 0.0 }
0x29bf   :  { %v8159_v6 = vpack.c.bf16 %v8154_v62, %v8149_v52  ;;  %v8161_v5 = vpack.c.bf16 %v8156_v58, %v8151_v19 }
0x29c0   :  { %v8160_v26 = vpack.c.bf16 %v8155_v63, %v8150_v50  ;;  %v8162_v28 = vpack.c.bf16 %v8157_v1, %v8152_v60 }
0x29c2   :  { %8605 = vmatprep.mubr.bf16.mxu0 %v8160_v26  ;;  %8646 = vmatprep.mubr.bf16.mxu1 %v8162_v28 }
0x29c3   :  { %8606 = vmatmul.mubr.bf16.vlgmr.msra.gmra.mrb[116].mxu0 %v8159_v6  ;;  %8647 = vmatmul.mubr.bf16.vlgmr.msra.gmra.mrb[140].mxu1 %v8161_v5 }
0x29c4   :  { %10347 = vmatpush3.bf16.msra.mxu0 %v10827_v51  ;;  %10362 = vmatprep.mubr.msk.bf16.mxu0 %vm11046_vm0, %v11044_v30 }
0x29c5   :  { %10348 = vmatprep.subr.bf16.mxu0 %v11044_v30 }
0x29c8   :  { %10349 = vmatpush3.bf16.msra.mxu0 %v10828_v13 }
0x29c9   :  { %10350 = vmatprep.subr.bf16.mxu0 %v11044_v30 }
0x29cc   :  { %10351 = vmatpush3.bf16.msra.mxu0 %v10829_v32 }
0x29cd   :  { %10352 = vmatprep.subr.bf16.mxu0 %v11044_v30 }
0x29d0   :  { %10353 = vmatpush3.bf16.msra.mxu0 %v10830_v41 }
0x29d1   :  { %10354 = vmatprep.subr.bf16.mxu0 %v11044_v30 }
0x29d4   :  { %10355 = vmatpush3.bf16.msra.mxu0 %v10831_v36 }
0x29d5   :  { %10356 = vmatprep.subr.bf16.mxu0 %v11044_v30 }
0x29d8   :  { %v8142_v9 = vpop.f32.mrb[112].mxu0  ;;  %v8326_v39 = vpop.f32.mrb[136].mxu1  ;;  %10357 = vmatpush3.bf16.msra.mxu0 %v10832_v2 }
0x29d9   :  { %v8143_v12 = vadd.f32 %v8142_v9, %v7808_v8  ;;  %v10324_v14 = vpop.f32.mrb[113].mxu0  ;;  %v10344_v15 = vpop.f32.mrb[137].mxu1  ;;  %10358 = vmatprep.subr.bf16.mxu0 %v11044_v30 }
0x29da   :  { %v8145_v27 = vpop.f32.mrb[114].mxu0  ;;  %v8329_v23 = vpop.f32.mrb[138].mxu1 }
0x29db   :  { %v8146_v24 = vadd.f32 %v8145_v27, %v7808_v8  ;;  %v10325_v4 = vpop.f32.mrb[115].mxu0  ;;  %v10345_v29 = vpop.f32.mrb[139].mxu1  ;;  %v8153_v31 = vmax.f32 %v8143_v12, 0.0 }
0x29dc   :  { %10359 = vmatpush3.bf16.msra.mxu0 %v10833_v7 }
0x29dd   :  { %v8158_v49 = vmax.f32 %v8146_v24, 0.0  ;;  %10360 = vmatprep.subr.bf16.mxu0 %v11044_v30  ;;  %v9334_v30 = vld [vmem:[%s12877_s9 + $0x7] ss:$0 sm:$0xff] }
0x29df   :  { %v8163_v25 = vpack.c.bf16 %v8158_v49, %v8153_v31 }
0x29e0   :  { %10361 = vmatpush3.bf16.msra.mxu0 %v10834_v16 }
0x29e3   :  { %10363 = vmatmul.mubr.bf16.vlgmr.msra.gmra.mrb[120].mxu0 %v8163_v25 }
0x2a96   :  { %v9741_v38 = vpop.f32.mrb[116].mxu0  ;;  %v9763_v40 = vpop.f32.mrb[140].mxu1 }
0x2a97   :  { %v9742_v43 = vpop.f32.mrb[117].mxu0  ;;  %v9764_v18 = vpop.f32.mrb[141].mxu1 }
0x2a98   :  { %v9743_v33 = vadd.f32 %v9742_v43, %v9741_v38  ;;  %v9765_v45 = vadd.f32 %v9764_v18, %v9763_v40  ;;  %v9744_v37 = vpop.f32.mrb[118].mxu0  ;;  %v9766_v47 = vpop.f32.mrb[142].mxu1 }
0x2a99   :  { %v9745_v3 = vpop.f32.mrb[119].mxu0  ;;  %v9767_v10 = vpop.f32.mrb[143].mxu1 }
0x2a9a   :  { %v8608_v35 = vadd.f32 %v9743_v33, %v8326_v39  ;;  %v9746_v0 = vadd.f32 %v9745_v3, %v9744_v37  ;;  %v9768_v11 = vadd.f32 %v9767_v10, %v9766_v47 }
0x2a9c   :  { %v8611_v48 = vadd.f32 %v9746_v0, %v8329_v23  ;;  %v8649_v20 = vadd.f32 %v9765_v45, %v8608_v35 }
0x2a9e   :  { %v8652_v22 = vadd.f32 %v9768_v11, %v8611_v48 }
0x2ab6   :  { %v8689_v53 = vpop.f32.mrb[120].mxu0 }
0x2ab7   :  { %v8690_v46 = vadd.f32 %v8689_v53, %v8649_v20  ;;  %v10364_v54 = vpop.f32.mrb[121].mxu0 }
0x2ab8   :  { %v8692_v56 = vpop.f32.mrb[122].mxu0 }
0x2ab9   :  { %v8702_v55 = vadd.f32 %v9334_v30, %v8690_v46  ;;  %v8693_v59 = vadd.f32 %v8692_v56, %v8652_v22  ;;  %v10365_v34 = vpop.f32.mrb[123].mxu0 }
0x2abb   :  { %8704 = vst [vmem:[%s12878_s10] sm:$0xff] %v8702_v55  ;;  %v8703_v57 = vadd.f32 %v9334_v30, %v8693_v59 }
0x2abd   :  { %8705 = vst [vmem:[%s12878_s10 + $0x8] sm:$0xff] %v8703_v57 }
0x2abe   :  { %8710 = vsyncpa [#allocation3], 1 }
0x2abf   :  { %8711 = vsyncpa [#allocation5], 1 }

</bundles_post_ra>
